<compile_context>
chip_gen: v6e
topology: v6e:2x2x1
jax: 0.10.0
libtpu: 0.0.40
codegen_flags: <defaults>
</compile_context>

<pallas_src>
import functools

import jax
import jax.numpy as jnp
from jax.experimental import pallas as pl
from jax.experimental.pallas import tpu as pltpu


# ----------------------------------------------------------------------------
# Fused kernel: one batch element per grid step, everything resident in VMEM.
# ----------------------------------------------------------------------------
def _dc_branchl_kernel(x_ref, wm_ref, bm_ref, w1a_ref, b1a_ref, w1b_ref, b1b_ref,
                       w3s_ref, b3s_ref, w1s_ref, b1s_ref, wt_ref, bt_ref,
                       out_ref, pad_ref, patch_ref, *,
                       H, W, stride, num_module, masked_taps, dcl_taps):
    C = out_ref.shape[1]
    HW = H * W
    P = max(stride, 1)            # halo radius covering both conv paddings
    f32 = jnp.float32

    # Zero the padded scratch once; the interior is rewritten before every
    # spatial conv while the halo ring stays zero (acts as conv zero-padding).
    pad_ref[...] = jnp.zeros_like(pad_ref)

    def spatial_conv(act, w_cols, bias, pad, dil, taps):
        """'same' KxK dilated conv of lane-dense act (C, HW) -> (C, HW) f32."""
        ntaps = len(taps)
        if ntaps == 0:                       # degenerate (fully masked kernel)
            return jnp.zeros((C, HW), f32) + bias
        pad_ref[:, P:P + H, P:P + W] = act.reshape(C, H, W)
        xp = pad_ref[...]                    # (C, H+2P, W+2P)
        base = P - pad
        # im2col: assemble the patch matrix once, then a single MXU matmul
        # (contraction depth ntaps*C) instead of ntaps tiny depth-C matmuls.
        for t, (kh, kw) in enumerate(taps):
            r0 = base + kh * dil
            c0 = base + kw * dil
            patch_ref[t * C:(t + 1) * C, :] = (
                xp[:, r0:r0 + H, c0:c0 + W].reshape(C, HW))
        patch = patch_ref[0:ntaps * C, :]    # (ntaps*C, HW)
        return jnp.dot(w_cols, patch, preferred_element_type=f32) + bias

    act = x_ref[0].astype(f32)               # (C, HW), lane-dense

    # CentralMaskedConv2d (center tap statically skipped) + ReLU
    act = jnp.maximum(
        spatial_conv(act, wm_ref[...], bm_ref[...],
                     pad=stride - 1, dil=1, taps=masked_taps), 0.0)
    # Conv1x1 + ReLU, twice
    act = jnp.maximum(
        jnp.dot(w1a_ref[...], act, preferred_element_type=f32) + b1a_ref[...], 0.0)
    act = jnp.maximum(
        jnp.dot(w1b_ref[...], act, preferred_element_type=f32) + b1b_ref[...], 0.0)
    # DCl blocks: x + Conv1x1(ReLU(DilatedConv3x3(x)))  (residual is the
    # already-resident unpadded activation -> plain VPU add, no slicing)
    for m in range(num_module):
        h = jnp.maximum(
            spatial_conv(act, w3s_ref[m], b3s_ref[m],
                         pad=stride, dil=stride, taps=dcl_taps), 0.0)
        act = act + jnp.dot(w1s_ref[m], h,
                            preferred_element_type=f32) + b1s_ref[m]
    # tail Conv1x1 + ReLU
    act = jnp.maximum(
        jnp.dot(wt_ref[...], act, preferred_element_type=f32) + bt_ref[...], 0.0)

    out_ref[0] = act.astype(out_ref.dtype)


# ----------------------------------------------------------------------------
# Wrapper: weight re-layout (im2col columns) + one pallas_call for the forward.
# ----------------------------------------------------------------------------
def dc_branchl_forward(x, params, *, stride, num_module):
    N, C, H, W = x.shape
    HW = H * W
    K = 2 * stride - 1

    masked_taps = tuple((kh, kw) for kh in range(K) for kw in range(K)
                        if not (kh == K // 2 and kw == K // 2))
    dcl_taps = tuple((kh, kw) for kh in range(3) for kw in range(3))

    def im2col_w(w, taps):
        # (Cout, Cin, K, K) -> (Cout, ntaps*Cin); column order = tap-major,
        # channel-minor, matching the patch layout assembled inside the kernel.
        return jnp.concatenate([w[:, :, kh, kw] for (kh, kw) in taps], axis=1)

    wm = (im2col_w(params["w_masked"], masked_taps) if masked_taps
          else jnp.zeros((C, C), jnp.float32))
    bm = params["b_masked"]
    w1a, b1a = params["w1a"], params["b1a"]
    w1b, b1b = params["w1b"], params["b1b"]
    wt, bt = params["w_tail"], params["b_tail"]

    if num_module > 0:
        w3s = jnp.stack([im2col_w(d["w3"], dcl_taps) for d in params["dcl"]])
        b3s = jnp.stack([d["b3"] for d in params["dcl"]])
        w1s = jnp.stack([d["w1"] for d in params["dcl"]])
        b1s = jnp.stack([d["b1"] for d in params["dcl"]])
    else:  # dummies so block shapes stay non-empty; kernel loop never runs
        w3s = jnp.zeros((1, C, 9 * C), jnp.float32)
        b3s = jnp.zeros((1, C, 1), jnp.float32)
        w1s = jnp.zeros((1, C, C), jnp.float32)
        b1s = jnp.zeros((1, C, 1), jnp.float32)

    P = max(stride, 1)
    max_taps = max(len(masked_taps), len(dcl_taps), 1)

    x_flat = x.reshape(N, C, HW)              # lane-dense activations
    weights = (wm, bm, w1a, b1a, w1b, b1b, w3s, b3s, w1s, b1s, wt, bt)

    def rep_spec(a):                          # replicated (grid-invariant) arg
        zeros = (0,) * a.ndim
        return pl.BlockSpec(a.shape, lambda n, _z=zeros: _z)

    kern = functools.partial(
        _dc_branchl_kernel, H=H, W=W, stride=stride, num_module=num_module,
        masked_taps=masked_taps, dcl_taps=dcl_taps)

    out = pl.pallas_call(
        kern,
        out_shape=jax.ShapeDtypeStruct((N, C, HW), x.dtype),
        grid=(N,),
        in_specs=[pl.BlockSpec((1, C, HW), lambda n: (n, 0, 0))]
                 + [rep_spec(w) for w in weights],
        out_specs=pl.BlockSpec((1, C, HW), lambda n: (n, 0, 0)),
        scratch_shapes=[
            pltpu.VMEM((C, H + 2 * P, W + 2 * P), jnp.float32),  # padded act
            pltpu.VMEM((max_taps * C, HW), jnp.float32),         # im2col patch
        ],
        compiler_params=pltpu.CompilerParams(
            dimension_semantics=("parallel",)),
    )(x_flat, *weights)

    return out.reshape(N, C, H, W)


# ----------------------------------------------------------------------------
# Parameter init (deterministic, synthetic)
# ----------------------------------------------------------------------------
def init_params(key, in_ch, stride, num_module):
    K = 2 * stride - 1
    keys = iter(jax.random.split(key, 64))

    def w_(shape, scale=0.1):
        return (scale * jax.random.normal(next(keys), shape)).astype(jnp.float32)

    def b_(c):
        return (0.01 * jax.random.normal(next(keys), (c, 1))).astype(jnp.float32)

    p = {}
    # CentralMaskedConv2d: zero the center tap (mask semantics).
    w_masked = w_((in_ch, in_ch, K, K))
    w_masked = w_masked.at[:, :, K // 2, K // 2].set(0.0)
    p["w_masked"], p["b_masked"] = w_masked, b_(in_ch)
    p["w1a"], p["b1a"] = w_((in_ch, in_ch)), b_(in_ch)
    p["w1b"], p["b1b"] = w_((in_ch, in_ch)), b_(in_ch)
    p["dcl"] = []
    for _ in range(num_module):
        p["dcl"].append({
            "w3": w_((in_ch, in_ch, 3, 3)), "b3": b_(in_ch),
            "w1": w_((in_ch, in_ch)), "b1": b_(in_ch),
        })
    p["w_tail"], p["b_tail"] = w_((in_ch, in_ch)), b_(in_ch)
    return p


# ----------------------------------------------------------------------------
# Pure-JAX reference (correctness check only)
# ----------------------------------------------------------------------------
def _conv_ref(x, w4, b, pad, dil):
    y = jax.lax.conv_general_dilated(
        x, w4, window_strides=(1, 1),
        padding=((pad, pad), (pad, pad)), rhs_dilation=(dil, dil),
        dimension_numbers=("NCHW", "OIHW", "NCHW"))
    return y + b.reshape(1, -1, 1, 1)


def dc_branchl_ref(x, p, *, stride, num_module):
    relu = lambda t: jnp.maximum(t, 0.0)
    x = relu(_conv_ref(x, p["w_masked"], p["b_masked"], stride - 1, 1))
    x = relu(_conv_ref(x, p["w1a"][:, :, None, None], p["b1a"], 0, 1))
    x = relu(_conv_ref(x, p["w1b"][:, :, None, None], p["b1b"], 0, 1))
    for m in range(num_module):
        d = p["dcl"][m]
        h = relu(_conv_ref(x, d["w3"], d["b3"], stride, stride))
        x = x + _conv_ref(h, d["w1"][:, :, None, None], d["b1"], 0, 1)
    x = relu(_conv_ref(x, p["w_tail"][:, :, None, None], p["b_tail"], 0, 1))
    return x


# ----------------------------------------------------------------------------
if __name__ == "__main__":
    N, C, H, W = 2, 4, 16, 16
    stride, num_module = 2, 2

    key = jax.random.PRNGKey(0)
    k_x, k_p = jax.random.split(key)
    x = jax.random.normal(k_x, (N, C, H, W), dtype=jnp.float32)
    params = init_params(k_p, C, stride, num_module)

    out = dc_branchl_forward(x, params, stride=stride, num_module=num_module)
    out = jax.block_until_ready(out)

    ref = dc_branchl_ref(x, params, stride=stride, num_module=num_module)
    assert out.shape == (N, C, H, W)
    assert jnp.allclose(out, ref, atol=1e-4, rtol=1e-4), "mismatch vs JAX reference"

    print("KERNEL_OK")
</pallas_src>

<mosaic_0001>
module attributes {stable_mosaic.version = 11 : i64} {
  func.func @_dc_branchl_kernel(%arg0: i32, %arg1: memref<1x4x256xf32, #tpu.memory_space<vmem>>, %arg2: memref<4x32xf32, #tpu.memory_space<vmem>>, %arg3: memref<4x1xf32, #tpu.memory_space<vmem>>, %arg4: memref<4x4xf32, #tpu.memory_space<vmem>>, %arg5: memref<4x1xf32, #tpu.memory_space<vmem>>, %arg6: memref<4x4xf32, #tpu.memory_space<vmem>>, %arg7: memref<4x1xf32, #tpu.memory_space<vmem>>, %arg8: memref<2x4x36xf32, #tpu.memory_space<vmem>>, %arg9: memref<2x4x1xf32, #tpu.memory_space<vmem>>, %arg10: memref<2x4x4xf32, #tpu.memory_space<vmem>>, %arg11: memref<2x4x1xf32, #tpu.memory_space<vmem>>, %arg12: memref<4x4xf32, #tpu.memory_space<vmem>>, %arg13: memref<4x1xf32, #tpu.memory_space<vmem>>, %arg14: memref<1x4x256xf32, #tpu.memory_space<vmem>>, %arg15: memref<4x20x20xf32, #tpu.memory_space<vmem>>, %arg16: memref<36x256xf32, #tpu.memory_space<vmem>>) attributes {dimension_semantics = [#tpu.dimension_semantics<parallel>], iteration_bounds = array<i64: 2>, scalar_prefetch = 0 : i64, scratch_operands = 2 : i64, tpu.core_type = #tpu.core_type<tc>, window_params = [{transform_indices = @transform_0, window_bounds = array<i64: 1, 4, 256>}, {pipeline_mode = #tpu.pipeline_mode<synchronous>, transform_indices = @transform_1, window_bounds = array<i64: 4, 32>}, {pipeline_mode = #tpu.pipeline_mode<synchronous>, transform_indices = @transform_2, window_bounds = array<i64: 4, 1>}, {pipeline_mode = #tpu.pipeline_mode<synchronous>, transform_indices = @transform_3, window_bounds = array<i64: 4, 4>}, {pipeline_mode = #tpu.pipeline_mode<synchronous>, transform_indices = @transform_4, window_bounds = array<i64: 4, 1>}, {pipeline_mode = #tpu.pipeline_mode<synchronous>, transform_indices = @transform_5, window_bounds = array<i64: 4, 4>}, {pipeline_mode = #tpu.pipeline_mode<synchronous>, transform_indices = @transform_6, window_bounds = array<i64: 4, 1>}, {pipeline_mode = #tpu.pipeline_mode<synchronous>, transform_indices = @transform_7, window_bounds = array<i64: 2, 4, 36>}, {pipeline_mode = #tpu.pipeline_mode<synchronous>, transform_indices = @transform_8, window_bounds = array<i64: 2, 4, 1>}, {pipeline_mode = #tpu.pipeline_mode<synchronous>, transform_indices = @transform_9, window_bounds = array<i64: 2, 4, 4>}, {pipeline_mode = #tpu.pipeline_mode<synchronous>, transform_indices = @transform_10, window_bounds = array<i64: 2, 4, 1>}, {pipeline_mode = #tpu.pipeline_mode<synchronous>, transform_indices = @transform_11, window_bounds = array<i64: 4, 4>}, {pipeline_mode = #tpu.pipeline_mode<synchronous>, transform_indices = @transform_12, window_bounds = array<i64: 4, 1>}, {transform_indices = @transform_13, window_bounds = array<i64: 1, 4, 256>}]} {
    %cst = arith.constant 0.000000e+00 : f32
    %0 = vector.broadcast %cst : f32 to vector<4x20x20xf32>
    %c0 = arith.constant 0 : index
    %c0_0 = arith.constant 0 : index
    %c0_1 = arith.constant 0 : index
    %1 = vector.load %arg15[%c0, %c0_0, %c0_1] : memref<4x20x20xf32, #tpu.memory_space<vmem>>, vector<4x20x20xf32>
    tpu.vector_store %arg15[%c0, %c0_0, %c0_1], %0 {strides = array<i32>} : memref<4x20x20xf32, #tpu.memory_space<vmem>>, vector<4x20x20xf32>,
    %c0_2 = arith.constant 0 : index
    %c0_3 = arith.constant 0 : index
    %c0_4 = arith.constant 0 : index
    %2 = vector.load %arg1[%c0_2, %c0_3, %c0_4] : memref<1x4x256xf32, #tpu.memory_space<vmem>>, vector<1x4x256xf32>
    %3 = vector.shape_cast %2 : vector<1x4x256xf32> to vector<4x256xf32>
    %c0_5 = arith.constant 0 : index
    %c0_6 = arith.constant 0 : index
    %4 = vector.load %arg2[%c0_5, %c0_6] : memref<4x32xf32, #tpu.memory_space<vmem>>, vector<4x32xf32>
    %c0_7 = arith.constant 0 : index
    %c0_8 = arith.constant 0 : index
    %5 = vector.load %arg3[%c0_7, %c0_8] : memref<4x1xf32, #tpu.memory_space<vmem>>, vector<4x1xf32>
    %6 = vector.shape_cast %3 : vector<4x256xf32> to vector<4x16x16xf32>
    %c0_9 = arith.constant 0 : index
    %c2 = arith.constant 2 : index
    %c2_10 = arith.constant 2 : index
    %7 = vector.load %arg15[%c0_9, %c2, %c2_10] : memref<4x20x20xf32, #tpu.memory_space<vmem>>, vector<4x16x16xf32>
    tpu.vector_store %arg15[%c0_9, %c2, %c2_10], %6 {strides = array<i32>} : memref<4x20x20xf32, #tpu.memory_space<vmem>>, vector<4x16x16xf32>,
    %c0_11 = arith.constant 0 : index
    %c0_12 = arith.constant 0 : index
    %c0_13 = arith.constant 0 : index
    %8 = vector.load %arg15[%c0_11, %c0_12, %c0_13] : memref<4x20x20xf32, #tpu.memory_space<vmem>>, vector<4x20x20xf32>
    %9 = vector.extract_strided_slice %8 {offsets = [0, 1, 1], sizes = [4, 16, 16], strides = [1, 1, 1]} : vector<4x20x20xf32> to vector<4x16x16xf32>
    %10 = vector.shape_cast %9 : vector<4x16x16xf32> to vector<4x256xf32>
    %c0_14 = arith.constant 0 : index
    %c0_15 = arith.constant 0 : index
    %11 = vector.load %arg16[%c0_14, %c0_15] : memref<36x256xf32, #tpu.memory_space<vmem>>, vector<4x256xf32>
    tpu.vector_store %arg16[%c0_14, %c0_15], %10 {strides = array<i32>} : memref<36x256xf32, #tpu.memory_space<vmem>>, vector<4x256xf32>,
    %12 = vector.extract_strided_slice %8 {offsets = [0, 1, 2], sizes = [4, 16, 16], strides = [1, 1, 1]} : vector<4x20x20xf32> to vector<4x16x16xf32>
    %13 = vector.shape_cast %12 : vector<4x16x16xf32> to vector<4x256xf32>
    %c4 = arith.constant 4 : index
    %c0_16 = arith.constant 0 : index
    %14 = vector.load %arg16[%c4, %c0_16] : memref<36x256xf32, #tpu.memory_space<vmem>>, vector<4x256xf32>
    tpu.vector_store %arg16[%c4, %c0_16], %13 {strides = array<i32>} : memref<36x256xf32, #tpu.memory_space<vmem>>, vector<4x256xf32>,
    %15 = vector.extract_strided_slice %8 {offsets = [0, 1, 3], sizes = [4, 16, 16], strides = [1, 1, 1]} : vector<4x20x20xf32> to vector<4x16x16xf32>
    %16 = vector.shape_cast %15 : vector<4x16x16xf32> to vector<4x256xf32>
    %c8 = arith.constant 8 : index
    %c0_17 = arith.constant 0 : index
    %17 = vector.load %arg16[%c8, %c0_17] : memref<36x256xf32, #tpu.memory_space<vmem>>, vector<4x256xf32>
    tpu.vector_store %arg16[%c8, %c0_17], %16 {strides = array<i32>} : memref<36x256xf32, #tpu.memory_space<vmem>>, vector<4x256xf32>,
    %18 = vector.extract_strided_slice %8 {offsets = [0, 2, 1], sizes = [4, 16, 16], strides = [1, 1, 1]} : vector<4x20x20xf32> to vector<4x16x16xf32>
    %19 = vector.shape_cast %18 : vector<4x16x16xf32> to vector<4x256xf32>
    %c12 = arith.constant 12 : index
    %c0_18 = arith.constant 0 : index
    %20 = vector.load %arg16[%c12, %c0_18] : memref<36x256xf32, #tpu.memory_space<vmem>>, vector<4x256xf32>
    tpu.vector_store %arg16[%c12, %c0_18], %19 {strides = array<i32>} : memref<36x256xf32, #tpu.memory_space<vmem>>, vector<4x256xf32>,
    %21 = vector.extract_strided_slice %8 {offsets = [0, 2, 3], sizes = [4, 16, 16], strides = [1, 1, 1]} : vector<4x20x20xf32> to vector<4x16x16xf32>
    %22 = vector.shape_cast %21 : vector<4x16x16xf32> to vector<4x256xf32>
    %c16 = arith.constant 16 : index
    %c0_19 = arith.constant 0 : index
    %23 = vector.load %arg16[%c16, %c0_19] : memref<36x256xf32, #tpu.memory_space<vmem>>, vector<4x256xf32>
    tpu.vector_store %arg16[%c16, %c0_19], %22 {strides = array<i32>} : memref<36x256xf32, #tpu.memory_space<vmem>>, vector<4x256xf32>,
    %24 = vector.extract_strided_slice %8 {offsets = [0, 3, 1], sizes = [4, 16, 16], strides = [1, 1, 1]} : vector<4x20x20xf32> to vector<4x16x16xf32>
    %25 = vector.shape_cast %24 : vector<4x16x16xf32> to vector<4x256xf32>
    %c20 = arith.constant 20 : index
    %c0_20 = arith.constant 0 : index
    %26 = vector.load %arg16[%c20, %c0_20] : memref<36x256xf32, #tpu.memory_space<vmem>>, vector<4x256xf32>
    tpu.vector_store %arg16[%c20, %c0_20], %25 {strides = array<i32>} : memref<36x256xf32, #tpu.memory_space<vmem>>, vector<4x256xf32>,
    %27 = vector.extract_strided_slice %8 {offsets = [0, 3, 2], sizes = [4, 16, 16], strides = [1, 1, 1]} : vector<4x20x20xf32> to vector<4x16x16xf32>
    %28 = vector.shape_cast %27 : vector<4x16x16xf32> to vector<4x256xf32>
    %c24 = arith.constant 24 : index
    %c0_21 = arith.constant 0 : index
    %29 = vector.load %arg16[%c24, %c0_21] : memref<36x256xf32, #tpu.memory_space<vmem>>, vector<4x256xf32>
    tpu.vector_store %arg16[%c24, %c0_21], %28 {strides = array<i32>} : memref<36x256xf32, #tpu.memory_space<vmem>>, vector<4x256xf32>,
    %30 = vector.extract_strided_slice %8 {offsets = [0, 3, 3], sizes = [4, 16, 16], strides = [1, 1, 1]} : vector<4x20x20xf32> to vector<4x16x16xf32>
    %31 = vector.shape_cast %30 : vector<4x16x16xf32> to vector<4x256xf32>
    %c28 = arith.constant 28 : index
    %c0_22 = arith.constant 0 : index
    %32 = vector.load %arg16[%c28, %c0_22] : memref<36x256xf32, #tpu.memory_space<vmem>>, vector<4x256xf32>
    tpu.vector_store %arg16[%c28, %c0_22], %31 {strides = array<i32>} : memref<36x256xf32, #tpu.memory_space<vmem>>, vector<4x256xf32>,
    %c0_23 = arith.constant 0 : index
    %c0_24 = arith.constant 0 : index
    %33 = vector.load %arg16[%c0_23, %c0_24] : memref<36x256xf32, #tpu.memory_space<vmem>>, vector<32x256xf32>
    %cst_25 = arith.constant dense<0.000000e+00> : vector<4x256xf32>
    %34 = tpu.matmul %4, %33, %cst_25 {dimension_numbers = #tpu.dot_dimension_numbers<[1], [0], [0], [1], [0, 0, 1, 1], [], []>} : vector<4x32xf32>, vector<32x256xf32>, vector<4x256xf32> -> vector<4x256xf32>
    %35 = vector.broadcast %5 : vector<4x1xf32> to vector<4x256xf32>
    %36 = arith.addf %34, %35 : vector<4x256xf32>
    %cst_26 = arith.constant 0.000000e+00 : f32
    %37 = vector.broadcast %cst_26 : f32 to vector<4x256xf32>
    %38 = arith.maximumf %36, %37 : vector<4x256xf32>
    %c0_27 = arith.constant 0 : index
    %c0_28 = arith.constant 0 : index
    %39 = vector.load %arg4[%c0_27, %c0_28] : memref<4x4xf32, #tpu.memory_space<vmem>>, vector<4x4xf32>
    %cst_29 = arith.constant dense<0.000000e+00> : vector<4x256xf32>
    %40 = tpu.matmul %39, %38, %cst_29 {dimension_numbers = #tpu.dot_dimension_numbers<[1], [0], [0], [1], [0, 0, 1, 1], [], []>} : vector<4x4xf32>, vector<4x256xf32>, vector<4x256xf32> -> vector<4x256xf32>
    %c0_30 = arith.constant 0 : index
    %c0_31 = arith.constant 0 : index
    %41 = vector.load %arg5[%c0_30, %c0_31] : memref<4x1xf32, #tpu.memory_space<vmem>>, vector<4x1xf32>
    %42 = vector.broadcast %41 : vector<4x1xf32> to vector<4x256xf32>
    %43 = arith.addf %40, %42 : vector<4x256xf32>
    %cst_32 = arith.constant 0.000000e+00 : f32
    %44 = vector.broadcast %cst_32 : f32 to vector<4x256xf32>
    %45 = arith.maximumf %43, %44 : vector<4x256xf32>
    %c0_33 = arith.constant 0 : index
    %c0_34 = arith.constant 0 : index
    %46 = vector.load %arg6[%c0_33, %c0_34] : memref<4x4xf32, #tpu.memory_space<vmem>>, vector<4x4xf32>
    %cst_35 = arith.constant dense<0.000000e+00> : vector<4x256xf32>
    %47 = tpu.matmul %46, %45, %cst_35 {dimension_numbers = #tpu.dot_dimension_numbers<[1], [0], [0], [1], [0, 0, 1, 1], [], []>} : vector<4x4xf32>, vector<4x256xf32>, vector<4x256xf32> -> vector<4x256xf32>
    %c0_36 = arith.constant 0 : index
    %c0_37 = arith.constant 0 : index
    %48 = vector.load %arg7[%c0_36, %c0_37] : memref<4x1xf32, #tpu.memory_space<vmem>>, vector<4x1xf32>
    %49 = vector.broadcast %48 : vector<4x1xf32> to vector<4x256xf32>
    %50 = arith.addf %47, %49 : vector<4x256xf32>
    %cst_38 = arith.constant 0.000000e+00 : f32
    %51 = vector.broadcast %cst_38 : f32 to vector<4x256xf32>
    %52 = arith.maximumf %50, %51 : vector<4x256xf32>
    %c0_39 = arith.constant 0 : index
    %c0_40 = arith.constant 0 : index
    %c0_41 = arith.constant 0 : index
    %53 = vector.load %arg8[%c0_39, %c0_40, %c0_41] : memref<2x4x36xf32, #tpu.memory_space<vmem>>, vector<1x4x36xf32>
    %54 = vector.shape_cast %53 : vector<1x4x36xf32> to vector<4x36xf32>
    %c0_42 = arith.constant 0 : index
    %c0_43 = arith.constant 0 : index
    %c0_44 = arith.constant 0 : index
    %55 = vector.load %arg9[%c0_42, %c0_43, %c0_44] : memref<2x4x1xf32, #tpu.memory_space<vmem>>, vector<1x4x1xf32>
    %56 = vector.shape_cast %55 : vector<1x4x1xf32> to vector<4x1xf32>
    %57 = vector.shape_cast %52 : vector<4x256xf32> to vector<4x16x16xf32>
    %c0_45 = arith.constant 0 : index
    %c2_46 = arith.constant 2 : index
    %c2_47 = arith.constant 2 : index
    %58 = vector.load %arg15[%c0_45, %c2_46, %c2_47] : memref<4x20x20xf32, #tpu.memory_space<vmem>>, vector<4x16x16xf32>
    tpu.vector_store %arg15[%c0_45, %c2_46, %c2_47], %57 {strides = array<i32>} : memref<4x20x20xf32, #tpu.memory_space<vmem>>, vector<4x16x16xf32>,
    %c0_48 = arith.constant 0 : index
    %c0_49 = arith.constant 0 : index
    %c0_50 = arith.constant 0 : index
    %59 = vector.load %arg15[%c0_48, %c0_49, %c0_50] : memref<4x20x20xf32, #tpu.memory_space<vmem>>, vector<4x20x20xf32>
    %60 = vector.extract_strided_slice %59 {offsets = [0, 0, 0], sizes = [4, 16, 16], strides = [1, 1, 1]} : vector<4x20x20xf32> to vector<4x16x16xf32>
    %61 = vector.shape_cast %60 : vector<4x16x16xf32> to vector<4x256xf32>
    %c0_51 = arith.constant 0 : index
    %c0_52 = arith.constant 0 : index
    %62 = vector.load %arg16[%c0_51, %c0_52] : memref<36x256xf32, #tpu.memory_space<vmem>>, vector<4x256xf32>
    tpu.vector_store %arg16[%c0_51, %c0_52], %61 {strides = array<i32>} : memref<36x256xf32, #tpu.memory_space<vmem>>, vector<4x256xf32>,
    %63 = vector.extract_strided_slice %59 {offsets = [0, 0, 2], sizes = [4, 16, 16], strides = [1, 1, 1]} : vector<4x20x20xf32> to vector<4x16x16xf32>
    %64 = vector.shape_cast %63 : vector<4x16x16xf32> to vector<4x256xf32>
    %c4_53 = arith.constant 4 : index
    %c0_54 = arith.constant 0 : index
    %65 = vector.load %arg16[%c4_53, %c0_54] : memref<36x256xf32, #tpu.memory_space<vmem>>, vector<4x256xf32>
    tpu.vector_store %arg16[%c4_53, %c0_54], %64 {strides = array<i32>} : memref<36x256xf32, #tpu.memory_space<vmem>>, vector<4x256xf32>,
    %66 = vector.extract_strided_slice %59 {offsets = [0, 0, 4], sizes = [4, 16, 16], strides = [1, 1, 1]} : vector<4x20x20xf32> to vector<4x16x16xf32>
    %67 = vector.shape_cast %66 : vector<4x16x16xf32> to vector<4x256xf32>
    %c8_55 = arith.constant 8 : index
    %c0_56 = arith.constant 0 : index
    %68 = vector.load %arg16[%c8_55, %c0_56] : memref<36x256xf32, #tpu.memory_space<vmem>>, vector<4x256xf32>
    tpu.vector_store %arg16[%c8_55, %c0_56], %67 {strides = array<i32>} : memref<36x256xf32, #tpu.memory_space<vmem>>, vector<4x256xf32>,
    %69 = vector.extract_strided_slice %59 {offsets = [0, 2, 0], sizes = [4, 16, 16], strides = [1, 1, 1]} : vector<4x20x20xf32> to vector<4x16x16xf32>
    %70 = vector.shape_cast %69 : vector<4x16x16xf32> to vector<4x256xf32>
    %c12_57 = arith.constant 12 : index
    %c0_58 = arith.constant 0 : index
    %71 = vector.load %arg16[%c12_57, %c0_58] : memref<36x256xf32, #tpu.memory_space<vmem>>, vector<4x256xf32>
    tpu.vector_store %arg16[%c12_57, %c0_58], %70 {strides = array<i32>} : memref<36x256xf32, #tpu.memory_space<vmem>>, vector<4x256xf32>,
    %72 = vector.extract_strided_slice %59 {offsets = [0, 2, 2], sizes = [4, 16, 16], strides = [1, 1, 1]} : vector<4x20x20xf32> to vector<4x16x16xf32>
    %73 = vector.shape_cast %72 : vector<4x16x16xf32> to vector<4x256xf32>
    %c16_59 = arith.constant 16 : index
    %c0_60 = arith.constant 0 : index
    %74 = vector.load %arg16[%c16_59, %c0_60] : memref<36x256xf32, #tpu.memory_space<vmem>>, vector<4x256xf32>
    tpu.vector_store %arg16[%c16_59, %c0_60], %73 {strides = array<i32>} : memref<36x256xf32, #tpu.memory_space<vmem>>, vector<4x256xf32>,
    %75 = vector.extract_strided_slice %59 {offsets = [0, 2, 4], sizes = [4, 16, 16], strides = [1, 1, 1]} : vector<4x20x20xf32> to vector<4x16x16xf32>
    %76 = vector.shape_cast %75 : vector<4x16x16xf32> to vector<4x256xf32>
    %c20_61 = arith.constant 20 : index
    %c0_62 = arith.constant 0 : index
    %77 = vector.load %arg16[%c20_61, %c0_62] : memref<36x256xf32, #tpu.memory_space<vmem>>, vector<4x256xf32>
    tpu.vector_store %arg16[%c20_61, %c0_62], %76 {strides = array<i32>} : memref<36x256xf32, #tpu.memory_space<vmem>>, vector<4x256xf32>,
    %78 = vector.extract_strided_slice %59 {offsets = [0, 4, 0], sizes = [4, 16, 16], strides = [1, 1, 1]} : vector<4x20x20xf32> to vector<4x16x16xf32>
    %79 = vector.shape_cast %78 : vector<4x16x16xf32> to vector<4x256xf32>
    %c24_63 = arith.constant 24 : index
    %c0_64 = arith.constant 0 : index
    %80 = vector.load %arg16[%c24_63, %c0_64] : memref<36x256xf32, #tpu.memory_space<vmem>>, vector<4x256xf32>
    tpu.vector_store %arg16[%c24_63, %c0_64], %79 {strides = array<i32>} : memref<36x256xf32, #tpu.memory_space<vmem>>, vector<4x256xf32>,
    %81 = vector.extract_strided_slice %59 {offsets = [0, 4, 2], sizes = [4, 16, 16], strides = [1, 1, 1]} : vector<4x20x20xf32> to vector<4x16x16xf32>
    %82 = vector.shape_cast %81 : vector<4x16x16xf32> to vector<4x256xf32>
    %c28_65 = arith.constant 28 : index
    %c0_66 = arith.constant 0 : index
    %83 = vector.load %arg16[%c28_65, %c0_66] : memref<36x256xf32, #tpu.memory_space<vmem>>, vector<4x256xf32>
    tpu.vector_store %arg16[%c28_65, %c0_66], %82 {strides = array<i32>} : memref<36x256xf32, #tpu.memory_space<vmem>>, vector<4x256xf32>,
    %84 = vector.extract_strided_slice %59 {offsets = [0, 4, 4], sizes = [4, 16, 16], strides = [1, 1, 1]} : vector<4x20x20xf32> to vector<4x16x16xf32>
    %85 = vector.shape_cast %84 : vector<4x16x16xf32> to vector<4x256xf32>
    %c32 = arith.constant 32 : index
    %c0_67 = arith.constant 0 : index
    %86 = vector.load %arg16[%c32, %c0_67] : memref<36x256xf32, #tpu.memory_space<vmem>>, vector<4x256xf32>
    tpu.vector_store %arg16[%c32, %c0_67], %85 {strides = array<i32>} : memref<36x256xf32, #tpu.memory_space<vmem>>, vector<4x256xf32>,
    %c0_68 = arith.constant 0 : index
    %c0_69 = arith.constant 0 : index
    %87 = vector.load %arg16[%c0_68, %c0_69] : memref<36x256xf32, #tpu.memory_space<vmem>>, vector<36x256xf32>
    %cst_70 = arith.constant dense<0.000000e+00> : vector<4x256xf32>
    %88 = tpu.matmul %54, %87, %cst_70 {dimension_numbers = #tpu.dot_dimension_numbers<[1], [0], [0], [1], [0, 0, 1, 1], [], []>} : vector<4x36xf32>, vector<36x256xf32>, vector<4x256xf32> -> vector<4x256xf32>
    %89 = vector.broadcast %56 : vector<4x1xf32> to vector<4x256xf32>
    %90 = arith.addf %88, %89 : vector<4x256xf32>
    %cst_71 = arith.constant 0.000000e+00 : f32
    %91 = vector.broadcast %cst_71 : f32 to vector<4x256xf32>
    %92 = arith.maximumf %90, %91 : vector<4x256xf32>
    %c0_72 = arith.constant 0 : index
    %c0_73 = arith.constant 0 : index
    %c0_74 = arith.constant 0 : index
    %93 = vector.load %arg10[%c0_72, %c0_73, %c0_74] : memref<2x4x4xf32, #tpu.memory_space<vmem>>, vector<1x4x4xf32>
    %94 = vector.shape_cast %93 : vector<1x4x4xf32> to vector<4x4xf32>
    %cst_75 = arith.constant dense<0.000000e+00> : vector<4x256xf32>
    %95 = tpu.matmul %94, %92, %cst_75 {dimension_numbers = #tpu.dot_dimension_numbers<[1], [0], [0], [1], [0, 0, 1, 1], [], []>} : vector<4x4xf32>, vector<4x256xf32>, vector<4x256xf32> -> vector<4x256xf32>
    %96 = arith.addf %52, %95 : vector<4x256xf32>
    %c0_76 = arith.constant 0 : index
    %c0_77 = arith.constant 0 : index
    %c0_78 = arith.constant 0 : index
    %97 = vector.load %arg11[%c0_76, %c0_77, %c0_78] : memref<2x4x1xf32, #tpu.memory_space<vmem>>, vector<1x4x1xf32>
    %98 = vector.shape_cast %97 : vector<1x4x1xf32> to vector<4x1xf32>
    %99 = vector.broadcast %98 : vector<4x1xf32> to vector<4x256xf32>
    %100 = arith.addf %96, %99 : vector<4x256xf32>
    %c1 = arith.constant 1 : index
    %c0_79 = arith.constant 0 : index
    %c0_80 = arith.constant 0 : index
    %101 = vector.load %arg8[%c1, %c0_79, %c0_80] : memref<2x4x36xf32, #tpu.memory_space<vmem>>, vector<1x4x36xf32>
    %102 = vector.shape_cast %101 : vector<1x4x36xf32> to vector<4x36xf32>
    %c1_81 = arith.constant 1 : index
    %c0_82 = arith.constant 0 : index
    %c0_83 = arith.constant 0 : index
    %103 = vector.load %arg9[%c1_81, %c0_82, %c0_83] : memref<2x4x1xf32, #tpu.memory_space<vmem>>, vector<1x4x1xf32>
    %104 = vector.shape_cast %103 : vector<1x4x1xf32> to vector<4x1xf32>
    %105 = vector.shape_cast %100 : vector<4x256xf32> to vector<4x16x16xf32>
    %c0_84 = arith.constant 0 : index
    %c2_85 = arith.constant 2 : index
    %c2_86 = arith.constant 2 : index
    %106 = vector.load %arg15[%c0_84, %c2_85, %c2_86] : memref<4x20x20xf32, #tpu.memory_space<vmem>>, vector<4x16x16xf32>
    tpu.vector_store %arg15[%c0_84, %c2_85, %c2_86], %105 {strides = array<i32>} : memref<4x20x20xf32, #tpu.memory_space<vmem>>, vector<4x16x16xf32>,
    %c0_87 = arith.constant 0 : index
    %c0_88 = arith.constant 0 : index
    %c0_89 = arith.constant 0 : index
    %107 = vector.load %arg15[%c0_87, %c0_88, %c0_89] : memref<4x20x20xf32, #tpu.memory_space<vmem>>, vector<4x20x20xf32>
    %108 = vector.extract_strided_slice %107 {offsets = [0, 0, 0], sizes = [4, 16, 16], strides = [1, 1, 1]} : vector<4x20x20xf32> to vector<4x16x16xf32>
    %109 = vector.shape_cast %108 : vector<4x16x16xf32> to vector<4x256xf32>
    %c0_90 = arith.constant 0 : index
    %c0_91 = arith.constant 0 : index
    %110 = vector.load %arg16[%c0_90, %c0_91] : memref<36x256xf32, #tpu.memory_space<vmem>>, vector<4x256xf32>
    tpu.vector_store %arg16[%c0_90, %c0_91], %109 {strides = array<i32>} : memref<36x256xf32, #tpu.memory_space<vmem>>, vector<4x256xf32>,
    %111 = vector.extract_strided_slice %107 {offsets = [0, 0, 2], sizes = [4, 16, 16], strides = [1, 1, 1]} : vector<4x20x20xf32> to vector<4x16x16xf32>
    %112 = vector.shape_cast %111 : vector<4x16x16xf32> to vector<4x256xf32>
    %c4_92 = arith.constant 4 : index
    %c0_93 = arith.constant 0 : index
    %113 = vector.load %arg16[%c4_92, %c0_93] : memref<36x256xf32, #tpu.memory_space<vmem>>, vector<4x256xf32>
    tpu.vector_store %arg16[%c4_92, %c0_93], %112 {strides = array<i32>} : memref<36x256xf32, #tpu.memory_space<vmem>>, vector<4x256xf32>,
    %114 = vector.extract_strided_slice %107 {offsets = [0, 0, 4], sizes = [4, 16, 16], strides = [1, 1, 1]} : vector<4x20x20xf32> to vector<4x16x16xf32>
    %115 = vector.shape_cast %114 : vector<4x16x16xf32> to vector<4x256xf32>
    %c8_94 = arith.constant 8 : index
    %c0_95 = arith.constant 0 : index
    %116 = vector.load %arg16[%c8_94, %c0_95] : memref<36x256xf32, #tpu.memory_space<vmem>>, vector<4x256xf32>
    tpu.vector_store %arg16[%c8_94, %c0_95], %115 {strides = array<i32>} : memref<36x256xf32, #tpu.memory_space<vmem>>, vector<4x256xf32>,
    %117 = vector.extract_strided_slice %107 {offsets = [0, 2, 0], sizes = [4, 16, 16], strides = [1, 1, 1]} : vector<4x20x20xf32> to vector<4x16x16xf32>
    %118 = vector.shape_cast %117 : vector<4x16x16xf32> to vector<4x256xf32>
    %c12_96 = arith.constant 12 : index
    %c0_97 = arith.constant 0 : index
    %119 = vector.load %arg16[%c12_96, %c0_97] : memref<36x256xf32, #tpu.memory_space<vmem>>, vector<4x256xf32>
    tpu.vector_store %arg16[%c12_96, %c0_97], %118 {strides = array<i32>} : memref<36x256xf32, #tpu.memory_space<vmem>>, vector<4x256xf32>,
    %120 = vector.extract_strided_slice %107 {offsets = [0, 2, 2], sizes = [4, 16, 16], strides = [1, 1, 1]} : vector<4x20x20xf32> to vector<4x16x16xf32>
    %121 = vector.shape_cast %120 : vector<4x16x16xf32> to vector<4x256xf32>
    %c16_98 = arith.constant 16 : index
    %c0_99 = arith.constant 0 : index
    %122 = vector.load %arg16[%c16_98, %c0_99] : memref<36x256xf32, #tpu.memory_space<vmem>>, vector<4x256xf32>
    tpu.vector_store %arg16[%c16_98, %c0_99], %121 {strides = array<i32>} : memref<36x256xf32, #tpu.memory_space<vmem>>, vector<4x256xf32>,
    %123 = vector.extract_strided_slice %107 {offsets = [0, 2, 4], sizes = [4, 16, 16], strides = [1, 1, 1]} : vector<4x20x20xf32> to vector<4x16x16xf32>
    %124 = vector.shape_cast %123 : vector<4x16x16xf32> to vector<4x256xf32>
    %c20_100 = arith.constant 20 : index
    %c0_101 = arith.constant 0 : index
    %125 = vector.load %arg16[%c20_100, %c0_101] : memref<36x256xf32, #tpu.memory_space<vmem>>, vector<4x256xf32>
    tpu.vector_store %arg16[%c20_100, %c0_101], %124 {strides = array<i32>} : memref<36x256xf32, #tpu.memory_space<vmem>>, vector<4x256xf32>,
    %126 = vector.extract_strided_slice %107 {offsets = [0, 4, 0], sizes = [4, 16, 16], strides = [1, 1, 1]} : vector<4x20x20xf32> to vector<4x16x16xf32>
    %127 = vector.shape_cast %126 : vector<4x16x16xf32> to vector<4x256xf32>
    %c24_102 = arith.constant 24 : index
    %c0_103 = arith.constant 0 : index
    %128 = vector.load %arg16[%c24_102, %c0_103] : memref<36x256xf32, #tpu.memory_space<vmem>>, vector<4x256xf32>
    tpu.vector_store %arg16[%c24_102, %c0_103], %127 {strides = array<i32>} : memref<36x256xf32, #tpu.memory_space<vmem>>, vector<4x256xf32>,
    %129 = vector.extract_strided_slice %107 {offsets = [0, 4, 2], sizes = [4, 16, 16], strides = [1, 1, 1]} : vector<4x20x20xf32> to vector<4x16x16xf32>
    %130 = vector.shape_cast %129 : vector<4x16x16xf32> to vector<4x256xf32>
    %c28_104 = arith.constant 28 : index
    %c0_105 = arith.constant 0 : index
    %131 = vector.load %arg16[%c28_104, %c0_105] : memref<36x256xf32, #tpu.memory_space<vmem>>, vector<4x256xf32>
    tpu.vector_store %arg16[%c28_104, %c0_105], %130 {strides = array<i32>} : memref<36x256xf32, #tpu.memory_space<vmem>>, vector<4x256xf32>,
    %132 = vector.extract_strided_slice %107 {offsets = [0, 4, 4], sizes = [4, 16, 16], strides = [1, 1, 1]} : vector<4x20x20xf32> to vector<4x16x16xf32>
    %133 = vector.shape_cast %132 : vector<4x16x16xf32> to vector<4x256xf32>
    %c32_106 = arith.constant 32 : index
    %c0_107 = arith.constant 0 : index
    %134 = vector.load %arg16[%c32_106, %c0_107] : memref<36x256xf32, #tpu.memory_space<vmem>>, vector<4x256xf32>
    tpu.vector_store %arg16[%c32_106, %c0_107], %133 {strides = array<i32>} : memref<36x256xf32, #tpu.memory_space<vmem>>, vector<4x256xf32>,
    %c0_108 = arith.constant 0 : index
    %c0_109 = arith.constant 0 : index
    %135 = vector.load %arg16[%c0_108, %c0_109] : memref<36x256xf32, #tpu.memory_space<vmem>>, vector<36x256xf32>
    %cst_110 = arith.constant dense<0.000000e+00> : vector<4x256xf32>
    %136 = tpu.matmul %102, %135, %cst_110 {dimension_numbers = #tpu.dot_dimension_numbers<[1], [0], [0], [1], [0, 0, 1, 1], [], []>} : vector<4x36xf32>, vector<36x256xf32>, vector<4x256xf32> -> vector<4x256xf32>
    %137 = vector.broadcast %104 : vector<4x1xf32> to vector<4x256xf32>
    %138 = arith.addf %136, %137 : vector<4x256xf32>
    %cst_111 = arith.constant 0.000000e+00 : f32
    %139 = vector.broadcast %cst_111 : f32 to vector<4x256xf32>
    %140 = arith.maximumf %138, %139 : vector<4x256xf32>
    %c1_112 = arith.constant 1 : index
    %c0_113 = arith.constant 0 : index
    %c0_114 = arith.constant 0 : index
    %141 = vector.load %arg10[%c1_112, %c0_113, %c0_114] : memref<2x4x4xf32, #tpu.memory_space<vmem>>, vector<1x4x4xf32>
    %142 = vector.shape_cast %141 : vector<1x4x4xf32> to vector<4x4xf32>
    %cst_115 = arith.constant dense<0.000000e+00> : vector<4x256xf32>
    %143 = tpu.matmul %142, %140, %cst_115 {dimension_numbers = #tpu.dot_dimension_numbers<[1], [0], [0], [1], [0, 0, 1, 1], [], []>} : vector<4x4xf32>, vector<4x256xf32>, vector<4x256xf32> -> vector<4x256xf32>
    %144 = arith.addf %100, %143 : vector<4x256xf32>
    %c1_116 = arith.constant 1 : index
    %c0_117 = arith.constant 0 : index
    %c0_118 = arith.constant 0 : index
    %145 = vector.load %arg11[%c1_116, %c0_117, %c0_118] : memref<2x4x1xf32, #tpu.memory_space<vmem>>, vector<1x4x1xf32>
    %146 = vector.shape_cast %145 : vector<1x4x1xf32> to vector<4x1xf32>
    %147 = vector.broadcast %146 : vector<4x1xf32> to vector<4x256xf32>
    %148 = arith.addf %144, %147 : vector<4x256xf32>
    %c0_119 = arith.constant 0 : index
    %c0_120 = arith.constant 0 : index
    %149 = vector.load %arg12[%c0_119, %c0_120] : memref<4x4xf32, #tpu.memory_space<vmem>>, vector<4x4xf32>
    %cst_121 = arith.constant dense<0.000000e+00> : vector<4x256xf32>
    %150 = tpu.matmul %149, %148, %cst_121 {dimension_numbers = #tpu.dot_dimension_numbers<[1], [0], [0], [1], [0, 0, 1, 1], [], []>} : vector<4x4xf32>, vector<4x256xf32>, vector<4x256xf32> -> vector<4x256xf32>
    %c0_122 = arith.constant 0 : index
    %c0_123 = arith.constant 0 : index
    %151 = vector.load %arg13[%c0_122, %c0_123] : memref<4x1xf32, #tpu.memory_space<vmem>>, vector<4x1xf32>
    %152 = vector.broadcast %151 : vector<4x1xf32> to vector<4x256xf32>
    %153 = arith.addf %150, %152 : vector<4x256xf32>
    %cst_124 = arith.constant 0.000000e+00 : f32
    %154 = vector.broadcast %cst_124 : f32 to vector<4x256xf32>
    %155 = arith.maximumf %153, %154 : vector<4x256xf32>
    %c0_125 = arith.constant 0 : index
    %c0_126 = arith.constant 0 : index
    %c0_127 = arith.constant 0 : index
    %156 = vector.load %arg14[%c0_125, %c0_126, %c0_127] : memref<1x4x256xf32, #tpu.memory_space<vmem>>, vector<1x4x256xf32>
    %157 = vector.shape_cast %156 : vector<1x4x256xf32> to vector<4x256xf32>
    %158 = vector.shape_cast %155 : vector<4x256xf32> to vector<1x4x256xf32>
    tpu.vector_store %arg14[%c0_125, %c0_126, %c0_127], %158 {strides = array<i32>} : memref<1x4x256xf32, #tpu.memory_space<vmem>>, vector<1x4x256xf32>,
    return
  }
  func.func @transform_0(%arg0: i32) -> (i32, i32, i32) {
    %c0_i32 = arith.constant 0 : i32
    %c0_i32_0 = arith.constant 0 : i32
    %c0_i32_1 = arith.constant 0 : i32
    return %arg0, %c0_i32, %c0_i32_0 : i32, i32, i32
  }
  func.func @transform_1(%arg0: i32) -> (i32, i32) {
    %c0_i32 = arith.constant 0 : i32
    %c0_i32_0 = arith.constant 0 : i32
    %c0_i32_1 = arith.constant 0 : i32
    return %c0_i32, %c0_i32_0 : i32, i32
  }
  func.func @transform_2(%arg0: i32) -> (i32, i32) {
    %c0_i32 = arith.constant 0 : i32
    %c0_i32_0 = arith.constant 0 : i32
    %c0_i32_1 = arith.constant 0 : i32
    return %c0_i32, %c0_i32_0 : i32, i32
  }
  func.func @transform_3(%arg0: i32) -> (i32, i32) {
    %c0_i32 = arith.constant 0 : i32
    %c0_i32_0 = arith.constant 0 : i32
    %c0_i32_1 = arith.constant 0 : i32
    return %c0_i32, %c0_i32_0 : i32, i32
  }
  func.func @transform_4(%arg0: i32) -> (i32, i32) {
    %c0_i32 = arith.constant 0 : i32
    %c0_i32_0 = arith.constant 0 : i32
    %c0_i32_1 = arith.constant 0 : i32
    return %c0_i32, %c0_i32_0 : i32, i32
  }
  func.func @transform_5(%arg0: i32) -> (i32, i32) {
    %c0_i32 = arith.constant 0 : i32
    %c0_i32_0 = arith.constant 0 : i32
    %c0_i32_1 = arith.constant 0 : i32
    return %c0_i32, %c0_i32_0 : i32, i32
  }
  func.func @transform_6(%arg0: i32) -> (i32, i32) {
    %c0_i32 = arith.constant 0 : i32
    %c0_i32_0 = arith.constant 0 : i32
    %c0_i32_1 = arith.constant 0 : i32
    return %c0_i32, %c0_i32_0 : i32, i32
  }
  func.func @transform_7(%arg0: i32) -> (i32, i32, i32) {
    %c0_i32 = arith.constant 0 : i32
    %c0_i32_0 = arith.constant 0 : i32
    %c0_i32_1 = arith.constant 0 : i32
    %c0_i32_2 = arith.constant 0 : i32
    return %c0_i32, %c0_i32_0, %c0_i32_1 : i32, i32, i32
  }
  func.func @transform_8(%arg0: i32) -> (i32, i32, i32) {
    %c0_i32 = arith.constant 0 : i32
    %c0_i32_0 = arith.constant 0 : i32
    %c0_i32_1 = arith.constant 0 : i32
    %c0_i32_2 = arith.constant 0 : i32
    return %c0_i32, %c0_i32_0, %c0_i32_1 : i32, i32, i32
  }
  func.func @transform_9(%arg0: i32) -> (i32, i32, i32) {
    %c0_i32 = arith.constant 0 : i32
    %c0_i32_0 = arith.constant 0 : i32
    %c0_i32_1 = arith.constant 0 : i32
    %c0_i32_2 = arith.constant 0 : i32
    return %c0_i32, %c0_i32_0, %c0_i32_1 : i32, i32, i32
  }
  func.func @transform_10(%arg0: i32) -> (i32, i32, i32) {
    %c0_i32 = arith.constant 0 : i32
    %c0_i32_0 = arith.constant 0 : i32
    %c0_i32_1 = arith.constant 0 : i32
    %c0_i32_2 = arith.constant 0 : i32
    return %c0_i32, %c0_i32_0, %c0_i32_1 : i32, i32, i32
  }
  func.func @transform_11(%arg0: i32) -> (i32, i32) {
    %c0_i32 = arith.constant 0 : i32
    %c0_i32_0 = arith.constant 0 : i32
    %c0_i32_1 = arith.constant 0 : i32
    return %c0_i32, %c0_i32_0 : i32, i32
  }
  func.func @transform_12(%arg0: i32) -> (i32, i32) {
    %c0_i32 = arith.constant 0 : i32
    %c0_i32_0 = arith.constant 0 : i32
    %c0_i32_1 = arith.constant 0 : i32
    return %c0_i32, %c0_i32_0 : i32, i32
  }
  func.func @transform_13(%arg0: i32) -> (i32, i32, i32) {
    %c0_i32 = arith.constant 0 : i32
    %c0_i32_0 = arith.constant 0 : i32
    %c0_i32_1 = arith.constant 0 : i32
    return %arg0, %c0_i32, %c0_i32_0 : i32, i32, i32
  }
}

</mosaic_0001>

<bundles_post_ra>
// kernel: tpu_custom_call.1
= control target key start
LH: loop header
LB: loop body
LE: loop exit
PB: predicated region body
PF: predicated region fallthrough
CT: control target
= control target key end

     0   :  { %s13171_s0 = inlined_call_operand.vmem [shape: f32[2,4,256], index: 0, kind: input, shape index: {}]   ;;  %s13172_s1 = inlined_call_operand.vmem [shape: f32[4,32], index: 1, kind: input, shape index: {}]   ;;  %s13173_s2 = inlined_call_operand.vmem [shape: f32[4,1], index: 2, kind: input, shape index: {}]   ;;  %s13174_s3 = inlined_call_operand.vmem [shape: f32[4,4], index: 3, kind: input, shape index: {}]   ;;  %s13175_s4 = inlined_call_operand.vmem [shape: f32[4,1], index: 4, kind: input, shape index: {}]   ;;  %s13176_s5 = inlined_call_operand.vmem [shape: f32[4,4], index: 5, kind: input, shape index: {}]   ;;  %s13177_s6 = inlined_call_operand.vmem [shape: f32[4,1], index: 6, kind: input, shape index: {}]   ;;  %s13178_s7 = inlined_call_operand.vmem [shape: f32[2,4,36], index: 7, kind: input, shape index: {}]   ;;  %s13179_s8 = inlined_call_operand.vmem [shape: f32[2,4,1], index: 8, kind: input, shape index: {}]   ;;  %s13180_s9 = inlined_call_operand.vmem [shape: f32[2,4,4], index: 9, kind: input, shape index: {}]   ;;  %s13181_s10 = inlined_call_operand.vmem [shape: f32[2,4,1], index: 10, kind: input, shape index: {}]   ;;  %s13182_s11 = inlined_call_operand.vmem [shape: f32[4,4], index: 11, kind: input, shape index: {}]   ;;  %s13183_s12 = inlined_call_operand.vmem [shape: f32[4,1], index: 12, kind: input, shape index: {}]   ;;  %s13184_s13 = inlined_call_operand.hbm [shape: f32[2,4,256], index: 13, kind: output, shape index: {}]  }
   0x1   :  { %13296 = sst [smem:[#allocation50_spill]] %s13171_s0 }
   0x2   :  { %13297 = sst [smem:[#allocation51_spill]] %s13172_s1 }
   0x3   :  { %18 = vsyncpa [#allocation5], 0 }
   0x4   :  { %20 = vsyncpa [#allocation5 + $0x1], 0  ;;  %s8421_s25 = smov 0   ;;  %s8423_s26 = smov 0  }
   0x5   :  { %s8425_s27 = smov 0   ;;  %s8427_s28 = smov 0  }
   0x6 LB: > { %13298 = sst [smem:[#allocation7_spill]] %s8328_s27  ;;  %s8442_s29 = sadd.s32 4294967295, %s8332_s28   ;;  %s8332_s28 = sphi %s8427_s28, %s13609_s28   ;;  %s8328_s27 = sphi %s8425_s27, %s13606_s27   ;;  %s8324_s26 = sphi %s8423_s26, %s13608_s26   ;;  %s8320_s25 = sphi %s8421_s25, %s13607_s25  }
   0x7   : > { %s8163_s30 = sadd.s32 4294967294, %s8332_s28   ;;  %s8446_s14 = sadd.s32 1, %s8332_s28  }
   0x8   : > { %s311_s15 = sadd.s32 1, %s8328_s27  ;;  %s308_s16 = ssub.s32 %s8332_s28, %s8446_s14 }
   0x9   : > { %p321_p0 = scmp.ne.s32.totalorder %s8328_s27, %s8324_s26  ;;  %p309_p1 = scmp.eq.s32.totalorder %s308_s16, 0 }
   0xa   : > { %p322_p2 = scmp.eq.s32.totalorder %s8442_s29, 1  ;;  %p327_p3 = scmp.ne.s32.totalorder %s8324_s26, %s8320_s25 }
   0xb   : > { %p328_p4 = scmp.eq.s32.totalorder %s8163_s30, 1  ;;  %p8166_p7 = scmp.ge.s32.totalorder %s8332_s28, 1 }
   0xc   : > { %s8457_s17 = scalar_select %p309_p1, %s8328_s27, %s311_s15  }
   0xd   : > { %p8459_p5 = por %p322_p2, %p321_p0  ;;  %p8463_p6 = por %p328_p4, %p327_p3 }
   0xe   : > { %13299 = sst [smem:[#allocation8_spill]] %s8457_s17  ;;  %p390_p8 = scmp.lt.s32.totalorder %s8332_s28, 3 }
  0x10   : > { %p391_p9 = pnand %p8166_p7, %p390_p8 }
  0x12   : > { %394 = sbr.rel (%p391_p9) target bundleno = 3927 (0xf57), region = 72 }
  0x17   : > { %p434_p10 = scmp.lt.s32.totalorder %s8442_s29, 1  ;;  %s13302_s0 = sld [smem:[#allocation50_spill]]  ;;  %vm439_vm0 = vcmask 162816   ;;  %v13188_v1 = vmov 0.0   ;;  %v8342_v3 = vmov 1983009808   ;;  %v498_v5 = vlaneseq }
  0x18   : > { %s13272_s30 = smov 80   ;;  %s8335_s15 = smov 112   ;;  %440 = vst.msk [vmem:[#allocation2] sm:$0xff] %vm439_vm0, %v13188_v1  ;;  %441 = vst.msk [vmem:[#allocation2 + $0x8] sm:$0xff] %vm439_vm0, %v13188_v1  ;;  %2741 = vmatprep.mubr.f32.mxu0 %v13188_v1  ;;  %2832 = vmatprep.mubr.f32.mxu1 %v13188_v1  ;;  %v496_v4 = vunpack.c.l.s4 %v8342_v3  ;;  %v8343_v15 = vmov 1934713408  }
  0x19   : > { %s435_s20 = scalar_select %p434_p10, %s8442_s29, 1  ;;  %444 = vst.msk [vmem:[#allocation2 + $0x18] sm:$0xff] %vm439_vm0, %v13188_v1  ;;  %445 = vst.msk [vmem:[#allocation2 + $0x20] sm:$0xff] %vm439_vm0, %v13188_v1  ;;  %v499_v8 = vshrl.u32 %v498_v5, 7  ;;  %v513_v16 = vunpack.c.l.s4 %v8343_v15  ;;  %vm442_vm1 = vcmask 158720   ;;  %vm678_vm2 = vcmask 146448  }
  0x1a   : > { %s8336_s16 = smov 64   ;;  %s8337_s17 = smov 96   ;;  %447 = vst.msk [vmem:[#allocation2 + $0x30] sm:$0xff] %vm439_vm0, %v13188_v1  ;;  %448 = vst.msk [vmem:[#allocation2 + $0x38] sm:$0xff] %vm439_vm0, %v13188_v1  ;;  %v497_v7 = vunpack.c.0.s8 %v496_v4  ;;  %vm1932_vm3 = vcmask 1044480   ;;  %vm1441_vm4 = vcmask 1045504  }
  0x1b   : > { %s8205_s21 = sshll.u32 %s435_s20, 3  ;;  %s13270_s27 = smov 32   ;;  %450 = vst.msk [vmem:[#allocation2 + $0x48] sm:$0xff] %vm439_vm0, %v13188_v1  ;;  %451 = vst.msk [vmem:[#allocation2 + $0x50] sm:$0xff] %vm439_vm0, %v13188_v1  ;;  %v514_v26 = vunpack.c.0.s8 %v513_v16  ;;  %vm711_vm5 = vcmask 1046528   ;;  %vm948_vm6 = vcmask 130048  }
  0x1c   : > { %s13268_s20 = smov 48   ;;  %v8491_v18 = vsub.s32 %v497_v7, %v499_v8  ;;  %443 = vst.msk [vmem:[#allocation2 + $0x10] sm:$0xf] %vm442_vm1, %v13188_v1  ;;  %446 = vst.msk [vmem:[#allocation2 + $0x28] sm:$0xf] %vm442_vm1, %v13188_v1  ;;  %s13186_s22 = smov 2  }
  0x1d   : > { %s438_s24 = scalar_lea.vmem %s13302_s0, %s8205_s21  ;;  %s13241_s21 = smov 16   ;;  %449 = vst.msk [vmem:[#allocation2 + $0x40] sm:$0xf] %vm442_vm1, %v13188_v1  ;;  %452 = vst.msk [vmem:[#allocation2 + $0x58] sm:$0xf] %vm442_vm1, %v13188_v1  ;;  %v8501_v37 = vsub.s32 %v514_v26, %v499_v8  ;;  %vm950_vm7 = vcmask 261120  }
  0x1e   : > { %v453_v0 = vld [vmem:[%s438_s24] sm:$0xff]  ;;  %13303 = vst [vmem:[#allocation9_spill] sm:$0xff] %v8491_v18  ;;  %s8345_s23 = smov 125   ;;  %s8346_s24 = smov 127   ;;  %vm952_vm8 = vcmask 392192   ;;  %vm954_vm9 = vcmask 523264  }
  0x1f   : > { %467 = vrot.lane.b32.xlu1 %v453_v0, %s13272_s30  ;;  %459 = vrot.lane.b32.xlu0 %v453_v0, %s8335_s15  ;;  %v457_v11 = vrot.slane %v453_v0, 4  ;;  %13304 = vst [vmem:[#allocation10_spill] sm:$0xff] %v8501_v37  ;;  %vm956_vm10 = vcmask 654336   ;;  %vm958_vm11 = vcmask 785408   ;;  %vm960_vm12 = vcmask 916480   ;;  %s13460_s1 = sld [smem:[#allocation51_spill]] }
  0x20   : > { %vm2761_vm13 = vcmask 1043456   ;;  %vm2757_vm14 = vcmask 31744   ;;  %vm5287_vm15 = vcmask 293888   ;;  %s8350_s0 = smov [#allocation4]  }
  0x23   : > { %471 = vrot.lane.b32.xlu1 %v453_v0, %s8336_s16  ;;  %463 = vrot.lane.b32.xlu0 %v453_v0, %s8337_s17 }
  0x27   : > { %479 = vrot.lane.b32.xlu1 %v453_v0, %s13270_s27  ;;  %475 = vrot.lane.b32.xlu0 %v453_v0, %s13268_s20 }
  0x2b   : > { %483 = vrot.lane.b32.xlu0 %v453_v0, %s13241_s21 }
  0x91   : > { %v468_v2 = vpop.permute.xlu1 %467  ;;  %v460_v6 = vpop.permute.xlu0 %459 }
  0x92   : > { %v469_v13 = vrot.slane %v468_v2, 4  ;;  %v461_v14 = vrot.slane %v460_v6, 4  ;;  %v502_v19 = vcombine.low %v460_v6, %v468_v2 }
  0x94   : > { %v570_v25 = vcombine.low %v461_v14, %v469_v13  ;;  %v509_v29 = vrot.slane %v502_v19, %v8491_v18 }
  0x95   : > { %v472_v9 = vpop.permute.xlu1 %471  ;;  %v464_v10 = vpop.permute.xlu0 %463 }
  0x96   : > { %v465_v12 = vrot.slane %v464_v10, 4  ;;  %v494_v17 = vcombine.low %v453_v0, %v464_v10  ;;  %v473_v23 = vrot.slane %v472_v9, 4  ;;  %v577_v36 = vrot.slane %v570_v25, %v8491_v18 }
  0x98   : > { %v562_v20 = vcombine.low %v457_v11, %v465_v12  ;;  %v501_v27 = vrot.slane %v494_v17, %v8491_v18 }
  0x99   : > { %v480_v21 = vpop.permute.xlu1 %479  ;;  %v476_v22 = vpop.permute.xlu0 %475 }
  0x9a   : > { %v481_v24 = vrot.slane %v480_v21, 4  ;;  %v528_v28 = vcombine.low %v472_v9, %v480_v21  ;;  %v569_v30 = vrot.slane %v562_v20, %v8491_v18  ;;  %v477_v33 = vrot.slane %v476_v22, 4 }
  0x9b   : > { %v510_v38 = vcombine.low %v501_v27, %v509_v29  ;;  %v511_v53 = vcombine.high %v501_v27, %v509_v29 }
  0x9c   : > { %v596_v32 = vcombine.low %v473_v23, %v481_v24  ;;  %v535_v39 = vrot.slane %v528_v28, %v8491_v18  ;;  %v578_v45 = vcombine.low %v569_v30, %v577_v36  ;;  %v579_v58 = vcombine.high %v569_v30, %v577_v36 }
  0x9d   : > { %v484_v31 = vpop.permute.xlu0 %483  ;;  %v518_v46 = vrot.slane %v510_v38, %v8501_v37  ;;  %v525_v60 = vrot.slane %v511_v53, %v8501_v37 }
  0x9e   : > { %v485_v34 = vrot.slane %v484_v31, 4  ;;  %v536_v35 = vcombine.low %v476_v22, %v484_v31  ;;  %v603_v42 = vrot.slane %v596_v32, %v8491_v18  ;;  %v586_v51 = vrot.slane %v578_v45, %v8501_v37 }
  0x9f   : > { %v593_v63 = vrot.slane %v579_v58, %v8501_v37 }
  0xa0   : > { %v543_v40 = vrot.slane %v536_v35, %v8491_v18  ;;  %v604_v41 = vcombine.low %v477_v33, %v485_v34 }
  0xa2   : > { %v544_v43 = vcombine.low %v535_v39, %v543_v40  ;;  %v611_v44 = vrot.slane %v604_v41, %v8491_v18  ;;  %v545_v49 = vcombine.high %v535_v39, %v543_v40 }
  0xa4   : > { %v552_v47 = vrot.slane %v544_v43, %v8501_v37  ;;  %v612_v48 = vcombine.low %v603_v42, %v611_v44  ;;  %v613_v55 = vcombine.high %v603_v42, %v611_v44  ;;  %v559_v57 = vrot.slane %v545_v49, %v8501_v37 }
  0xa6   : > { %v646_v50 = vcombine.low %v518_v46, %v552_v47  ;;  %v620_v52 = vrot.slane %v612_v48, %v8501_v37  ;;  %v8170_v56 = vcombine.high %v518_v46, %v552_v47  ;;  %v627_v61 = vrot.slane %v613_v55, %v8501_v37 }
  0xa7   : > { %v650_v62 = vcombine.low %v525_v60, %v559_v57  ;;  %v8172_v2 = vcombine.high %v525_v60, %v559_v57 }
  0xa8   : > { %654 = vrot.lane.b32.xlu1 %v646_v50, %s13186_s22  ;;  %v647_v54 = vcombine.low %v586_v51, %v620_v52  ;;  %v8171_v59 = vcombine.high %v586_v51, %v620_v52  ;;  %v651_v0 = vcombine.low %v593_v63, %v627_v61  ;;  %v8173_v3 = vcombine.high %v593_v63, %v627_v61 }
  0xaa   : > { %656 = vrot.lane.b32.xlu0 %v647_v54, %s13186_s22 }
  0xac   : > { %658 = vrot.lane.b32.xlu1 %v8170_v56, %s13186_s22 }
  0xae   : > { %660 = vrot.lane.b32.xlu0 %v8171_v59, %s13186_s22 }
  0xb0   : > { %662 = vrot.lane.b32.xlu1 %v650_v62, %s13186_s22 }
  0xb2   : > { %664 = vrot.lane.b32.xlu0 %v651_v0, %s13186_s22 }
  0xb4   : > { %666 = vrot.lane.b32.xlu1 %v8172_v2, %s13186_s22 }
  0xb6   : > { %668 = vrot.lane.b32.xlu0 %v8173_v3, %s13186_s22  ;;  %s13239_s22 = smov 126  }
 0x11a   : > { %v655_v4 = vpop.permute.xlu1 %654 }
 0x11b   : > { %679 = vst.msk [vmem:[#allocation2 + $0x2] sm:$0xff] %vm678_vm2, %v655_v4 }
 0x11c   : > { %v657_v5 = vpop.permute.xlu0 %656 }
 0x11d   : > { %680 = vst.msk [vmem:[#allocation2 + $0xa] sm:$0xff] %vm678_vm2, %v657_v5 }
 0x11e   : > { %v659_v6 = vpop.permute.xlu1 %658 }
 0x11f   : > { %681 = vst.msk [vmem:[#allocation2 + $0x1a] sm:$0xff] %vm678_vm2, %v659_v6 }
 0x120   : > { %v661_v7 = vpop.permute.xlu0 %660 }
 0x121   : > { %682 = vst.msk [vmem:[#allocation2 + $0x22] sm:$0xff] %vm678_vm2, %v661_v7 }
 0x122   : > { %v663_v8 = vpop.permute.xlu1 %662  ;;  %v8553_v27 = vld [vmem:[#allocation2] sm:$0xff] }
 0x123   : > { %683 = vst.msk [vmem:[#allocation2 + $0x32] sm:$0xff] %vm678_vm2, %v663_v8  ;;  %v1933_v31 = vrot.slane %v8553_v27, 3  ;;  %v1442_v58 = vrot.slane %v8553_v27, 2 }
 0x124   : > { %v665_v9 = vpop.permute.xlu0 %664  ;;  %v8528_v10 = vld [vmem:[#allocation2 + $0x8] sm:$0xff]  ;;  %v8530_v11 = vld [vmem:[#allocation2 + $0x10] sm:$0xf] }
 0x125   : > { %684 = vst.msk [vmem:[#allocation2 + $0x3a] sm:$0xff] %vm678_vm2, %v665_v9  ;;  %v1934_v12 = vrot.slane %v8528_v10, 3  ;;  %v1936_v13 = vrot.slane %v8530_v11, 3  ;;  %v1443_v46 = vrot.slane %v8528_v10, 2  ;;  %v1445_v47 = vrot.slane %v8530_v11, 2 }
 0x126   : > { %v667_v14 = vpop.permute.xlu1 %666  ;;  %v8566_v35 = vld [vmem:[#allocation2 + $0x18] sm:$0xff]  ;;  %v713_v3 = vrot.slane %v8528_v10, 1  ;;  %v715_v4 = vrot.slane %v8530_v11, 1 }
 0x127   : > { %685 = vst.msk [vmem:[#allocation2 + $0x4a] sm:$0xff] %vm678_vm2, %v667_v14  ;;  %v1937_v15 = vsel %vm1932_vm3, %v1934_v12, %v1936_v13  ;;  %v1935_v36 = vsel %vm1932_vm3, %v1933_v31, %v1934_v12  ;;  %v1938_v40 = vrot.slane %v8566_v35, 3  ;;  %v1446_v48 = vsel %vm1441_vm4, %v1443_v46, %v1445_v47 }
 0x128   : > { %2425 = vrot.lane.b32.xlu1 %v1937_v15, %s8345_s23  ;;  %v669_v16 = vpop.permute.xlu0 %668  ;;  %v8538_v17 = vld [vmem:[#allocation2 + $0x20] sm:$0xff]  ;;  %v8540_v19 = vld [vmem:[#allocation2 + $0x28] sm:$0xf]  ;;  %v1444_v59 = vsel %vm1441_vm4, %v1442_v58, %v1443_v46  ;;  %v1447_v61 = vrot.slane %v8566_v35, 2  ;;  %v716_v5 = vsel %vm711_vm5, %v713_v3, %v715_v4 }
 0x129   : > { %686 = vst.msk [vmem:[#allocation2 + $0x52] sm:$0xff] %vm678_vm2, %v669_v16  ;;  %v1939_v20 = vrot.slane %v8538_v17, 3  ;;  %v1941_v21 = vrot.slane %v8540_v19, 3  ;;  %v1448_v51 = vrot.slane %v8538_v17, 2  ;;  %v1450_v52 = vrot.slane %v8540_v19, 2 }
 0x12a   : > { %v8564_v34 = vld [vmem:[#allocation2 + $0x30] sm:$0xff]  ;;  %v718_v8 = vrot.slane %v8538_v17, 1  ;;  %v720_v9 = vrot.slane %v8540_v19, 1  ;;  %v717_v19 = vrot.slane %v8566_v35, 1 }
 0x12b   : > { %v1942_v22 = vsel %vm1932_vm3, %v1939_v20, %v1941_v21  ;;  %v1943_v39 = vrot.slane %v8564_v34, 3  ;;  %v1940_v43 = vsel %vm1932_vm3, %v1938_v40, %v1939_v20  ;;  %v1451_v54 = vsel %vm1441_vm4, %v1448_v51, %v1450_v52 }
 0x12c   : > { %2429 = vrot.lane.b32.xlu0 %v1942_v22, %s8345_s23  ;;  %v8547_v23 = vld [vmem:[#allocation2 + $0x38] sm:$0xff]  ;;  %v8549_v24 = vld [vmem:[#allocation2 + $0x40] sm:$0xf]  ;;  %v1452_v60 = vrot.slane %v8564_v34, 2  ;;  %v1449_v63 = vsel %vm1441_vm4, %v1447_v61, %v1448_v51  ;;  %v721_v11 = vsel %vm711_vm5, %v718_v8, %v720_v9  ;;  %v722_v17 = vrot.slane %v8564_v34, 1 }
 0x12d   : > { %v1944_v25 = vrot.slane %v8547_v23, 3  ;;  %v1946_v26 = vrot.slane %v8549_v24, 3  ;;  %v1453_v49 = vrot.slane %v8547_v23, 2  ;;  %v1455_v50 = vrot.slane %v8549_v24, 2 }
 0x12e   : > { %v8574_v41 = vld [vmem:[#allocation2 + $0x48] sm:$0xff]  ;;  %v723_v6 = vrot.slane %v8547_v23, 1  ;;  %v725_v7 = vrot.slane %v8549_v24, 1  ;;  %v719_v21 = vsel %vm711_vm5, %v717_v19, %v718_v8 }
 0x12f   : > { %v1947_v28 = vsel %vm1932_vm3, %v1944_v25, %v1946_v26  ;;  %v1945_v42 = vsel %vm1932_vm3, %v1943_v39, %v1944_v25  ;;  %v1948_v44 = vrot.slane %v8574_v41, 3  ;;  %v1456_v53 = vsel %vm1441_vm4, %v1453_v49, %v1455_v50 }
 0x130   : > { %2433 = vrot.lane.b32.xlu1 %v1947_v28, %s8345_s23  ;;  %v8557_v29 = vld [vmem:[#allocation2 + $0x50] sm:$0xff]  ;;  %v8559_v30 = vld [vmem:[#allocation2 + $0x58] sm:$0xf]  ;;  %v1454_v62 = vsel %vm1441_vm4, %v1452_v60, %v1453_v49  ;;  %v1457_v0 = vrot.slane %v8574_v41, 2  ;;  %v726_v10 = vsel %vm711_vm5, %v723_v6, %v725_v7  ;;  %v724_v20 = vsel %vm711_vm5, %v722_v17, %v723_v6 }
 0x131   : > { %v1949_v32 = vrot.slane %v8557_v29, 3  ;;  %v1951_v33 = vrot.slane %v8559_v30, 3  ;;  %v1458_v55 = vrot.slane %v8557_v29, 2  ;;  %v1460_v56 = vrot.slane %v8559_v30, 2 }
 0x132   : > { %v728_v12 = vrot.slane %v8557_v29, 1  ;;  %v730_v13 = vrot.slane %v8559_v30, 1 }
 0x133   : > { %v1952_v38 = vsel %vm1932_vm3, %v1949_v32, %v1951_v33  ;;  %v1950_v45 = vsel %vm1932_vm3, %v1948_v44, %v1949_v32  ;;  %v1461_v57 = vsel %vm1441_vm4, %v1458_v55, %v1460_v56  ;;  %v1459_v2 = vsel %vm1441_vm4, %v1457_v0, %v1458_v55 }
 0x134   : > { %2423 = vrot.lane.b32.xlu1 %v1935_v36, %s8345_s23  ;;  %2437 = vrot.lane.b32.xlu0 %v1952_v38, %s8345_s23  ;;  %v731_v14 = vsel %vm711_vm5, %v728_v12, %v730_v13 }
 0x138   : > { %2431 = vrot.lane.b32.xlu1 %v1945_v42, %s8345_s23  ;;  %2427 = vrot.lane.b32.xlu0 %v1940_v43, %s8345_s23 }
 0x13c   : > { %1955 = vrot.lane.b32.xlu1 %v1937_v15, %s8346_s24  ;;  %2435 = vrot.lane.b32.xlu0 %v1950_v45, %s8345_s23 }
 0x140   : > { %1963 = vrot.lane.b32.xlu1 %v1947_v28, %s8346_s24  ;;  %1959 = vrot.lane.b32.xlu0 %v1942_v22, %s8346_s24 }
 0x144   : > { %2193 = vrot.lane.b32.xlu1 %v1937_v15, %s13239_s22  ;;  %1967 = vrot.lane.b32.xlu0 %v1952_v38, %s8346_s24  ;;  %v712_v15 = vrot.slane %v8553_v27, 1 }
 0x146   : > { %v714_v16 = vsel %vm711_vm5, %v712_v15, %v713_v3 }
 0x148   : > { %2201 = vrot.lane.b32.xlu1 %v1947_v28, %s13239_s22  ;;  %2197 = vrot.lane.b32.xlu0 %v1942_v22, %s13239_s22  ;;  %v727_v22 = vrot.slane %v8574_v41, 1 }
 0x14a   : > { %v729_v23 = vsel %vm711_vm5, %v727_v22, %v728_v12 }
 0x14c   : > { %1953 = vrot.lane.b32.xlu1 %v1935_v36, %s8346_s24  ;;  %2205 = vrot.lane.b32.xlu0 %v1952_v38, %s13239_s22 }
 0x150   : > { %1961 = vrot.lane.b32.xlu1 %v1945_v42, %s8346_s24  ;;  %1957 = vrot.lane.b32.xlu0 %v1940_v43, %s8346_s24 }
 0x154   : > { %2191 = vrot.lane.b32.xlu1 %v1935_v36, %s13239_s22  ;;  %1965 = vrot.lane.b32.xlu0 %v1950_v45, %s8346_s24 }
 0x158   : > { %2199 = vrot.lane.b32.xlu1 %v1945_v42, %s13239_s22  ;;  %2195 = vrot.lane.b32.xlu0 %v1940_v43, %s13239_s22 }
 0x15c   : > { %1464 = vrot.lane.b32.xlu1 %v1446_v48, %s8346_s24  ;;  %2203 = vrot.lane.b32.xlu0 %v1950_v45, %s13239_s22 }
 0x160   : > { %1472 = vrot.lane.b32.xlu1 %v1456_v53, %s8346_s24  ;;  %1468 = vrot.lane.b32.xlu0 %v1451_v54, %s8346_s24 }
 0x164   : > { %1702 = vrot.lane.b32.xlu1 %v1446_v48, %s8345_s23  ;;  %1476 = vrot.lane.b32.xlu0 %v1461_v57, %s8346_s24 }
 0x168   : > { %1710 = vrot.lane.b32.xlu1 %v1456_v53, %s8345_s23  ;;  %1706 = vrot.lane.b32.xlu0 %v1451_v54, %s8345_s23 }
 0x16c   : > { %1462 = vrot.lane.b32.xlu1 %v1444_v59, %s8346_s24  ;;  %1714 = vrot.lane.b32.xlu0 %v1461_v57, %s8345_s23 }
 0x170   : > { %1470 = vrot.lane.b32.xlu1 %v1454_v62, %s8346_s24  ;;  %1466 = vrot.lane.b32.xlu0 %v1449_v63, %s8346_s24 }
 0x174   : > { %1700 = vrot.lane.b32.xlu1 %v1444_v59, %s8345_s23  ;;  %1474 = vrot.lane.b32.xlu0 %v1459_v2, %s8346_s24 }
 0x178   : > { %1708 = vrot.lane.b32.xlu1 %v1454_v62, %s8345_s23  ;;  %1704 = vrot.lane.b32.xlu0 %v1449_v63, %s8345_s23 }
 0x17c   : > { %973 = vrot.lane.b32.xlu1 %v716_v5, %s13239_s22  ;;  %1712 = vrot.lane.b32.xlu0 %v1459_v2, %s8345_s23 }
 0x180   : > { %981 = vrot.lane.b32.xlu1 %v726_v10, %s13239_s22  ;;  %977 = vrot.lane.b32.xlu0 %v721_v11, %s13239_s22 }
 0x184   : > { %1211 = vrot.lane.b32.xlu1 %v716_v5, %s8345_s23  ;;  %985 = vrot.lane.b32.xlu0 %v731_v14, %s13239_s22 }
 0x188   : > { %1219 = vrot.lane.b32.xlu1 %v726_v10, %s8345_s23  ;;  %1215 = vrot.lane.b32.xlu0 %v721_v11, %s8345_s23 }
 0x18c   : > { %971 = vrot.lane.b32.xlu1 %v714_v16, %s13239_s22  ;;  %1223 = vrot.lane.b32.xlu0 %v731_v14, %s8345_s23 }
 0x190   : > { %979 = vrot.lane.b32.xlu1 %v724_v20, %s13239_s22  ;;  %975 = vrot.lane.b32.xlu0 %v719_v21, %s13239_s22 }
 0x194   : > { %1209 = vrot.lane.b32.xlu1 %v714_v16, %s8345_s23  ;;  %983 = vrot.lane.b32.xlu0 %v729_v23, %s13239_s22  ;;  %s13467_s22 = smov 2  }
 0x198   : > { %1217 = vrot.lane.b32.xlu1 %v724_v20, %s8345_s23  ;;  %1213 = vrot.lane.b32.xlu0 %v719_v21, %s8345_s23 }
 0x19a   : > { %v2426_v24 = vpop.permute.xlu1 %2425 }
 0x19c   : > { %734 = vrot.lane.b32.xlu1 %v716_v5, %s8346_s24  ;;  %1221 = vrot.lane.b32.xlu0 %v729_v23, %s8345_s23  ;;  %s13468_s23 = smov 126  }
 0x19e   : > { %v2430_v25 = vpop.permute.xlu0 %2429 }
 0x1a0   : > { %742 = vrot.lane.b32.xlu1 %v726_v10, %s8346_s24  ;;  %738 = vrot.lane.b32.xlu0 %v721_v11, %s8346_s24 }
 0x1a2   : > { %v2434_v26 = vpop.permute.xlu1 %2433 }
 0x1a3   : > { %v2515_v27 = vcombine.low %v2426_v24, %v2434_v26  ;;  %v2516_v3 = vcombine.high %v2426_v24, %v2434_v26 }
 0x1a4   : > { %732 = vrot.lane.b32.xlu1 %v714_v16, %s8346_s24  ;;  %746 = vrot.lane.b32.xlu0 %v731_v14, %s8346_s24 }
 0x1a5   : > { %v8681_v31 = vrot.slane %v2515_v27, %v8491_v18  ;;  %v8778_v10 = vrot.slane %v2516_v3, %v8491_v18 }
 0x1a6   : > { %v8676_v28 = vpop.permute.xlu1 %2423  ;;  %v2438_v29 = vpop.permute.xlu0 %2437 }
 0x1a7   : > { %v2531_v30 = vcombine.low %v2430_v25, %v2438_v29  ;;  %v2532_v61 = vcombine.high %v2430_v25, %v2438_v29 }
 0x1a8   : > { %740 = vrot.lane.b32.xlu1 %v724_v20, %s8346_s24  ;;  %736 = vrot.lane.b32.xlu0 %v719_v21, %s8346_s24 }
 0x1a9   : > { %v8684_v32 = vrot.slane %v2531_v30, %v8491_v18  ;;  %v8769_v6 = vrot.slane %v2532_v61, %v8491_v18 }
 0x1aa   : > { %v8686_v33 = vpop.permute.xlu1 %2431  ;;  %v8688_v34 = vpop.permute.xlu0 %2427 }
 0x1ab   : > { %v2548_v36 = vcombine.high %v8681_v31, %v8684_v32  ;;  %v2447_v38 = vcombine.low %v8676_v28, %v8686_v33  ;;  %v2563_v16 = vcombine.low %v8778_v10, %v8769_v6 }
 0x1ac   : > { %744 = vrot.lane.b32.xlu0 %v729_v23, %s8346_s24  ;;  %s13266_s24 = smov 124  }
 0x1ad   : > { %v8698_v39 = vrot.slane %v2548_v36, %v8501_v37  ;;  %v8709_v43 = vrot.slane %v2447_v38, %v8491_v18  ;;  %v8808_v23 = vrot.slane %v2563_v16, %v8501_v37 }
 0x1ae   : > { %v8700_v40 = vpop.permute.xlu1 %1955  ;;  %v8702_v41 = vpop.permute.xlu0 %2435 }
 0x1af   : > { %v2463_v42 = vcombine.low %v8688_v34, %v8702_v41  ;;  %2616 = vrot.lane.b32.xlu1 %v8698_v39, %s13270_s27  ;;  %13307 = vst [vmem:[#allocation13_spill] sm:$0xff] %v8808_v23  ;;  %v2464_v27 = vcombine.high %v8688_v34, %v8702_v41 }
 0x1b1   : > { %v8712_v44 = vrot.slane %v2463_v42, %v8491_v18  ;;  %v2448_v42 = vcombine.high %v8676_v28, %v8686_v33  ;;  %v8840_v41 = vrot.slane %v2464_v27, %v8491_v18 }
 0x1b2   : > { %v8714_v45 = vpop.permute.xlu1 %1963  ;;  %v8716_v46 = vpop.permute.xlu0 %1959 }
 0x1b3   : > { %v2480_v48 = vcombine.high %v8709_v43, %v8712_v44  ;;  %v2045_v49 = vcombine.low %v8700_v40, %v8714_v45  ;;  %v8849_v28 = vrot.slane %v2448_v42, %v8491_v18  ;;  %v2046_v24 = vcombine.high %v8700_v40, %v8714_v45 }
 0x1b5   : > { %v8725_v50 = vrot.slane %v2480_v48, %v8501_v37  ;;  %v8736_v54 = vrot.slane %v2045_v49, %v8491_v18  ;;  %v8922_v45 = vrot.slane %v2046_v24, %v8491_v18 }
 0x1b6   : > { %v8727_v51 = vpop.permute.xlu1 %2193  ;;  %v8729_v52 = vpop.permute.xlu0 %1967 }
 0x1b7   : > { %13305 = vst [vmem:[#allocation11_spill] sm:$0xff] %v8725_v50  ;;  %v2061_v53 = vcombine.low %v8716_v46, %v8729_v52  ;;  %2588 = vrot.lane.b32.xlu0 %v8725_v50, %s13270_s27 }
 0x1b9   : > { %v8739_v55 = vrot.slane %v2061_v53, %v8491_v18 }
 0x1ba   : > { %v8741_v56 = vpop.permute.xlu1 %2201  ;;  %v8743_v57 = vpop.permute.xlu0 %2197 }
 0x1bb   : > { %v2078_v59 = vcombine.high %v8736_v54, %v8739_v55  ;;  %v2283_v60 = vcombine.low %v8727_v51, %v8741_v56 }
 0x1bd   : > { %v8756_v0 = vrot.slane %v2078_v59, %v8501_v37  ;;  %v8763_v4 = vrot.slane %v2283_v60, %v8491_v18 }
 0x1be   : > { %v8751_v62 = vpop.permute.xlu1 %1953  ;;  %v8753_v63 = vpop.permute.xlu0 %2205 }
 0x1bf   : > { %v2299_v2 = vcombine.low %v8743_v57, %v8753_v63  ;;  %2146 = vrot.lane.b32.xlu1 %v8756_v0, %s13270_s27 }
 0x1c1   : > { %v8766_v5 = vrot.slane %v2299_v2, %v8491_v18 }
 0x1c2   : > { %v8771_v7 = vpop.permute.xlu1 %1961  ;;  %v8773_v8 = vpop.permute.xlu0 %1957 }
 0x1c3   : > { %v2316_v11 = vcombine.high %v8763_v4, %v8766_v5  ;;  %v1977_v12 = vcombine.low %v8751_v62, %v8771_v7 }
 0x1c5   : > { %v8789_v15 = vrot.slane %v2316_v11, %v8501_v37  ;;  %v8798_v19 = vrot.slane %v1977_v12, %v8491_v18  ;;  %v2495_v11 = vcombine.low %v8849_v28, %v8840_v41 }
 0x1c6   : > { %v8784_v13 = vpop.permute.xlu1 %2191  ;;  %v8786_v14 = vpop.permute.xlu0 %1965 }
 0x1c7   : > { %13306 = vst [vmem:[#allocation12_spill] sm:$0xff] %v8789_v15  ;;  %v1993_v17 = vcombine.low %v8773_v8, %v8786_v14  ;;  %2384 = vrot.lane.b32.xlu1 %v8789_v15, %s13270_s27  ;;  %v8879_v27 = vrot.slane %v2495_v11, %v8501_v37 }
 0x1c9   : > { %v8801_v20 = vrot.slane %v1993_v17, %v8491_v18  ;;  %13312 = vst [vmem:[#allocation18_spill] sm:$0xff] %v8879_v27 }
 0x1ca   : > { %v8803_v21 = vpop.permute.xlu1 %2199  ;;  %v8805_v22 = vpop.permute.xlu0 %2195 }
 0x1cb   : > { %2624 = vrot.lane.b32.xlu1 %v8808_v23, %s8336_s16  ;;  %v2010_v25 = vcombine.high %v8798_v19, %v8801_v20  ;;  %v2215_v26 = vcombine.low %v8784_v13, %v8803_v21 }
 0x1cd   : > { %v8825_v36 = vrot.slane %v2010_v25, %v8501_v37  ;;  %v8834_v48 = vrot.slane %v2215_v26, %v8491_v18 }
 0x1ce   : > { %v8820_v29 = vpop.permute.xlu1 %1464  ;;  %v8822_v30 = vpop.permute.xlu0 %2203 }
 0x1cf   : > { %13308 = vst [vmem:[#allocation14_spill] sm:$0xff] %v8825_v36  ;;  %v2231_v38 = vcombine.low %v8805_v22, %v8822_v30  ;;  %2118 = vrot.lane.b32.xlu0 %v8825_v36, %s13270_s27 }
 0x1d1   : > { %v8837_v34 = vrot.slane %v2231_v38, %v8491_v18 }
 0x1d2   : > { %v8842_v49 = vpop.permute.xlu1 %1472  ;;  %v8844_v53 = vpop.permute.xlu0 %1468 }
 0x1d3   : > { %v2248_v33 = vcombine.high %v8834_v48, %v8837_v34  ;;  %v1554_v60 = vcombine.low %v8820_v29, %v8842_v49 }
 0x1d5   : > { %v8860_v3 = vrot.slane %v2248_v33, %v8501_v37  ;;  %v8869_v16 = vrot.slane %v1554_v60, %v8491_v18  ;;  %v2062_v60 = vcombine.high %v8716_v46, %v8729_v52 }
 0x1d6   : > { %v8855_v61 = vpop.permute.xlu1 %1702  ;;  %v8857_v2 = vpop.permute.xlu0 %1476 }
 0x1d7   : > { %13309 = vst [vmem:[#allocation15_spill] sm:$0xff] %v8860_v3  ;;  %v1570_v12 = vcombine.low %v8844_v53, %v8857_v2  ;;  %2356 = vrot.lane.b32.xlu0 %v8860_v3, %s13270_s27  ;;  %13310 = vst [vmem:[#allocation16_spill] sm:$0xff] %v8869_v16  ;;  %v8911_v52 = vrot.slane %v2062_v60, %v8491_v18 }
 0x1d9   : > { %v8872_v17 = vrot.slane %v1570_v12, %v8491_v18  ;;  %v2093_v24 = vcombine.low %v8922_v45, %v8911_v52 }
 0x1da   : > { %v8874_v25 = vpop.permute.xlu1 %1710  ;;  %v8876_v26 = vpop.permute.xlu0 %1706 }
 0x1db   : > { %13311 = vst [vmem:[#allocation17_spill] sm:$0xff] %v8872_v17  ;;  %2596 = vrot.lane.b32.xlu0 %v8879_v27, %s8336_s16  ;;  %v1587_v42 = vcombine.high %v8869_v16, %v8872_v17  ;;  %v1792_v33 = vcombine.low %v8855_v61, %v8874_v25  ;;  %v8960_v3 = vrot.slane %v2093_v24, %v8501_v37 }
 0x1dd   : > { %v8896_v11 = vrot.slane %v1587_v42, %v8501_v37  ;;  %v8905_v58 = vrot.slane %v1792_v33, %v8491_v18  ;;  %v2300_v42 = vcombine.high %v8743_v57, %v8753_v63  ;;  %13317 = vst [vmem:[#allocation23_spill] sm:$0xff] %v8960_v3 }
 0x1de   : > { %v8891_v12 = vpop.permute.xlu1 %1462  ;;  %v8893_v59 = vpop.permute.xlu0 %1714 }
 0x1df   : > { %13313 = vst [vmem:[#allocation19_spill] sm:$0xff] %v8896_v11  ;;  %v1808_v38 = vcombine.low %v8876_v26, %v8893_v59  ;;  %1655 = vrot.lane.b32.xlu1 %v8896_v11, %s13270_s27  ;;  %v8931_v57 = vrot.slane %v2300_v42, %v8491_v18 }
 0x1e1   : > { %v8908_v46 = vrot.slane %v1808_v38, %v8491_v18  ;;  %v2284_v38 = vcombine.high %v8727_v51, %v8741_v56 }
 0x1e2   : > { %v8915_v47 = vpop.permute.xlu1 %1470  ;;  %v8917_v9 = vpop.permute.xlu0 %1466 }
 0x1e3   : > { %v1825_v33 = vcombine.high %v8905_v58, %v8908_v46  ;;  %v1486_v60 = vcombine.low %v8891_v12, %v8915_v47  ;;  %v8945_v56 = vrot.slane %v2284_v38, %v8491_v18 }
 0x1e5   : > { %v8938_v40 = vrot.slane %v1825_v33, %v8501_v37  ;;  %v8950_v42 = vrot.slane %v1486_v60, %v8491_v18  ;;  %v2331_v38 = vcombine.low %v8945_v56, %v8931_v57 }
 0x1e6   : > { %v8933_v63 = vpop.permute.xlu1 %1700  ;;  %v8935_v1 = vpop.permute.xlu0 %1474 }
 0x1e7   : > { %13314 = vst [vmem:[#allocation20_spill] sm:$0xff] %v8938_v40  ;;  %v1502_v51 = vcombine.low %v8917_v9, %v8935_v1  ;;  %1893 = vrot.lane.b32.xlu1 %v8938_v40, %s13270_s27  ;;  %13315 = vst [vmem:[#allocation21_spill] sm:$0xff] %v8950_v42  ;;  %v1994_v40 = vcombine.high %v8773_v8, %v8786_v14  ;;  %v8979_v17 = vrot.slane %v2331_v38, %v8501_v37 }
 0x1e9   : > { %v8953_v35 = vrot.slane %v1502_v51, %v8491_v18  ;;  %13318 = vst [vmem:[#allocation24_spill] sm:$0xff] %v8979_v17 }
 0x1ea   : > { %v8955_v33 = vpop.permute.xlu1 %1708  ;;  %v8957_v27 = vpop.permute.xlu0 %1704 }
 0x1eb   : > { %13316 = vst [vmem:[#allocation22_spill] sm:$0xff] %v8953_v35  ;;  %2154 = vrot.lane.b32.xlu1 %v8960_v3, %s8336_s16  ;;  %v1519_v60 = vcombine.high %v8950_v42, %v8953_v35  ;;  %v1724_v51 = vcombine.low %v8933_v63, %v8955_v33  ;;  %v2564_v3 = vcombine.high %v8778_v10, %v8769_v6 }
 0x1ec   : > { %v1978_v42 = vcombine.high %v8751_v62, %v8771_v7  ;;  %v9001_v6 = vrot.slane %v1994_v40, %v8491_v18  ;;  %v2232_v10 = vcombine.high %v8805_v22, %v8822_v30 }
 0x1ed   : > { %v8982_v36 = vrot.slane %v1519_v60, %v8501_v37  ;;  %v8995_v8 = vrot.slane %v1724_v51, %v8491_v18  ;;  %v9010_v7 = vrot.slane %v2564_v3, %v8501_v37 }
 0x1ee   : > { %v8974_v24 = vpop.permute.xlu1 %973  ;;  %v8976_v11 = vpop.permute.xlu0 %1712  ;;  %v9015_v51 = vrot.slane %v1978_v42, %v8491_v18  ;;  %v9026_v3 = vrot.slane %v2232_v10, %v8491_v18 }
 0x1ef   : > { %13319 = vst [vmem:[#allocation25_spill] sm:$0xff] %v8982_v36  ;;  %v1740_v35 = vcombine.low %v8957_v27, %v8976_v11  ;;  %2392 = vrot.lane.b32.xlu1 %v8979_v17, %s8336_s16  ;;  %1627 = vrot.lane.b32.xlu0 %v8982_v36, %s13270_s27  ;;  %13320 = vst [vmem:[#allocation26_spill] sm:$0xff] %v8995_v8 }
 0x1f0   : > { %13322 = vst [vmem:[#allocation28_spill] sm:$0xff] %v9010_v7 }
 0x1f1   : > { %v8998_v14 = vrot.slane %v1740_v35, %v8491_v18  ;;  %v2216_v35 = vcombine.high %v8784_v13, %v8803_v21  ;;  %v2025_v13 = vcombine.low %v9015_v51, %v9001_v6 }
 0x1f2   : > { %v9005_v38 = vpop.permute.xlu1 %981  ;;  %v9007_v62 = vpop.permute.xlu0 %977 }
 0x1f3   : > { %13321 = vst [vmem:[#allocation27_spill] sm:$0xff] %v8998_v14  ;;  %2632 = vrot.lane.b32.xlu1 %v9010_v7, %s8337_s17  ;;  %v1757_v22 = vcombine.high %v8995_v8, %v8998_v14  ;;  %v1063_v30 = vcombine.low %v8974_v24, %v9005_v38  ;;  %v9040_v36 = vrot.slane %v2216_v35, %v8491_v18 }
 0x1f4   : > { %v9055_v14 = vrot.slane %v2025_v13, %v8501_v37 }
 0x1f5   : > { %v9033_v42 = vrot.slane %v1757_v22, %v8501_v37  ;;  %v9045_v10 = vrot.slane %v1063_v30, %v8491_v18  ;;  %v2263_v35 = vcombine.low %v9040_v36, %v9026_v3 }
 0x1f6   : > { %v9028_v40 = vpop.permute.xlu1 %1211  ;;  %v9030_v60 = vpop.permute.xlu0 %985  ;;  %13326 = vst [vmem:[#allocation32_spill] sm:$0xff] %v9055_v14 }
 0x1f7   : > { %13323 = vst [vmem:[#allocation29_spill] sm:$0xff] %v9033_v42  ;;  %v1079_v21 = vcombine.low %v9007_v62, %v9030_v60  ;;  %1865 = vrot.lane.b32.xlu0 %v9033_v42, %s13270_s27  ;;  %13324 = vst [vmem:[#allocation30_spill] sm:$0xff] %v9045_v10  ;;  %v9074_v50 = vrot.slane %v2263_v35, %v8501_v37  ;;  %v1809_v35 = vcombine.high %v8876_v26, %v8893_v59 }
 0x1f9   : > { %v9048_v7 = vrot.slane %v1079_v21, %v8491_v18  ;;  %v1571_v21 = vcombine.high %v8844_v53, %v8857_v2  ;;  %13327 = vst [vmem:[#allocation33_spill] sm:$0xff] %v9074_v50 }
 0x1fa   : > { %v9050_v22 = vpop.permute.xlu1 %1219  ;;  %v9052_v17 = vpop.permute.xlu0 %1215 }
 0x1fb   : > { %13325 = vst [vmem:[#allocation31_spill] sm:$0xff] %v9048_v7  ;;  %2126 = vrot.lane.b32.xlu0 %v9055_v14, %s8336_s16  ;;  %v1096_v30 = vcombine.high %v9045_v10, %v9048_v7  ;;  %v1301_v42 = vcombine.low %v9028_v40, %v9050_v22  ;;  %v2496_v14 = vcombine.high %v8849_v28, %v8840_v41 }
 0x1fc   : > { %v1555_v7 = vcombine.high %v8820_v29, %v8842_v49  ;;  %v9090_v2 = vrot.slane %v1571_v21, %v8491_v18  ;;  %v1793_v21 = vcombine.high %v8855_v61, %v8874_v25 }
 0x1fd   : > { %v9077_v8 = vrot.slane %v1096_v30, %v8501_v37  ;;  %v9095_v41 = vrot.slane %v1301_v42, %v8491_v18  ;;  %v9105_v30 = vrot.slane %v2496_v14, %v8501_v37  ;;  %v9121_v14 = vrot.slane %v1809_v35, %v8491_v18 }
 0x1fe   : > { %v9069_v13 = vpop.permute.xlu1 %971  ;;  %v9071_v16 = vpop.permute.xlu0 %1223  ;;  %v9133_v59 = vrot.slane %v1793_v21, %v8491_v18 }
 0x1ff   : > { %13328 = vst [vmem:[#allocation34_spill] sm:$0xff] %v9077_v8  ;;  %v1317_v53 = vcombine.low %v9052_v17, %v9071_v16  ;;  %2364 = vrot.lane.b32.xlu0 %v9074_v50, %s8336_s16  ;;  %1164 = vrot.lane.b32.xlu1 %v9077_v8, %s13270_s27  ;;  %13329 = vst [vmem:[#allocation35_spill] sm:$0xff] %v9095_v41  ;;  %v9108_v50 = vrot.slane %v1555_v7, %v8491_v18 }
 0x200   : > { %13331 = vst [vmem:[#allocation37_spill] sm:$0xff] %v9105_v30  ;;  %v1840_v35 = vcombine.low %v9133_v59, %v9121_v14 }
 0x201   : > { %v9098_v29 = vrot.slane %v1317_v53, %v8491_v18  ;;  %v1602_v42 = vcombine.low %v9108_v50, %v9090_v2 }
 0x202   : > { %v9100_v49 = vpop.permute.xlu1 %979  ;;  %v9102_v28 = vpop.permute.xlu0 %975  ;;  %v9167_v23 = vrot.slane %v1840_v35, %v8501_v37 }
 0x203   : > { %13330 = vst [vmem:[#allocation36_spill] sm:$0xff] %v9098_v29  ;;  %v1334_v26 = vcombine.high %v9095_v41, %v9098_v29  ;;  %2604 = vrot.lane.b32.xlu0 %v9105_v30, %s8337_s17  ;;  %v995_v7 = vcombine.low %v9069_v13, %v9100_v49  ;;  %v9148_v10 = vrot.slane %v1602_v42, %v8501_v37 }
 0x204   : > { %v1503_v42 = vcombine.high %v8917_v9, %v8935_v1  ;;  %13335 = vst [vmem:[#allocation41_spill] sm:$0xff] %v9167_v23  ;;  %v2332_v1 = vcombine.high %v8945_v56, %v8931_v57  ;;  %v1725_v56 = vcombine.high %v8933_v63, %v8955_v33 }
 0x205   : > { %v9126_v61 = vrot.slane %v1334_v26, %v8501_v37  ;;  %v9142_v8 = vrot.slane %v995_v7, %v8491_v18  ;;  %13334 = vst [vmem:[#allocation40_spill] sm:$0xff] %v9148_v10 }
 0x206   : > { %v9128_v25 = vpop.permute.xlu1 %1209  ;;  %v9130_v53 = vpop.permute.xlu0 %983 }
 0x207   : > { %13332 = vst [vmem:[#allocation38_spill] sm:$0xff] %v9126_v61  ;;  %v1011_v30 = vcombine.low %v9102_v28, %v9130_v53  ;;  %1402 = vrot.lane.b32.xlu1 %v9126_v61, %s13270_s27 }
 0x209   : > { %v9145_v26 = vrot.slane %v1011_v30, %v8491_v18  ;;  %v2094_v30 = vcombine.high %v8922_v45, %v8911_v52  ;;  %v9190_v45 = vrot.slane %v1503_v42, %v8491_v18 }
 0x20a   : > { %v9150_v21 = vpop.permute.xlu1 %1217  ;;  %v9152_v29 = vpop.permute.xlu0 %1213 }
 0x20b   : > { %13333 = vst [vmem:[#allocation39_spill] sm:$0xff] %v9145_v26  ;;  %v1028_v61 = vcombine.high %v9142_v8, %v9145_v26  ;;  %1663 = vrot.lane.b32.xlu1 %v9148_v10, %s8336_s16  ;;  %v1233_v7 = vcombine.low %v9128_v25, %v9150_v21  ;;  %v1487_v10 = vcombine.high %v8891_v12, %v8915_v47 }
 0x20c   : > { %v9187_v9 = vrot.slane %v2094_v30, %v8501_v37  ;;  %v1741_v47 = vcombine.high %v8957_v27, %v8976_v11  ;;  %v9216_v11 = vrot.slane %v2332_v1, %v8501_v37  ;;  %v9233_v1 = vrot.slane %v1725_v56, %v8491_v18 }
 0x20d   : > { %v9170_v41 = vrot.slane %v1028_v61, %v8501_v37  ;;  %v9195_v12 = vrot.slane %v1233_v7, %v8491_v18  ;;  %v9205_v57 = vrot.slane %v1487_v10, %v8491_v18  ;;  %v1080_v7 = vcombine.high %v9007_v62, %v9030_v60 }
 0x20e   : > { %v9172_v15 = vpop.permute.xlu1 %734  ;;  %v9174_v26 = vpop.permute.xlu0 %1221  ;;  %13337 = vst [vmem:[#allocation43_spill] sm:$0xff] %v9187_v9  ;;  %13339 = vst [vmem:[#allocation45_spill] sm:$0xff] %v9216_v11  ;;  %v9221_v10 = vrot.slane %v1741_v47, %v8491_v18  ;;  %v1064_v47 = vcombine.high %v8974_v24, %v9005_v38 }
 0x20f   : > { %13336 = vst [vmem:[#allocation42_spill] sm:$0xff] %v9170_v41  ;;  %v1249_v52 = vcombine.low %v9152_v29, %v9174_v26  ;;  %1901 = vrot.lane.b32.xlu1 %v9167_v23, %s8336_s16  ;;  %1136 = vrot.lane.b32.xlu0 %v9170_v41, %s13270_s27  ;;  %v1534_v42 = vcombine.low %v9205_v57, %v9190_v45 }
 0x210   : > { %v1772_v62 = vcombine.low %v9233_v1, %v9221_v10 }
 0x211   : > { %v9198_v61 = vrot.slane %v1249_v52, %v8491_v18 }
 0x212   : > { %v9200_v35 = vpop.permute.xlu1 %742  ;;  %v9202_v41 = vpop.permute.xlu0 %738 }
 0x213   : > { %13338 = vst [vmem:[#allocation44_spill] sm:$0xff] %v9198_v61  ;;  %v1266_v27 = vcombine.high %v9195_v12, %v9198_v61  ;;  %2162 = vrot.lane.b32.xlu1 %v9187_v9, %s8337_s17  ;;  %v824_v63 = vcombine.low %v9172_v15, %v9200_v35 }
 0x215   : > { %v9226_v33 = vrot.slane %v1266_v27, %v8501_v37  ;;  %v9245_v60 = vrot.slane %v824_v63, %v8491_v18  ;;  %v9251_v27 = vrot.slane %v1534_v42, %v8501_v37  ;;  %v2026_v42 = vcombine.high %v9015_v51, %v9001_v6 }
 0x216   : > { %v9230_v52 = vpop.permute.xlu1 %732  ;;  %v747_v30 = vpop.permute.xlu0 %746  ;;  %v9271_v63 = vrot.slane %v1064_v47, %v8491_v18 }
 0x217   : > { %13340 = vst [vmem:[#allocation46_spill] sm:$0xff] %v9226_v33  ;;  %v840_v9 = vcombine.low %v9202_v41, %v747_v30  ;;  %2400 = vrot.lane.b32.xlu1 %v9216_v11, %s8337_s17  ;;  %1374 = vrot.lane.b32.xlu0 %v9226_v33, %s13270_s27  ;;  %13341 = vst [vmem:[#allocation47_spill] sm:$0xff] %v9251_v27  ;;  %v9254_v11 = vrot.slane %v1080_v7, %v8491_v18 }
 0x218   : > { %v1318_v33 = vcombine.high %v9052_v17, %v9071_v16  ;;  %v1302_v16 = vcombine.high %v9028_v40, %v9050_v22  ;;  %v9278_v7 = vrot.slane %v1772_v62, %v8501_v37  ;;  %v9295_v22 = vrot.slane %v2026_v42, %v8501_v37 }
 0x219   : > { %v9248_v56 = vrot.slane %v840_v9, %v8491_v18  ;;  %v2264_v62 = vcombine.high %v9040_v36, %v9026_v3  ;;  %v996_v42 = vcombine.high %v9069_v13, %v9100_v49  ;;  %v1603_v13 = vcombine.high %v9108_v50, %v9090_v2  ;;  %v13381_v36 = vld [vmem:[#allocation30_spill] sm:$0xff] }
 0x21a   : > { %v9258_v23 = vpop.permute.xlu1 %740  ;;  %v9260_v24 = vpop.permute.xlu0 %736  ;;  %13342 = vst [vmem:[#allocation48_spill] sm:$0xff] %v9278_v7  ;;  %v9286_v6 = vrot.slane %v1318_v33, %v8491_v18  ;;  %v1316_v40 = vrot.slane %v1302_v16, %v8491_v18  ;;  %v1012_v33 = vcombine.high %v9102_v28, %v9130_v53  ;;  %v1250_v28 = vcombine.high %v9152_v29, %v9174_v26 }
 0x21b   : > { %v857_v9 = vcombine.high %v9245_v60, %v9248_v56  ;;  %1635 = vrot.lane.b32.xlu0 %v9251_v27, %s8336_s16  ;;  %v756_v17 = vcombine.low %v9230_v52, %v9258_v23  ;;  %v1111_v27 = vcombine.low %v9271_v63, %v9254_v11  ;;  %v841_v49 = vcombine.high %v9202_v41, %v747_v30 }
 0x21c   : > { %v1026_v3 = vrot.slane %v1012_v33, %v8491_v18  ;;  %v825_v29 = vcombine.high %v9172_v15, %v9200_v35  ;;  %v1264_v2 = vrot.slane %v1250_v28, %v8491_v18  ;;  %v1841_v26 = vcombine.high %v9133_v59, %v9121_v14 }
 0x21d   : > { %v9281_v38 = vrot.slane %v857_v9, %v8501_v37  ;;  %v9302_v9 = vrot.slane %v756_v17, %v8491_v18  ;;  %v1010_v17 = vrot.slane %v996_v42, %v8491_v18  ;;  %v1112_v28 = vcombine.high %v9271_v63, %v9254_v11 }
 0x21e   : > { %v745_v51 = vpop.permute.xlu0 %744  ;;  %v839_v15 = vrot.slane %v825_v29, %v8491_v18  ;;  %v9362_v14 = vrot.slane %v1841_v26, %v8501_v37  ;;  %v1350_v11 = vcombine.high %v1316_v40, %v9286_v6 }
 0x21f   : > { %13343 = vst [vmem:[#allocation49_spill] sm:$0xff] %v9281_v38  ;;  %v772_v47 = vcombine.low %v9260_v24, %v745_v51  ;;  %1873 = vrot.lane.b32.xlu0 %v9278_v7, %s8336_s16  ;;  %925 = vrot.lane.b32.xlu1 %v9281_v38, %s13270_s27  ;;  %v1349_v7 = vcombine.low %v1316_v40, %v9286_v6 }
 0x220   : > { %v9309_v38 = vrot.slane %v1111_v27, %v8501_v37  ;;  %v9325_v27 = vrot.slane %v2264_v62, %v8501_v37  ;;  %v1043_v50 = vcombine.low %v1010_v17, %v1026_v3  ;;  %v1535_v62 = vcombine.high %v9205_v57, %v9190_v45 }
 0x221   : > { %v9305_v61 = vrot.slane %v772_v47, %v8491_v18  ;;  %v9331_v16 = vrot.slane %v1349_v7, %v8501_v37  ;;  %v1234_v47 = vcombine.high %v9128_v25, %v9150_v21  ;;  %v855_v25 = vrot.slane %v841_v49, %v8491_v18 }
 0x222   : > { %v9350_v21 = vrot.slane %v1603_v13, %v8501_v37  ;;  %v9359_v7 = vrot.slane %v1043_v50, %v8501_v37  ;;  %v773_v33 = vcombine.high %v9260_v24, %v745_v51  ;;  %v757_v13 = vcombine.high %v9230_v52, %v9258_v23 }
 0x223   : > { %2134 = vrot.lane.b32.xlu0 %v9295_v22, %s8337_s17  ;;  %1172 = vrot.lane.b32.xlu1 %v9309_v38, %s8336_s16  ;;  %v789_v53 = vcombine.high %v9302_v9, %v9305_v61  ;;  %v1248_v30 = vrot.slane %v1234_v47, %v8491_v18  ;;  %v872_v59 = vcombine.low %v839_v15, %v855_v25 }
 0x224   : > { %v1773_v45 = vcombine.high %v9233_v1, %v9221_v10  ;;  %v787_v57 = vrot.slane %v773_v33, %v8491_v18  ;;  %v9389_v24 = vrot.slane %v1535_v62, %v8501_v37  ;;  %v9393_v63 = vrot.slane %v1112_v28, %v8501_v37 }
 0x225   : > { %v9344_v41 = vrot.slane %v789_v53, %v8501_v37  ;;  %v1281_v35 = vcombine.low %v1248_v30, %v1264_v2  ;;  %v9377_v53 = vrot.slane %v872_v59, %v8501_v37  ;;  %v771_v23 = vrot.slane %v757_v13, %v8491_v18 }
 0x226   : > { %v9401_v10 = vrot.slane %v1773_v45, %v8501_v37  ;;  %v873_v1 = vcombine.high %v839_v15, %v855_v25  ;;  %v9404_v51 = vrot.slane %v1350_v11, %v8501_v37  ;;  %v1044_v6 = vcombine.high %v1010_v17, %v1026_v3 }
 0x227   : > { %2372 = vrot.lane.b32.xlu0 %v9325_v27, %s8337_s17  ;;  %1410 = vrot.lane.b32.xlu1 %v9331_v16, %s8336_s16  ;;  %v9372_v42 = vrot.slane %v1281_v35, %v8501_v37  ;;  %v804_v52 = vcombine.low %v771_v23, %v787_v57  ;;  %v13344_v47 = vcombine.low %v8681_v31, %v8684_v32  ;;  %v13345_v17 = vmov 0.0  }
 0x228   : > { %v9414_v49 = vrot.slane %v873_v1, %v8501_v37  ;;  %v1282_v50 = vcombine.high %v1248_v30, %v1264_v2  ;;  %v9427_v3 = vrot.slane %v1044_v6, %v8501_v37  ;;  %v13346_v25 = vcombine.low %v8763_v4, %v8766_v5  ;;  %v9448_v4 = vpop.permute.xlu1 %2616  ;;  %v13353_v6 = vld [vmem:[#allocation13_spill] sm:$0xff] }
 0x229   : > { %v9411_v40 = vrot.slane %v804_v52, %v8501_v37  ;;  %v9420_v29 = vrot.slane %v13344_v47, %v8501_v37  ;;  %v805_v32 = vcombine.high %v771_v23, %v787_v57  ;;  %v13347_v15 = vcombine.low %v8709_v43, %v8712_v44 }
 0x22a   : > { %v9435_v31 = vrot.slane %v13346_v25, %v8501_v37  ;;  %v9441_v2 = vrot.slane %v1282_v50, %v8501_v37  ;;  %v2580_v59 = vcombine.high %v8698_v39, %v13345_v17  ;;  %v13348_v62 = vcombine.low %v8905_v58, %v8908_v46 }
 0x22b   : > { %897 = vrot.lane.b32.xlu0 %v9344_v41, %s13270_s27  ;;  %1671 = vrot.lane.b32.xlu1 %v9350_v21, %s8337_s17  ;;  %v2579_v26 = vcombine.high %v9420_v29, %v13345_v17  ;;  %v9451_v5 = vrot.slane %v805_v32, %v8501_v37  ;;  %v9457_v35 = vrot.slane %v13347_v15, %v8501_v37  ;;  %v13358_v32 = vld [vmem:[#allocation11_spill] sm:$0xff] }
 0x22c   : > { %v2347_v30 = vcombine.high %v9435_v31, %v13345_v17  ;;  %v9465_v33 = vrot.slane %v13348_v62, %v8501_v37  ;;  %v13349_v39 = vcombine.low %v8736_v54, %v8739_v55  ;;  %v13350_v45 = vcombine.low %v8798_v19, %v8801_v20  ;;  %v13352_v19 = vld [vmem:[#allocation12_spill] sm:$0xff]  ;;  %v13360_v62 = vld [vmem:[#allocation17_spill] sm:$0xff] }
 0x22d   : > { %v2511_v43 = vcombine.high %v9457_v35, %v13345_v17  ;;  %v2110_v54 = vcombine.high %v8756_v0, %v13345_v17  ;;  %v13351_v11 = vcombine.low %v8834_v48, %v8837_v34  ;;  %v2348_v20 = vcombine.high %v13352_v19, %v13345_v17  ;;  %v9512_v0 = vpop.permute.xlu0 %2588  ;;  %v13354_v48 = vld [vmem:[#allocation35_spill] sm:$0xff]  ;;  %v13355_v34 = vld [vmem:[#allocation36_spill] sm:$0xff] }
 0x22e   : > { %v9478_v44 = vrot.slane %v13349_v39, %v8501_v37  ;;  %v1856_v58 = vcombine.high %v9465_v33, %v13345_v17  ;;  %v9492_v57 = vrot.slane %v13350_v45, %v8501_v37  ;;  %v2581_v47 = vcombine.high %v13353_v6, %v13345_v17 }
 0x22f   : > { %1144 = vrot.lane.b32.xlu0 %v9359_v7, %s8336_s16  ;;  %1909 = vrot.lane.b32.xlu1 %v9362_v14, %s8337_s17  ;;  %v9504_v23 = vrot.slane %v13351_v11, %v8501_v37  ;;  %v13356_v50 = vcombine.low %v13354_v48, %v13355_v34  ;;  %v13363_v11 = vld [vmem:[#allocation22_spill] sm:$0xff] }
 0x230   : > { %v2109_v13 = vcombine.high %v9478_v44, %v13345_v17  ;;  %v2041_v55 = vcombine.high %v9492_v57, %v13345_v17  ;;  %v13367_v34 = vld [vmem:[#allocation26_spill] sm:$0xff] }
 0x231   : > { %v9470_v28 = vpop.permute.xlu1 %2146  ;;  %v2279_v1 = vcombine.high %v9504_v23, %v13345_v17 }
 0x233   : > { %1382 = vrot.lane.b32.xlu0 %v9372_v42, %s8336_s16  ;;  %933 = vrot.lane.b32.xlu1 %v9377_v53, %s8336_s16 }
 0x237   : > { %1643 = vrot.lane.b32.xlu0 %v9389_v24, %s8337_s17  ;;  %1180 = vrot.lane.b32.xlu1 %v9393_v63, %s8337_s17 }
 0x239   : > { %v9484_v46 = vpop.permute.xlu1 %2384 }
 0x23b   : > { %1881 = vrot.lane.b32.xlu0 %v9401_v10, %s8337_s17  ;;  %1418 = vrot.lane.b32.xlu1 %v9404_v51, %s8337_s17 }
 0x23d   : > { %v9508_v52 = vpop.permute.xlu1 %2624 }
 0x23f   : > { %905 = vrot.lane.b32.xlu0 %v9411_v40, %s8336_s16  ;;  %941 = vrot.lane.b32.xlu1 %v9414_v49, %s8337_s17 }
 0x241   : > { %v9530_v15 = vpop.permute.xlu0 %2118 }
 0x243   : > { %1152 = vrot.lane.b32.xlu0 %v9427_v3, %s8337_s17  ;;  %2612 = vrot.lane.b32.xlu1 %v2579_v26, %s13241_s21  ;;  %v9522_v26 = vrot.slane %v13356_v50, %v8501_v37  ;;  %v13368_v50 = vld [vmem:[#allocation27_spill] sm:$0xff] }
 0x245   : > { %13357 = vst [vmem:[#allocation12_spill] sm:$0xff] %v9522_v26 }
 0x247   : > { %1390 = vrot.lane.b32.xlu0 %v9441_v2, %s8337_s17  ;;  %2380 = vrot.lane.b32.xlu1 %v2347_v30, %s13241_s21  ;;  %v2512_v30 = vcombine.high %v13358_v32, %v13345_v17  ;;  %v13369_v32 = vcombine.low %v13367_v34, %v13368_v50 }
 0x249   : > { %v9544_v45 = vpop.permute.xlu0 %2356 }
 0x24b   : > { %913 = vrot.lane.b32.xlu0 %v9451_v5, %s8337_s17  ;;  %2620 = vrot.lane.b32.xlu1 %v2580_v59, %s13268_s20  ;;  %v13359_v59 = vld [vmem:[#allocation16_spill] sm:$0xff] }
 0x24f   : > { %2584 = vrot.lane.b32.xlu0 %v2511_v43, %s13241_s21  ;;  %1889 = vrot.lane.b32.xlu1 %v1856_v58, %s13241_s21  ;;  %v13361_v43 = vcombine.low %v13359_v59, %v13360_v62  ;;  %v1365_v58 = vcombine.high %v9522_v26, %v13345_v17  ;;  %v13370_v59 = vld [vmem:[#allocation20_spill] sm:$0xff] }
 0x250   : > { %v1857_v62 = vcombine.high %v13370_v59, %v13345_v17 }
 0x251   : > { %v9524_v25 = vpop.permute.xlu1 %1655  ;;  %v9536_v39 = vrot.slane %v13361_v43, %v8501_v37  ;;  %v9570_v43 = vpop.permute.xlu0 %2596 }
 0x253   : > { %2142 = vrot.lane.b32.xlu0 %v2109_v13, %s13241_s21  ;;  %2150 = vrot.lane.b32.xlu1 %v2110_v54, %s13268_s20  ;;  %v1618_v54 = vcombine.high %v9536_v39, %v13345_v17 }
 0x257   : > { %2114 = vrot.lane.b32.xlu0 %v2041_v55, %s13241_s21  ;;  %2388 = vrot.lane.b32.xlu1 %v2348_v20, %s13268_s20  ;;  %v13362_v55 = vld [vmem:[#allocation21_spill] sm:$0xff] }
 0x258   : > { %v13364_v19 = vcombine.low %v13362_v55, %v13363_v11 }
 0x259   : > { %v9540_v13 = vpop.permute.xlu1 %1893 }
 0x25a   : > { %v9552_v20 = vrot.slane %v13364_v19, %v8501_v37 }
 0x25b   : > { %2352 = vrot.lane.b32.xlu0 %v2279_v1, %s13241_s21  ;;  %2628 = vrot.lane.b32.xlu1 %v2581_v47, %s13272_s30  ;;  %v13366_v1 = vld [vmem:[#allocation19_spill] sm:$0xff] }
 0x25c   : > { %13365 = vst [vmem:[#allocation13_spill] sm:$0xff] %v9552_v20  ;;  %v1619_v6 = vcombine.high %v13366_v1, %v13345_v17  ;;  %v1550_v48 = vcombine.high %v9552_v20, %v13345_v17  ;;  %v13373_v1 = vld [vmem:[#allocation14_spill] sm:$0xff]  ;;  %v13393_v20 = vld [vmem:[#allocation40_spill] sm:$0xff] }
 0x25d   : > { %v9558_v47 = vpop.permute.xlu1 %2154 }
 0x25f   : > { %2592 = vrot.lane.b32.xlu0 %v2512_v30, %s13268_s20  ;;  %1398 = vrot.lane.b32.xlu1 %v1365_v58, %s13241_s21  ;;  %v9566_v30 = vrot.slane %v13369_v32, %v8501_v37  ;;  %v13375_v32 = vld [vmem:[#allocation15_spill] sm:$0xff] }
 0x260   : > { %v2280_v59 = vcombine.high %v13375_v32, %v13345_v17 }
 0x261   : > { %v1788_v58 = vcombine.high %v9566_v30, %v13345_v17  ;;  %v9578_v11 = vpop.permute.xlu1 %2392  ;;  %v9580_v19 = vpop.permute.xlu0 %1627 }
 0x262   : > { %13372 = vst [vmem:[#allocation35_spill] sm:$0xff] %v9580_v19 }
 0x263   : > { %1651 = vrot.lane.b32.xlu0 %v1618_v54, %s13241_s21  ;;  %1659 = vrot.lane.b32.xlu1 %v1619_v6, %s13268_s20  ;;  %v13371_v54 = vld [vmem:[#allocation23_spill] sm:$0xff]  ;;  %v2042_v6 = vcombine.high %v13373_v1, %v13345_v17 }
 0x264   : > { %v2111_v55 = vcombine.high %v13371_v54, %v13345_v17 }
 0x267   : > { %1623 = vrot.lane.b32.xlu0 %v1550_v48, %s13241_s21  ;;  %1897 = vrot.lane.b32.xlu1 %v1857_v62, %s13268_s20  ;;  %v13374_v48 = vld [vmem:[#allocation24_spill] sm:$0xff]  ;;  %v9594_v62 = vpop.permute.xlu1 %2632 }
 0x268   : > { %v2349_v34 = vcombine.high %v13374_v48, %v13345_v17 }
 0x269   : > { %v9588_v50 = vpop.permute.xlu0 %1865 }
 0x26b   : > { %1861 = vrot.lane.b32.xlu0 %v1788_v58, %s13241_s21  ;;  %2158 = vrot.lane.b32.xlu1 %v2111_v55, %s13272_s30  ;;  %v13376_v58 = vld [vmem:[#allocation28_spill] sm:$0xff]  ;;  %v13377_v55 = vcombine.low %v9245_v60, %v9248_v56 }
 0x26c   : > { %v2582_v54 = vcombine.high %v13376_v58, %v13345_v17  ;;  %v13382_v58 = vld [vmem:[#allocation31_spill] sm:$0xff] }
 0x26d   : > { %v9602_v1 = vrot.slane %v13377_v55, %v8501_v37  ;;  %v13383_v18 = vcombine.low %v13381_v36, %v13382_v58 }
 0x26f   : > { %2122 = vrot.lane.b32.xlu0 %v2042_v6, %s13268_s20  ;;  %2396 = vrot.lane.b32.xlu1 %v2349_v34, %s13272_s30  ;;  %13378 = vst [vmem:[#allocation36_spill] sm:$0xff] %v9602_v1  ;;  %v13379_v6 = vld [vmem:[#allocation18_spill] sm:$0xff]  ;;  %v9608_v34 = vpop.permute.xlu0 %2126  ;;  %v9616_v19 = vrot.slane %v13383_v18, %v8501_v37  ;;  %v888_v60 = vcombine.high %v9602_v1, %v13345_v17  ;;  %v13389_v1 = vld [vmem:[#allocation44_spill] sm:$0xff] }
 0x270   : > { %v2513_v48 = vcombine.high %v13379_v6, %v13345_v17  ;;  %13380 = vst [vmem:[#allocation11_spill] sm:$0xff] %v9608_v34  ;;  %v13388_v18 = vld [vmem:[#allocation34_spill] sm:$0xff] }
 0x271   : > { %v9610_v32 = vpop.permute.xlu1 %1164  ;;  %v1128_v36 = vcombine.high %v13388_v18, %v13345_v17 }
 0x273   : > { %2360 = vrot.lane.b32.xlu0 %v2280_v59, %s13268_s20  ;;  %2636 = vrot.lane.b32.xlu1 %v2582_v54, %s8335_s15  ;;  %v1127_v59 = vcombine.high %v9616_v19, %v13345_v17  ;;  %v13385_v54 = vld [vmem:[#allocation39_spill] sm:$0xff]  ;;  %v9634_v58 = vpop.permute.xlu0 %2364 }
 0x274   : > { %v13386_v55 = vcombine.low %v9142_v8, %v13385_v54  ;;  %v13390_v8 = vcombine.low %v9195_v12, %v13389_v1  ;;  %v13394_v12 = vld [vmem:[#allocation25_spill] sm:$0xff] }
 0x275   : > { %v1551_v1 = vcombine.high %v13394_v12, %v13345_v17  ;;  %v13400_v12 = vld [vmem:[#allocation32_spill] sm:$0xff] }
 0x276   : > { %v9630_v6 = vrot.slane %v13386_v55, %v8501_v37  ;;  %v9646_v54 = vrot.slane %v13390_v8, %v8501_v37  ;;  %v13392_v55 = vld [vmem:[#allocation38_spill] sm:$0xff]  ;;  %v13396_v8 = vld [vmem:[#allocation41_spill] sm:$0xff] }
 0x277   : > { %2600 = vrot.lane.b32.xlu0 %v2513_v48, %s13272_s30  ;;  %921 = vrot.lane.b32.xlu1 %v888_v60, %s13241_s21  ;;  %v1366_v18 = vcombine.high %v13392_v55, %v13345_v17  ;;  %v1858_v55 = vcombine.high %v13396_v8, %v13345_v17  ;;  %v2043_v8 = vcombine.high %v13400_v12, %v13345_v17 }
 0x278   : > { %13387 = vst [vmem:[#allocation17_spill] sm:$0xff] %v9630_v6  ;;  %v1059_v60 = vcombine.high %v9630_v6, %v13345_v17  ;;  %13391 = vst [vmem:[#allocation21_spill] sm:$0xff] %v9646_v54  ;;  %v1297_v6 = vcombine.high %v9646_v54, %v13345_v17  ;;  %v2282_v12 = vcombine.high %v9325_v27, %v13345_v17 }
 0x279   : > { %v9622_v56 = vpop.permute.xlu1 %1402 }
 0x27a   : > { %13384 = vst [vmem:[#allocation16_spill] sm:$0xff] %v9622_v56  ;;  %v1620_v56 = vcombine.high %v13393_v20, %v13345_v17  ;;  %v13397_v20 = vld [vmem:[#allocation29_spill] sm:$0xff] }
 0x27b   : > { %1160 = vrot.lane.b32.xlu0 %v1127_v59, %s13241_s21  ;;  %1168 = vrot.lane.b32.xlu1 %v1128_v36, %s13268_s20  ;;  %v9652_v59 = vpop.permute.xlu0 %2604  ;;  %v1789_v54 = vcombine.high %v13397_v20, %v13345_v17  ;;  %v13403_v20 = vld [vmem:[#allocation33_spill] sm:$0xff] }
 0x27d   : > { %v9638_v48 = vpop.permute.xlu1 %1663 }
 0x27f   : > { %1132 = vrot.lane.b32.xlu0 %v1059_v60, %s13241_s21  ;;  %1406 = vrot.lane.b32.xlu1 %v1366_v18, %s13268_s20 }
 0x281   : > { %v9654_v36 = vpop.permute.xlu1 %1901  ;;  %v9664_v60 = vpop.permute.xlu0 %1136 }
 0x282   : > { %13395 = vst [vmem:[#allocation22_spill] sm:$0xff] %v9664_v60 }
 0x283   : > { %1370 = vrot.lane.b32.xlu0 %v1297_v6, %s13241_s21  ;;  %1667 = vrot.lane.b32.xlu1 %v1620_v56, %s13272_s30  ;;  %v13399_v56 = vld [vmem:[#allocation43_spill] sm:$0xff] }
 0x284   : > { %v2112_v26 = vcombine.high %v13399_v56, %v13345_v17  ;;  %v2281_v56 = vcombine.high %v13403_v20, %v13345_v17 }
 0x285   : > { %v9668_v18 = vpop.permute.xlu1 %2162 }
 0x287   : > { %1631 = vrot.lane.b32.xlu0 %v1551_v1, %s13268_s20  ;;  %1905 = vrot.lane.b32.xlu1 %v1858_v55, %s13272_s30  ;;  %v13402_v55 = vld [vmem:[#allocation45_spill] sm:$0xff] }
 0x288   : > { %v2350_v34 = vcombine.high %v13402_v55, %v13345_v17  ;;  %v13405_v55 = vld [vmem:[#allocation37_spill] sm:$0xff] }
 0x289   : > { %v9674_v6 = vpop.permute.xlu0 %1374  ;;  %v9682_v60 = vpop.permute.xlu1 %2400 }
 0x28a   : > { %13398 = vst [vmem:[#allocation19_spill] sm:$0xff] %v9674_v6  ;;  %v13409_v6 = vld [vmem:[#allocation49_spill] sm:$0xff] }
 0x28b   : > { %1869 = vrot.lane.b32.xlu0 %v1789_v54, %s13268_s20  ;;  %2166 = vrot.lane.b32.xlu1 %v2112_v26, %s8335_s15  ;;  %v889_v27 = vcombine.high %v13409_v6, %v13345_v17  ;;  %v13412_v6 = vld [vmem:[#allocation42_spill] sm:$0xff] }
 0x28d   : > { %v9684_v1 = vpop.permute.xlu0 %1635 }
 0x28e   : > { %13401 = vst [vmem:[#allocation26_spill] sm:$0xff] %v9684_v1  ;;  %v2514_v1 = vcombine.high %v13405_v55, %v13345_v17 }
 0x28f   : > { %2130 = vrot.lane.b32.xlu0 %v2043_v8, %s13272_s30  ;;  %2404 = vrot.lane.b32.xlu1 %v2350_v34, %s8335_s15  ;;  %v13406_v34 = vcombine.low %v9302_v9, %v9305_v61  ;;  %v1129_v61 = vcombine.high %v9309_v38, %v13345_v17  ;;  %v13414_v38 = vld [vmem:[#allocation46_spill] sm:$0xff] }
 0x291   : > { %v9692_v54 = vpop.permute.xlu1 %925  ;;  %v9694_v26 = vpop.permute.xlu0 %1873  ;;  %v9708_v20 = vrot.slane %v13406_v34, %v8501_v37 }
 0x292   : > { %13404 = vst [vmem:[#allocation27_spill] sm:$0xff] %v9692_v54 }
 0x293   : > { %2368 = vrot.lane.b32.xlu0 %v2281_v56, %s13272_s30  ;;  %2376 = vrot.lane.b32.xlu1 %v2282_v12, %s8335_s15  ;;  %13407 = vst [vmem:[#allocation20_spill] sm:$0xff] %v9708_v20  ;;  %v820_v12 = vcombine.high %v9708_v20, %v13345_v17  ;;  %v1791_v20 = vcombine.high %v9401_v10, %v13345_v17 }
 0x294   : > { %v821_v10 = vcombine.high %v9344_v41, %v13345_v17 }
 0x295   : > { %v9702_v8 = vpop.permute.xlu0 %2134  ;;  %v9710_v54 = vpop.permute.xlu1 %1172 }
 0x296   : > { %13408 = vst [vmem:[#allocation23_spill] sm:$0xff] %v9710_v54 }
 0x297   : > { %2608 = vrot.lane.b32.xlu0 %v2514_v1, %s8335_s15  ;;  %929 = vrot.lane.b32.xlu1 %v889_v27, %s13268_s20  ;;  %v1060_v1 = vcombine.high %v13412_v6, %v13345_v17  ;;  %v1367_v27 = vcombine.high %v9331_v16, %v13345_v17  ;;  %v13416_v16 = vld [vmem:[#allocation47_spill] sm:$0xff] }
 0x299   : > { %v9716_v56 = vpop.permute.xlu0 %2372  ;;  %v9720_v55 = vpop.permute.xlu1 %1410 }
 0x29a   : > { %13410 = vst [vmem:[#allocation14_spill] sm:$0xff] %v9720_v55 }
 0x29b   : > { %893 = vrot.lane.b32.xlu0 %v820_v12, %s13241_s21  ;;  %1176 = vrot.lane.b32.xlu1 %v1129_v61, %s13272_s30  ;;  %v1298_v12 = vcombine.high %v13414_v38, %v13345_v17  ;;  %s13464_s21 = smov 16  }
 0x29d   : > { %v9726_v9 = vpop.permute.xlu0 %897  ;;  %v9730_v34 = vpop.permute.xlu1 %1671 }
 0x29e   : > { %13411 = vst [vmem:[#allocation24_spill] sm:$0xff] %v9726_v9  ;;  %v1621_v9 = vcombine.high %v9350_v21, %v13345_v17  ;;  %v13419_v21 = vld [vmem:[#allocation48_spill] sm:$0xff] }
 0x29f   : > { %1140 = vrot.lane.b32.xlu0 %v1060_v1, %s13268_s20  ;;  %1414 = vrot.lane.b32.xlu1 %v1367_v27, %s13272_s30  ;;  %v1552_v1 = vcombine.high %v13416_v16, %v13345_v17 }
 0x2a1   : > { %v9736_v37 = vpop.permute.xlu0 %1144  ;;  %v9740_v61 = vpop.permute.xlu1 %1909 }
 0x2a2   : > { %13413 = vst [vmem:[#allocation15_spill] sm:$0xff] %v9736_v37  ;;  %v1859_v37 = vcombine.high %v9362_v14, %v13345_v17  ;;  %v2044_v14 = vcombine.high %v9295_v22, %v13345_v17 }
 0x2a3   : > { %1378 = vrot.lane.b32.xlu0 %v1298_v12, %s13268_s20  ;;  %1675 = vrot.lane.b32.xlu1 %v1621_v9, %s8335_s15  ;;  %v1790_v12 = vcombine.high %v13419_v21, %v13345_v17 }
 0x2a5   : > { %v9746_v6 = vpop.permute.xlu0 %1382  ;;  %v9750_v27 = vpop.permute.xlu1 %933 }
 0x2a6   : > { %13415 = vst [vmem:[#allocation28_spill] sm:$0xff] %v9746_v6  ;;  %13417 = vst [vmem:[#allocation18_spill] sm:$0xff] %v9750_v27 }
 0x2a7   : > { %1639 = vrot.lane.b32.xlu0 %v1552_v1, %s13272_s30  ;;  %1913 = vrot.lane.b32.xlu1 %v1859_v37, %s8335_s15  ;;  %v890_v1 = vcombine.high %v9377_v53, %v13345_v17  ;;  %v1061_v53 = vcombine.high %v9359_v7, %v13345_v17 }
 0x2a9   : > { %v9756_v38 = vpop.permute.xlu0 %1643  ;;  %v9760_v9 = vpop.permute.xlu1 %1180 }
 0x2aa   : > { %13418 = vst [vmem:[#allocation30_spill] sm:$0xff] %v9756_v38  ;;  %13420 = vst [vmem:[#allocation31_spill] sm:$0xff] %v9760_v9 }
 0x2ab   : > { %1877 = vrot.lane.b32.xlu0 %v1790_v12, %s13272_s30  ;;  %1885 = vrot.lane.b32.xlu1 %v1791_v20, %s8335_s15  ;;  %v1130_v12 = vcombine.high %v9393_v63, %v13345_v17  ;;  %v1299_v63 = vcombine.high %v9372_v42, %v13345_v17 }
 0x2ad   : > { %v9766_v16 = vpop.permute.xlu0 %1881  ;;  %v9770_v37 = vpop.permute.xlu1 %1418 }
 0x2ae   : > { %13421 = vst [vmem:[#allocation39_spill] sm:$0xff] %v9770_v37 }
 0x2af   : > { %2138 = vrot.lane.b32.xlu0 %v2044_v14, %s8335_s15  ;;  %937 = vrot.lane.b32.xlu1 %v890_v1, %s13272_s30  ;;  %v1368_v1 = vcombine.high %v9404_v51, %v13345_v17  ;;  %v1553_v51 = vcombine.high %v9389_v24, %v13345_v17  ;;  %v1062_v24 = vcombine.high %v9427_v3, %v13345_v17  ;;  %v2842_v3 = vld [vmem:[%s13177_s6] sm:$0xf] }
 0x2b1   : > { %v9776_v21 = vpop.permute.xlu0 %905  ;;  %v9780_v20 = vpop.permute.xlu1 %941 }
 0x2b2   : > { %13422 = vst [vmem:[#allocation34_spill] sm:$0xff] %v9776_v21  ;;  %13423 = vst [vmem:[#allocation44_spill] sm:$0xff] %v9780_v20 }
 0x2b3   : > { %901 = vrot.lane.b32.xlu0 %v821_v10, %s13268_s20  ;;  %1184 = vrot.lane.b32.xlu1 %v1130_v12, %s8335_s15  ;;  %v1300_v12 = vcombine.high %v9441_v2, %v13345_v17  ;;  %v822_v2 = vcombine.high %v9411_v40, %v13345_v17  ;;  %v823_v40 = vcombine.high %v9451_v5, %v13345_v17 }
 0x2b5   : > { %v9786_v22 = vpop.permute.xlu0 %1152  ;;  %v2613_v14 = vpop.permute.xlu1 %2612 }
 0x2b6   : > { %13424 = vst [vmem:[#allocation38_spill] sm:$0xff] %v9786_v22 }
 0x2b7   : > { %1148 = vrot.lane.b32.xlu0 %v1061_v53, %s13272_s30  ;;  %1422 = vrot.lane.b32.xlu1 %v1368_v1, %s8335_s15  ;;  %v891_v1 = vcombine.high %v9414_v49, %v13345_v17  ;;  %v455_v49 = vld [vmem:[%s13173_s2] sm:$0xf] }
 0x2b9   : > { %v9794_v41 = vpop.permute.xlu0 %1390  ;;  %v9798_v10 = vpop.permute.xlu1 %2380 }
 0x2ba   : > { %13425 = vst [vmem:[#allocation40_spill] sm:$0xff] %v9794_v41 }
 0x2bb   : > { %1386 = vrot.lane.b32.xlu0 %v1299_v63, %s13272_s30  ;;  %1394 = vrot.lane.b32.xlu1 %v1300_v12, %s8335_s15 }
 0x2bd   : > { %v9804_v7 = vpop.permute.xlu0 %913  ;;  %v2621_v53 = vpop.permute.xlu1 %2620 }
 0x2be   : > { %13426 = vst [vmem:[#allocation25_spill] sm:$0xff] %v9804_v7 }
 0x2bf   : > { %1647 = vrot.lane.b32.xlu0 %v1553_v51, %s8335_s15  ;;  %945 = vrot.lane.b32.xlu1 %v891_v1, %s8335_s15  ;;  %v8348_v1 = vmov 0  }
 0x2c0   : > { %8262 = vset.pattern.permute.xlu1 %v8348_v1  ;;  %8263 = vset.pattern.permute.xlu0 %v8348_v1 }
 0x2c1   : > { %v9812_v42 = vpop.permute.xlu0 %2584  ;;  %v9816_v63 = vpop.permute.xlu1 %1889 }
 0x2c3   : > { %909 = vrot.lane.b32.xlu0 %v822_v2, %s13272_s30  ;;  %2671 = vperm.xlu1 %8262, %v455_v49  }
 0x2c5   : > { %v2143_v12 = vpop.permute.xlu0 %2142  ;;  %v2151_v7 = vpop.permute.xlu1 %2150 }
 0x2c7   : > { %1156 = vrot.lane.b32.xlu0 %v1062_v24, %s8335_s15  ;;  %2845 = vperm.xlu1 %8262, %v2842_v3  }
 0x2c9   : > { %v9825_v51 = vpop.permute.xlu0 %2114  ;;  %v2389_v2 = vpop.permute.xlu1 %2388 }
 0x2cb   : > { %917 = vrot.lane.b32.xlu0 %v823_v40, %s8335_s15  ;;  %v2646_v40 = vsel %vm948_vm6, %v9420_v29, %v2613_v14 }
 0x2cc   : > { %v2647_v3 = vsel %vm950_vm7, %v2646_v40, %v9448_v4 }
 0x2cd   : > { %v2353_v24 = vpop.permute.xlu0 %2352  ;;  %v2629_v22 = vpop.permute.xlu1 %2628  ;;  %v2648_v27 = vsel %vm952_vm8, %v2647_v3, %v2621_v53 }
 0x2ce   : > { %v2649_v37 = vsel %vm954_vm9, %v2648_v27, %v9508_v52  ;;  %v2176_v27 = vsel %vm948_vm6, %v9478_v44, %v2143_v12 }
 0x2cf   : > { %v2650_v29 = vsel %vm956_vm10, %v2649_v37, %v2629_v22 }
 0x2d0   : > { %v2651_v55 = vsel %vm958_vm11, %v2650_v29, %v9594_v62  ;;  %v2177_v62 = vsel %vm950_vm7, %v2176_v27, %v9470_v28 }
 0x2d1   : > { %v2593_v21 = vpop.permute.xlu0 %2592  ;;  %v9833_v20 = vpop.permute.xlu1 %1398 }
 0x2d5   : > { %v9835_v38 = vpop.permute.xlu0 %1651  ;;  %v9837_v5 = vpop.permute.xlu1 %1659 }
 0x2d9   : > { %v9839_v1 = vpop.permute.xlu0 %1623  ;;  %v9841_v49 = vpop.permute.xlu1 %1897 }
 0x2da   : > { %13427 = vst [vmem:[#allocation41_spill] sm:$0xff] %v9839_v1 }
 0x2dd   : > { %v9845_v17 = vpop.permute.xlu0 %1861  ;;  %v2159_v41 = vpop.permute.xlu1 %2158 }
 0x2e1   : > { %v9850_v6 = vpop.permute.xlu0 %2122  ;;  %v2397_v9 = vpop.permute.xlu1 %2396 }
 0x2e5   : > { %v2361_v14 = vpop.permute.xlu0 %2360  ;;  %v2637_v4 = vpop.permute.xlu1 %2636 }
 0x2e6   : > { %v2652_v40 = vsel %vm960_vm12, %v2651_v55, %v2637_v4  ;;  %v2414_v4 = vsel %vm948_vm6, %v9435_v31, %v9798_v10  ;;  %v2639_v31 = vsel %vm948_vm6, %v9457_v35, %v9812_v42  ;;  %v2407_v10 = vsel %vm948_vm6, %v9504_v23, %v2353_v24 }
 0x2e7   : > { %v2656_v53 = vrot.slane %v2652_v40, 4  ;;  %v2178_v40 = vsel %vm952_vm8, %v2177_v62, %v2151_v7  ;;  %v2415_v44 = vsel %vm950_vm7, %v2414_v4, %v9484_v46  ;;  %v2640_v4 = vsel %vm950_vm7, %v2639_v31, %v9512_v0 }
 0x2e8   : > { %v2179_v12 = vsel %vm954_vm9, %v2178_v40, %v9558_v47  ;;  %v2416_v28 = vsel %vm952_vm8, %v2415_v44, %v2389_v2  ;;  %v2408_v35 = vsel %vm950_vm7, %v2407_v10, %v9544_v45  ;;  %v2641_v23 = vsel %vm952_vm8, %v2640_v4, %v2593_v21 }
 0x2e9   : > { %v2601_v3 = vpop.permute.xlu0 %2600  ;;  %2660 = vst [vmem:[#allocation3 + $0x20] sm:$0xf0] %v2656_v53  ;;  %v9858_v1 = vpop.permute.xlu1 %921  ;;  %v2180_v27 = vsel %vm956_vm10, %v2179_v12, %v2159_v41  ;;  %v2417_v46 = vsel %vm954_vm9, %v2416_v28, %v9578_v11  ;;  %v2409_v11 = vsel %vm952_vm8, %v2408_v35, %v2361_v14  ;;  %v2642_v0 = vsel %vm954_vm9, %v2641_v23, %v9570_v43 }
 0x2ea   : > { %13428 = vst [vmem:[#allocation29_spill] sm:$0xff] %v9858_v1  ;;  %v2181_v47 = vsel %vm958_vm11, %v2180_v27, %v9668_v18  ;;  %v2418_v2 = vsel %vm956_vm10, %v2417_v46, %v2397_v9  ;;  %v2410_v45 = vsel %vm954_vm9, %v2409_v11, %v9634_v58  ;;  %v2643_v44 = vsel %vm956_vm10, %v2642_v0, %v2601_v3 }
 0x2eb   : > { %v2419_v18 = vsel %vm958_vm11, %v2418_v2, %v9682_v60  ;;  %v1685_v28 = vsel %vm948_vm6, %v9536_v39, %v9835_v38  ;;  %v2644_v43 = vsel %vm958_vm11, %v2643_v44, %v9652_v59  ;;  %v1923_v39 = vsel %vm948_vm6, %v9465_v33, %v9816_v63  ;;  %v13432_v44 = vld [vmem:[#allocation16_spill] sm:$0xff] }
 0x2ec   : > { %v2169_v63 = vsel %vm948_vm6, %v9492_v57, %v9825_v51 }
 0x2ed   : > { %v9860_v54 = vpop.permute.xlu0 %1160  ;;  %v9862_v52 = vpop.permute.xlu1 %1168  ;;  %v2170_v11 = vsel %vm950_vm7, %v2169_v63, %v9530_v15 }
 0x2ee   : > { %v1194_v57 = vsel %vm948_vm6, %v9616_v19, %v9860_v54  ;;  %v13430_v54 = vld [vmem:[#allocation11_spill] sm:$0xff] }
 0x2ef   : > { %v1195_v19 = vsel %vm950_vm7, %v1194_v57, %v9610_v32 }
 0x2f0   : > { %v1196_v32 = vsel %vm952_vm8, %v1195_v19, %v9862_v52  ;;  %v13446_v19 = vld [vmem:[#allocation28_spill] sm:$0xff] }
 0x2f1   : > { %v9866_v37 = vpop.permute.xlu0 %1132  ;;  %v9868_v22 = vpop.permute.xlu1 %1406 }
 0x2f2   : > { %13429 = vst [vmem:[#allocation43_spill] sm:$0xff] %v9866_v37 }
 0x2f5   : > { %v9872_v55 = vpop.permute.xlu0 %1370  ;;  %v1668_v29 = vpop.permute.xlu1 %1667 }
 0x2f9   : > { %v9878_v53 = vpop.permute.xlu0 %1631  ;;  %v1906_v37 = vpop.permute.xlu1 %1905 }
 0x2fd   : > { %v9886_v1 = vpop.permute.xlu0 %1869  ;;  %v2167_v7 = vpop.permute.xlu1 %2166 }
 0x2fe   : > { %v2182_v41 = vsel %vm960_vm12, %v2181_v47, %v2167_v7  ;;  %v1924_v47 = vsel %vm950_vm7, %v1923_v39, %v9540_v13  ;;  %v1916_v13 = vsel %vm948_vm6, %v9566_v30, %v9845_v17  ;;  %v13437_v39 = vld [vmem:[#allocation14_spill] sm:$0xff] }
 0x2ff   : > { %v2186_v62 = vrot.slane %v2182_v41, 4  ;;  %v1925_v41 = vsel %vm952_vm8, %v1924_v47, %v9841_v49  ;;  %v1917_v17 = vsel %vm950_vm7, %v1916_v13, %v9588_v50 }
 0x301   : > { %v9903_v42 = vpop.permute.xlu0 %2130  ;;  %2190 = vst [vmem:[#allocation3 + $0x28] sm:$0xf0] %v2186_v62  ;;  %v2405_v9 = vpop.permute.xlu1 %2404 }
 0x302   : > { %v2420_v24 = vsel %vm960_vm12, %v2419_v18, %v2405_v9 }
 0x303   : > { %2422 = vst [vmem:[#allocation3 + $0x20] sm:$0xf] %v2420_v24  ;;  %v13431_v24 = vld [vmem:[#allocation12_spill] sm:$0xff] }
 0x304   : > { %v1432_v0 = vsel %vm948_vm6, %v13431_v24, %v9833_v20 }
 0x305   : > { %v2369_v40 = vpop.permute.xlu0 %2368  ;;  %v2377_v21 = vpop.permute.xlu1 %2376 }
 0x306   : > { %v2411_v14 = vsel %vm956_vm10, %v2410_v45, %v2369_v40 }
 0x307   : > { %v2412_v12 = vsel %vm958_vm11, %v2411_v14, %v9716_v56  ;;  %v1686_v56 = vsel %vm950_vm7, %v1685_v28, %v9524_v25  ;;  %v13433_v14 = vld [vmem:[#allocation23_spill] sm:$0xff] }
 0x308   : > { %v2413_v60 = vsel %vm960_vm12, %v2412_v12, %v2377_v21  ;;  %v1687_v59 = vsel %vm952_vm8, %v1686_v56, %v9837_v5  ;;  %v1433_v21 = vsel %vm950_vm7, %v1432_v0, %v13432_v44  ;;  %v1197_v12 = vsel %vm954_vm9, %v1196_v32, %v13433_v14  ;;  %v13450_v32 = vld [vmem:[#allocation40_spill] sm:$0xff]  ;;  %v13452_v44 = vld [vmem:[#allocation30_spill] sm:$0xff] }
 0x309   : > { %2421 = vst [vmem:[#allocation3 + $0x8] sm:$0xf] %v2413_v60  ;;  %v2609_v58 = vpop.permute.xlu0 %2608  ;;  %v9924_v27 = vpop.permute.xlu1 %929  ;;  %v1688_v25 = vsel %vm954_vm9, %v1687_v59, %v9638_v48  ;;  %v1926_v48 = vsel %vm954_vm9, %v1925_v41, %v9654_v36  ;;  %v2171_v36 = vsel %vm952_vm8, %v2170_v11, %v9850_v6  ;;  %v1434_v52 = vsel %vm952_vm8, %v1433_v21, %v9868_v22  ;;  %v13438_v22 = vld [vmem:[#allocation31_spill] sm:$0xff]  ;;  %v13440_v41 = vld [vmem:[#allocation36_spill] sm:$0xff] }
 0x30a   : > { %v2645_v3 = vsel %vm960_vm12, %v2644_v43, %v2609_v58  ;;  %v2668_v10 = vld [vmem:[#allocation3 + $0x20] sm:$0xff]  ;;  %v1689_v62 = vsel %vm956_vm10, %v1688_v25, %v1668_v29  ;;  %v1927_v29 = vsel %vm956_vm10, %v1926_v48, %v1906_v37  ;;  %v2172_v50 = vsel %vm954_vm9, %v2171_v36, %v13430_v54  ;;  %v13441_v48 = vld [vmem:[#allocation35_spill] sm:$0xff]  ;;  %v13453_v14 = vld [vmem:[#allocation20_spill] sm:$0xff] }
 0x30b   : > { %v2655_v31 = vrot.slane %v2645_v3, 4  ;;  %2701 = vmatprep.subr.mxu0 %v2668_v10  ;;  %v1690_v49 = vsel %vm958_vm11, %v1689_v62, %v9730_v34  ;;  %v1918_v34 = vsel %vm952_vm8, %v1917_v17, %v9886_v1  ;;  %v1928_v51 = vsel %vm958_vm11, %v1927_v29, %v9740_v61  ;;  %v13434_v58 = vld [vmem:[#allocation41_spill] sm:$0xff] }
 0x30c   : > { %v1919_v6 = vsel %vm954_vm9, %v1918_v34, %v9694_v26  ;;  %v2173_v1 = vsel %vm956_vm10, %v2172_v50, %v9903_v42  ;;  %v13435_v3 = vld [vmem:[#allocation13_spill] sm:$0xff]  ;;  %v1435_v59 = vsel %vm954_vm9, %v1434_v52, %v13437_v39  ;;  %v13447_v50 = vld [vmem:[#allocation43_spill] sm:$0xff] }
 0x30d   : > { %2659 = vst [vmem:[#allocation3 + $0x8] sm:$0xf0] %v2655_v31  ;;  %v9929_v46 = vpop.permute.xlu0 %893  ;;  %v1177_v7 = vpop.permute.xlu1 %1176  ;;  %v2174_v26 = vsel %vm958_vm11, %v2173_v1, %v9702_v8  ;;  %v1678_v31 = vsel %vm948_vm6, %v13435_v3, %v13434_v58  ;;  %v13436_v10 = vld [vmem:[#allocation21_spill] sm:$0xff] }
 0x30e   : > { %v1425_v56 = vsel %vm948_vm6, %v13436_v10, %v9872_v55  ;;  %v13439_v25 = vld [vmem:[#allocation29_spill] sm:$0xff]  ;;  %v13442_v55 = vld [vmem:[#allocation19_spill] sm:$0xff] }
 0x30f   : > { %v962_v62 = vsel %vm948_vm6, %v13440_v41, %v13439_v25 }
 0x311   : > { %v9936_v38 = vpop.permute.xlu0 %1140  ;;  %v1415_v2 = vpop.permute.xlu1 %1414 }
 0x314   : > { %v2667_v4 = vld [vmem:[#allocation3 + $0x8] sm:$0xff] }
 0x315   : > { %2702 = vmatpush1.msra.mxu0 %v2667_v4  ;;  %v1379_v33 = vpop.permute.xlu0 %1378  ;;  %v1676_v5 = vpop.permute.xlu1 %1675  ;;  %v1436_v4 = vsel %vm956_vm10, %v1435_v59, %v1415_v2  ;;  %v13444_v2 = vld [vmem:[#allocation39_spill] sm:$0xff] }
 0x316   : > { %v1691_v35 = vsel %vm960_vm12, %v1690_v49, %v1676_v5  ;;  %v1679_v5 = vsel %vm950_vm7, %v1678_v31, %v13441_v48  ;;  %v1426_v49 = vsel %vm950_vm7, %v1425_v56, %v13442_v55  ;;  %v1437_v17 = vsel %vm958_vm11, %v1436_v4, %v13444_v2  ;;  %v13455_v31 = vld [vmem:[#allocation24_spill] sm:$0xff]  ;;  %v13456_v56 = vld [vmem:[#allocation15_spill] sm:$0xff]  ;;  %v13459_v48 = vld [vmem:[#allocation25_spill] sm:$0xff] }
 0x317   : > { %v1695_v23 = vrot.slane %v1691_v35, 4  ;;  %v1680_v35 = vsel %vm952_vm8, %v1679_v5, %v9878_v53  ;;  %v1427_v57 = vsel %vm952_vm8, %v1426_v49, %v1379_v33 }
 0x318   : > { %v1428_v54 = vsel %vm954_vm9, %v1427_v57, %v13446_v19 }
 0x319   : > { %v1640_v30 = vpop.permute.xlu0 %1639  ;;  %1699 = vst [vmem:[#allocation3 + $0x10] sm:$0xf0] %v1695_v23  ;;  %v1914_v37 = vpop.permute.xlu1 %1913  ;;  %v13443_v23 = vld [vmem:[#allocation27_spill] sm:$0xff] }
 0x31a   : > { %v1929_v15 = vsel %vm960_vm12, %v1928_v51, %v1914_v37  ;;  %v963_v11 = vsel %vm950_vm7, %v962_v62, %v13443_v23  ;;  %v13461_v23 = vmov 0.0  }
 0x31b   : > { %1931 = vst [vmem:[#allocation3 + $0x28] sm:$0xf] %v1929_v15  ;;  %v964_v34 = vsel %vm952_vm8, %v963_v11, %v9924_v27  ;;  %v13445_v15 = vld [vmem:[#allocation26_spill] sm:$0xff]  ;;  %v2751_v11 = vld [vmem:[%s13175_s4] sm:$0xf] }
 0x31c   : > { %v1681_v53 = vsel %vm954_vm9, %v1680_v35, %v13445_v15  ;;  %2754 = vperm.xlu0 %8263, %v2751_v11   ;;  %v2750_v15 = vld [vmem:[%s13174_s3] sm:$0xf] }
 0x31d   : > { %v1878_v18 = vpop.permute.xlu0 %1877  ;;  %v1886_v9 = vpop.permute.xlu1 %1885  ;;  %v1682_v1 = vsel %vm956_vm10, %v1681_v53, %v1640_v30 }
 0x31e   : > { %v1920_v61 = vsel %vm956_vm10, %v1919_v6, %v1878_v18  ;;  %v13448_v6 = vld [vmem:[#allocation17_spill] sm:$0xff]  ;;  %v1683_v30 = vsel %vm958_vm11, %v1682_v1, %v13452_v44 }
 0x31f   : > { %v1921_v45 = vsel %vm958_vm11, %v1920_v61, %v9766_v16  ;;  %v1198_v16 = vsel %vm956_vm10, %v1197_v12, %v1177_v7  ;;  %v1187_v18 = vsel %vm948_vm6, %v13448_v6, %v13447_v50  ;;  %v949_v12 = vsel %vm948_vm6, %v13453_v14, %v9929_v46  ;;  %v2841_v1 = vld [vmem:[%s13176_s5] sm:$0xf] }
 0x320   : > { %v1922_v40 = vsel %vm960_vm12, %v1921_v45, %v1886_v9  ;;  %v1199_v7 = vsel %vm958_vm11, %v1198_v16, %v13438_v22  ;;  %v13449_v9 = vld [vmem:[#allocation18_spill] sm:$0xff]  ;;  %v951_v10 = vsel %vm950_vm7, %v949_v12, %v13455_v31 }
 0x321   : > { %1930 = vst [vmem:[#allocation3 + $0x48] sm:$0xf] %v1922_v40  ;;  %v2139_v42 = vpop.permute.xlu0 %2138  ;;  %v938_v20 = vpop.permute.xlu1 %937  ;;  %v965_v27 = vsel %vm954_vm9, %v964_v34, %v13449_v9 }
 0x322   : > { %v2175_v60 = vsel %vm960_vm12, %v2174_v26, %v2139_v42  ;;  %v2666_v43 = vld [vmem:[#allocation3 + $0x28] sm:$0xff]  ;;  %v966_v0 = vsel %vm956_vm10, %v965_v27, %v938_v20 }
 0x323   : > { %v2185_v28 = vrot.slane %v2175_v60, 4  ;;  %2703 = vmatprep.subr.mxu0 %v2666_v43  ;;  %v13451_v26 = vld [vmem:[#allocation22_spill] sm:$0xff]  ;;  %v13454_v60 = vld [vmem:[#allocation44_spill] sm:$0xff] }
 0x324   : > { %v1188_v42 = vsel %vm950_vm7, %v1187_v18, %v13451_v26  ;;  %v967_v52 = vsel %vm958_vm11, %v966_v0, %v13454_v60 }
 0x325   : > { %2189 = vst [vmem:[#allocation3 + $0x48] sm:$0xf0] %v2185_v28  ;;  %v902_v8 = vpop.permute.xlu0 %901  ;;  %v1185_v47 = vpop.permute.xlu1 %1184  ;;  %v1189_v20 = vsel %vm952_vm8, %v1188_v42, %v9936_v38 }
 0x326   : > { %v1200_v63 = vsel %vm960_vm12, %v1199_v7, %v1185_v47  ;;  %v1190_v46 = vsel %vm954_vm9, %v1189_v20, %v13456_v56  ;;  %v953_v39 = vsel %vm952_vm8, %v951_v10, %v902_v8  ;;  %v13457_v47 = vld [vmem:[#allocation34_spill] sm:$0xff]  ;;  %v13465_v20 = vld [vmem:[#allocation9_spill] sm:$0xff] }
 0x327   : > { %v1204_v13 = vrot.slane %v1200_v63, 4  ;;  %v955_v22 = vsel %vm954_vm9, %v953_v39, %v13457_v47  ;;  %v13458_v7 = vld [vmem:[#allocation38_spill] sm:$0xff] }
 0x328   : > { %v13466_v39 = vld [vmem:[#allocation10_spill] sm:$0xff] }
 0x329   : > { %v1149_v29 = vpop.permute.xlu0 %1148  ;;  %1208 = vst [vmem:[#allocation3] sm:$0xf0] %v1204_v13  ;;  %v1423_v36 = vpop.permute.xlu1 %1422 }
 0x32a   : > { %v1438_v51 = vsel %vm960_vm12, %v1437_v17, %v1423_v36  ;;  %v1191_v59 = vsel %vm956_vm10, %v1190_v46, %v1149_v29  ;;  %v454_v29 = vld [vmem:[%s13460_s1] sm:$0xf]  ;;  %s8276_s1 = sshll.u32 %s8350_s0, 4  ;;  %s8277_s1 = int_to_ptr.vmem [resolvable:$false] %s8276_s1 }
 0x32b   : > { %1440 = vst [vmem:[#allocation3 + $0x10] sm:$0xf] %v1438_v51  ;;  %v1192_v25 = vsel %vm958_vm11, %v1191_v59, %v13458_v7 }
 0x32c   : > { %v2665_v37 = vld [vmem:[#allocation3 + $0x48] sm:$0xff] }
 0x32d   : > { %2704 = vmatpush1.msra.mxu0 %v2665_v37  ;;  %v1387_v33 = vpop.permute.xlu0 %1386  ;;  %v1395_v61 = vpop.permute.xlu1 %1394 }
 0x32e   : > { %v1429_v24 = vsel %vm956_vm10, %v1428_v54, %v1387_v33 }
 0x32f   : > { %v1430_v45 = vsel %vm958_vm11, %v1429_v24, %v13450_v32 }
 0x330   : > { %v1431_v40 = vsel %vm960_vm12, %v1430_v45, %v1395_v61 }
 0x331   : > { %1439 = vst [vmem:[#allocation3 + $0x18] sm:$0xf] %v1431_v40  ;;  %v1648_v21 = vpop.permute.xlu0 %1647  ;;  %v946_v16 = vpop.permute.xlu1 %945 }
 0x332   : > { %v1684_v28 = vsel %vm960_vm12, %v1683_v30, %v1648_v21  ;;  %v968_v43 = vsel %vm960_vm12, %v967_v52, %v946_v16  ;;  %v2664_v3 = vld [vmem:[#allocation3 + $0x10] sm:$0xff] }
 0x333   : > { %v1694_v58 = vrot.slane %v1684_v28, 4  ;;  %970 = vst [vmem:[#allocation3] sm:$0xf] %v968_v43  ;;  %2705 = vmatprep.subr.mxu0 %v2664_v3 }
 0x335   : > { %1698 = vst [vmem:[#allocation3 + $0x18] sm:$0xf0] %v1694_v58  ;;  %v910_v38 = vpop.permute.xlu0 %909 }
 0x336   : > { %v957_v62 = vsel %vm956_vm10, %v955_v22, %v910_v38 }
 0x337   : > { %v959_v8 = vsel %vm958_vm11, %v957_v62, %v13459_v48 }
 0x339   : > { %v1157_v41 = vpop.permute.xlu0 %1156 }
 0x33a   : > { %v1193_v4 = vsel %vm960_vm12, %v1192_v25, %v1157_v41  ;;  %v2662_v55 = vld [vmem:[#allocation3] sm:$0xff] }
 0x33b   : > { %v1203_v63 = vrot.slane %v1193_v4, 4 }
 0x33c   : > { %v2663_v13 = vld [vmem:[#allocation3 + $0x18] sm:$0xff] }
 0x33d   : > { %1207 = vst [vmem:[#allocation3 + $0x30] sm:$0xf0] %v1203_v63  ;;  %2706 = vmatpush1.msra.mxu0 %v2663_v13  ;;  %v918_v5 = vpop.permute.xlu0 %917 }
 0x33e   : > { %v961_v49 = vsel %vm960_vm12, %v959_v8, %v918_v5  ;;  %2707 = vmatprep.subr.mxu0 %v2662_v55  ;;  %v2672_v2 = vpop.permute.xlu1 %2671 }
 0x33f   : > { %969 = vst [vmem:[#allocation3 + $0x30] sm:$0xf] %v961_v49 }
 0x342   : > { %v2846_v9 = vpop.permute.xlu1 %2845 }
 0x346   : > { %v2661_v35 = vld [vmem:[#allocation3 + $0x30] sm:$0xff] }
 0x347   : > { %2708 = vmatpush1.msra.mxu0 %v2661_v35 }
 0x348   : > { %8174 = vmatmul.mubr.msk.f32.vlgmr.msra.gmra.mxu0 %vm950_vm7, %v454_v29 }
 0x349   : > { %5444 = vmatprep.mubr.f32.mxu0 %v13461_v23 }
 0x397   : > { %v2755_v53 = vpop.permute.xlu0 %2754 }
 0x408   : > { %v2743_v57 = vpop.f32.mrf.mxu0 }
 0x409   : > { %v2744_v17 = vadd.f32 %v2743_v57, %v2672_v2 }
 0x40a   : > { %v2745_v36 = vpop.f32.mrf.mxu0 }
 0x40b   : > { %v2746_v34 = vadd.f32 %v2745_v36, %v2672_v2  ;;  %v2748_v37 = vmax.f32 %v2744_v17, 0.0 }
 0x40d   : > { %v2749_v51 = vmax.f32 %v2746_v34, 0.0 }
 0x40f   : > { %8175 = vmatprep.subr.msk.mxu1 %vm2761_vm13, %v2749_v51 }
 0x410   : > { %8176 = vmatpush1.msk.msra.mxu1 %vm2761_vm13, %v2748_v37 }
 0x411   : > { %8177 = vmatmul.mubr.msk.f32.vlgmr.msra.gmra.mxu1 %vm2757_vm14, %v2750_v15 }
 0x412   : > { %2921 = vmatprep.mubr.f32.mxu1 %v13461_v23 }
 0x4d1   : > { %v2834_v19 = vpop.f32.mrf.mxu1 }
 0x4d2   : > { %v2835_v54 = vadd.f32 %v2834_v19, %v2755_v53 }
 0x4d3   : > { %v2836_v33 = vpop.f32.mrf.mxu1 }
 0x4d4   : > { %v2837_v50 = vadd.f32 %v2836_v33, %v2755_v53  ;;  %v2839_v18 = vmax.f32 %v2835_v54, 0.0 }
 0x4d6   : > { %v2840_v6 = vmax.f32 %v2837_v50, 0.0 }
 0x4d8   : > { %8178 = vmatprep.subr.msk.mxu1 %vm2761_vm13, %v2840_v6 }
 0x4d9   : > { %8179 = vmatpush1.msk.msra.mxu1 %vm2761_vm13, %v2839_v18 }
 0x4da   : > { %8180 = vmatmul.mubr.msk.f32.vlgmr.msra.gmra.mxu1 %vm2757_vm14, %v2841_v1 }
 0x4db   : > { %5361 = vmatprep.mubr.f32.mxu1 %v13461_v23 }
 0x59a   : > { %v2923_v27 = vpop.f32.mrf.mxu1 }
 0x59b   : > { %v2924_v61 = vadd.f32 %v2923_v27, %v2846_v9 }
 0x59c   : > { %v2925_v0 = vpop.f32.mrf.mxu1 }
 0x59d   : > { %v10092_v24 = vmax.f32 %v2924_v61, 0.0  ;;  %v2926_v32 = vadd.f32 %v2925_v0, %v2846_v9 }
 0x59f   : > { %13462 = vst [vmem:[#allocation32_spill] sm:$0xff] %v10092_v24  ;;  %2936 = vrot.lane.b32.xlu0 %v10092_v24, %s8337_s17  ;;  %2933 = vrot.lane.b32.xlu1 %v10092_v24, %s8335_s15  ;;  %v10106_v45 = vmax.f32 %v2926_v32, 0.0 }
 0x5a1   : > { %13463 = vst [vmem:[#allocation45_spill] sm:$0xff] %v10106_v45 }
 0x5a3   : > { %2942 = vrot.lane.b32.xlu0 %v10092_v24, %s8336_s16  ;;  %2939 = vrot.lane.b32.xlu1 %v10092_v24, %s13272_s30 }
 0x5a7   : > { %2948 = vrot.lane.b32.xlu0 %v10092_v24, %s13270_s27  ;;  %2945 = vrot.lane.b32.xlu1 %v10092_v24, %s13268_s20 }
 0x5ab   : > { %2955 = vrot.lane.b32.xlu0 %v10106_v45, %s8335_s15  ;;  %2951 = vrot.lane.b32.xlu1 %v10092_v24, %s13464_s21 }
 0x5af   : > { %2961 = vrot.lane.b32.xlu0 %v10106_v45, %s13272_s30  ;;  %2958 = vrot.lane.b32.xlu1 %v10106_v45, %s8337_s17 }
 0x5b3   : > { %2967 = vrot.lane.b32.xlu0 %v10106_v45, %s13268_s20  ;;  %2964 = vrot.lane.b32.xlu1 %v10106_v45, %s8336_s16 }
 0x5b7   : > { %2973 = vrot.lane.b32.xlu0 %v10106_v45, %s13464_s21  ;;  %2970 = vrot.lane.b32.xlu1 %v10106_v45, %s13270_s27 }
 0x611   : > { %v2937_v40 = vpop.permute.xlu0 %2936  ;;  %v2934_v26 = vpop.permute.xlu1 %2933 }
 0x612   : > { %v2976_v12 = vcombine.low %v10092_v24, %v2937_v40 }
 0x614   : > { %v2983_v43 = vrot.slane %v2976_v12, %v13465_v20 }
 0x615   : > { %v2943_v42 = vpop.permute.xlu0 %2942  ;;  %v2940_v44 = vpop.permute.xlu1 %2939 }
 0x616   : > { %v2984_v30 = vcombine.low %v2934_v26, %v2940_v44 }
 0x618   : > { %v2991_v60 = vrot.slane %v2984_v30, %v13465_v20 }
 0x619   : > { %v2949_v21 = vpop.permute.xlu0 %2948  ;;  %v2946_v14 = vpop.permute.xlu1 %2945 }
 0x61a   : > { %v2992_v52 = vcombine.low %v2943_v42, %v2949_v21  ;;  %v3008_v3 = vcombine.low %v2983_v43, %v2991_v60  ;;  %v3009_v63 = vcombine.high %v2983_v43, %v2991_v60 }
 0x61c   : > { %v2999_v31 = vrot.slane %v2992_v52, %v13465_v20  ;;  %v3016_v59 = vrot.slane %v3008_v3, %v13466_v39  ;;  %v3023_v11 = vrot.slane %v3009_v63, %v13466_v39 }
 0x61d   : > { %v2956_v16 = vpop.permute.xlu0 %2955  ;;  %v2952_v28 = vpop.permute.xlu1 %2951 }
 0x61e   : > { %v3000_v58 = vcombine.low %v2946_v14, %v2952_v28 }
 0x620   : > { %v3007_v10 = vrot.slane %v3000_v58, %v13465_v20 }
 0x621   : > { %v2962_v56 = vpop.permute.xlu0 %2961  ;;  %v2959_v46 = vpop.permute.xlu1 %2958 }
 0x622   : > { %v3024_v38 = vcombine.low %v2999_v31, %v3007_v10  ;;  %v3052_v22 = vcombine.low %v2956_v16, %v2962_v56  ;;  %v3044_v7 = vcombine.low %v10106_v45, %v2959_v46  ;;  %v3025_v62 = vcombine.high %v2999_v31, %v3007_v10 }
 0x624   : > { %v3032_v47 = vrot.slane %v3024_v38, %v13466_v39  ;;  %v3059_v13 = vrot.slane %v3052_v22, %v13465_v20  ;;  %v3051_v48 = vrot.slane %v3044_v7, %v13465_v20  ;;  %v3039_v55 = vrot.slane %v3025_v62, %v13466_v39 }
 0x625   : > { %v2968_v25 = vpop.permute.xlu0 %2967  ;;  %v2965_v41 = vpop.permute.xlu1 %2964 }
 0x626   : > { %v3040_v4 = vcombine.low %v3016_v59, %v3032_v47  ;;  %v3041_v35 = vcombine.high %v3016_v59, %v3032_v47  ;;  %v3076_v57 = vcombine.low %v3051_v48, %v3059_v13  ;;  %v3042_v34 = vcombine.low %v3023_v11, %v3039_v55 }
 0x627   : > { %v3043_v53 = vcombine.high %v3023_v11, %v3039_v55  ;;  %v3077_v54 = vcombine.high %v3051_v48, %v3059_v13 }
 0x628   : > { %3120 = vrot.lane.b32.xlu1 %v3040_v4, %s13467_s22  ;;  %v3084_v51 = vrot.slane %v3076_v57, %v13466_v39 }
 0x629   : > { %v2974_v8 = vpop.permute.xlu0 %2973  ;;  %v2971_v5 = vpop.permute.xlu1 %2970  ;;  %v3091_v6 = vrot.slane %v3077_v54, %v13466_v39 }
 0x62a   : > { %v3068_v49 = vcombine.low %v2968_v25, %v2974_v8  ;;  %v3060_v29 = vcombine.low %v2965_v41, %v2971_v5 }
 0x62c   : > { %v3075_v2 = vrot.slane %v3068_v49, %v13465_v20  ;;  %v3067_v17 = vrot.slane %v3060_v29, %v13465_v20  ;;  %3124 = vrot.lane.b32.xlu1 %v3041_v35, %s13467_s22 }
 0x62e   : > { %v3092_v36 = vcombine.low %v3067_v17, %v3075_v2  ;;  %v3093_v15 = vcombine.high %v3067_v17, %v3075_v2 }
 0x630   : > { %v3100_v37 = vrot.slane %v3092_v36, %v13466_v39  ;;  %3128 = vrot.lane.b32.xlu1 %v3042_v34, %s13467_s22  ;;  %v3107_v33 = vrot.slane %v3093_v15, %v13466_v39 }
 0x632   : > { %v3108_v19 = vcombine.low %v3084_v51, %v3100_v37  ;;  %v3109_v50 = vcombine.high %v3084_v51, %v3100_v37  ;;  %v3110_v18 = vcombine.low %v3091_v6, %v3107_v33  ;;  %v3111_v1 = vcombine.high %v3091_v6, %v3107_v33 }
 0x634   : > { %3132 = vrot.lane.b32.xlu1 %v3043_v53, %s13467_s22  ;;  %3122 = vrot.lane.b32.xlu0 %v3108_v19, %s13467_s22 }
 0x638   : > { %3126 = vrot.lane.b32.xlu0 %v3109_v50, %s13467_s22 }
 0x63c   : > { %3130 = vrot.lane.b32.xlu0 %v3110_v18, %s13467_s22 }
 0x640   : > { %3134 = vrot.lane.b32.xlu0 %v3111_v1, %s13467_s22 }
 0x69a   : > { %v3121_v9 = vpop.permute.xlu1 %3120 }
 0x69b   : > { %3144 = vst.msk [vmem:[#allocation2 + $0x2] sm:$0xff] %vm678_vm2, %v3121_v9 }
 0x69e   : > { %v3125_v27 = vpop.permute.xlu1 %3124 }
 0x69f   : > { %3146 = vst.msk [vmem:[#allocation2 + $0x1a] sm:$0xff] %vm678_vm2, %v3125_v27 }
 0x6a2   : > { %v3129_v61 = vpop.permute.xlu1 %3128  ;;  %v10152_v0 = vld [vmem:[#allocation2] sm:$0xff] }
 0x6a3   : > { %3148 = vst.msk [vmem:[#allocation2 + $0x32] sm:$0xff] %vm678_vm2, %v3129_v61  ;;  %3380 = vrot.lane.b32.xlu1 %v10152_v0, %s13468_s23  ;;  %v4566_v59 = vrot.slane %v10152_v0, 4 }
 0x6a6   : > { %v3123_v32 = vpop.permute.xlu0 %3122  ;;  %v3133_v40 = vpop.permute.xlu1 %3132  ;;  %v10157_v26 = vld [vmem:[#allocation2 + $0x18] sm:$0xff] }
 0x6a7   : > { %3145 = vst.msk [vmem:[#allocation2 + $0xa] sm:$0xff] %vm678_vm2, %v3123_v32  ;;  %3150 = vst.msk [vmem:[#allocation2 + $0x4a] sm:$0xff] %vm678_vm2, %v3133_v40  ;;  %3384 = vrot.lane.b32.xlu0 %v10157_v26, %s13468_s23  ;;  %v4571_v11 = vrot.slane %v10157_v26, 4 }
 0x6aa   : > { %v3127_v42 = vpop.permute.xlu0 %3126  ;;  %v10163_v44 = vld [vmem:[#allocation2 + $0x30] sm:$0xff] }
 0x6ab   : > { %3147 = vst.msk [vmem:[#allocation2 + $0x22] sm:$0xff] %vm678_vm2, %v3127_v42  ;;  %3388 = vrot.lane.b32.xlu1 %v10163_v44, %s13468_s23  ;;  %v3165_v14 = vcombine.high %v10152_v0, %v10163_v44  ;;  %v4576_v7 = vrot.slane %v10163_v44, 4 }
 0x6ad   : > { %v10184_v28 = vrot.slane %v3165_v14, %v13465_v20 }
 0x6ae   : > { %v3131_v30 = vpop.permute.xlu0 %3130  ;;  %v10168_v21 = vld [vmem:[#allocation2 + $0x48] sm:$0xff]  ;;  %v10181_v52 = vld [vmem:[#allocation2 + $0x10] sm:$0xf] }
 0x6af   : > { %3149 = vst.msk [vmem:[#allocation2 + $0x3a] sm:$0xff] %vm678_vm2, %v3131_v30  ;;  %3618 = vrot.lane.b32.xlu1 %v10152_v0, %s13266_s24  ;;  %3392 = vrot.lane.b32.xlu0 %v10168_v21, %s13468_s23  ;;  %v3181_v12 = vcombine.high %v10157_v26, %v10168_v21  ;;  %v10179_v60 = vld [vmem:[#allocation2 + $0x8] sm:$0xff]  ;;  %13469 = vst [vmem:[#allocation33_spill] sm:$0xff] %v10184_v28  ;;  %v4569_v3 = vrot.slane %v10181_v52, 4  ;;  %v4581_v57 = vrot.slane %v10168_v21, 4  ;;  %v3857_v42 = vrot.slane %v10181_v52, 2 }
 0x6b0   : > { %v4567_v58 = vrot.slane %v10179_v60, 4  ;;  %v3855_v40 = vrot.slane %v10179_v60, 2 }
 0x6b1   : > { %v10187_v43 = vrot.slane %v3181_v12, %v13465_v20 }
 0x6b2   : > { %v3135_v16 = vpop.permute.xlu0 %3134  ;;  %v10198_v10 = vld [vmem:[#allocation2 + $0x20] sm:$0xff]  ;;  %v10204_v38 = vld [vmem:[#allocation2 + $0x28] sm:$0xf]  ;;  %v4570_v25 = vsel %vm2761_vm13, %v4567_v58, %v4569_v3  ;;  %v10216_v41 = vsel %vm2761_vm13, %v4566_v59, %v4567_v58  ;;  %v10313_v30 = vsel %vm1441_vm4, %v3855_v40, %v3857_v42 }
 0x6b3   : > { %13470 = vst [vmem:[#allocation37_spill] sm:$0xff] %v10187_v43  ;;  %3151 = vst.msk [vmem:[#allocation2 + $0x52] sm:$0xff] %vm678_vm2, %v3135_v16  ;;  %3626 = vrot.lane.b32.xlu1 %v10163_v44, %s13266_s24  ;;  %3622 = vrot.lane.b32.xlu0 %v10157_v26, %s13266_s24  ;;  %v4572_v4 = vrot.slane %v10198_v10, 4  ;;  %v4574_v63 = vrot.slane %v10204_v38, 4  ;;  %v3860_v16 = vrot.slane %v10198_v10, 2  ;;  %v3862_v58 = vrot.slane %v10204_v38, 2 }
 0x6b4   : > { %v3854_v38 = vrot.slane %v10152_v0, 2 }
 0x6b5   : > { %v4575_v2 = vsel %vm2761_vm13, %v4572_v4, %v4574_v63  ;;  %v10241_v36 = vsel %vm2761_vm13, %v4571_v11, %v4572_v4  ;;  %v10327_v3 = vsel %vm1441_vm4, %v3860_v16, %v3862_v58  ;;  %v3869_v63 = vrot.slane %v10168_v21, 2 }
 0x6b6   : > { %v10200_v56 = vld [vmem:[#allocation2 + $0x38] sm:$0xff]  ;;  %v10202_v46 = vld [vmem:[#allocation2 + $0x40] sm:$0xf] }
 0x6b7   : > { %3382 = vrot.lane.b32.xlu1 %v10179_v60, %s13468_s23  ;;  %3630 = vrot.lane.b32.xlu0 %v10168_v21, %s13266_s24  ;;  %v4577_v47 = vrot.slane %v10200_v56, 4  ;;  %v4579_v22 = vrot.slane %v10202_v46, 4  ;;  %v3865_v14 = vrot.slane %v10200_v56, 2  ;;  %v3867_v12 = vrot.slane %v10202_v46, 2 }
 0x6b9   : > { %v4580_v62 = vsel %vm2761_vm13, %v4577_v47, %v4579_v22  ;;  %v10222_v13 = vsel %vm2761_vm13, %v4576_v7, %v4577_v47  ;;  %v10324_v52 = vsel %vm1441_vm4, %v3865_v14, %v3867_v12  ;;  %v10337_v47 = vsel %vm1441_vm4, %v3854_v38, %v3855_v40 }
 0x6ba   : > { %v10224_v48 = vld [vmem:[#allocation2 + $0x50] sm:$0xff]  ;;  %v4662_v8 = vcombine.low %v4570_v25, %v4580_v62  ;;  %v4663_v5 = vcombine.high %v4570_v25, %v4580_v62  ;;  %v10226_v55 = vld [vmem:[#allocation2 + $0x58] sm:$0xf]  ;;  %v4595_v49 = vcombine.high %v10216_v41, %v10222_v13  ;;  %v3864_v7 = vrot.slane %v10163_v44, 2 }
 0x6bb   : > { %3390 = vrot.lane.b32.xlu1 %v10200_v56, %s13468_s23  ;;  %3386 = vrot.lane.b32.xlu0 %v10198_v10, %s13468_s23  ;;  %v4582_v29 = vrot.slane %v10224_v48, 4  ;;  %v4584_v35 = vrot.slane %v10226_v55, 4  ;;  %v3870_v59 = vrot.slane %v10224_v48, 2  ;;  %v3872_v46 = vrot.slane %v10226_v55, 2 }
 0x6bc   : > { %v10263_v54 = vrot.slane %v4662_v8, %v13465_v20  ;;  %v10266_v33 = vrot.slane %v4595_v49, %v13465_v20  ;;  %v10279_v1 = vrot.slane %v4663_v5, %v13465_v20  ;;  %v3248_v5 = vcombine.low %v10198_v10, %v10224_v48 }
 0x6bd   : > { %v4585_v17 = vsel %vm2761_vm13, %v4582_v29, %v4584_v35  ;;  %v10244_v34 = vsel %vm2761_vm13, %v4581_v57, %v4582_v29  ;;  %v10340_v22 = vsel %vm1441_vm4, %v3870_v59, %v3872_v46  ;;  %v10360_v8 = vsel %vm1441_vm4, %v3869_v63, %v3870_v59 }
 0x6be   : > { %v4678_v51 = vcombine.low %v4575_v2, %v4585_v17  ;;  %v4679_v37 = vcombine.high %v4575_v2, %v4585_v17  ;;  %v4611_v15 = vcombine.high %v10241_v36, %v10244_v34  ;;  %v3232_v55 = vcombine.low %v10179_v60, %v10200_v56 }
 0x6bf   : > { %3620 = vrot.lane.b32.xlu1 %v10179_v60, %s13266_s24  ;;  %3394 = vrot.lane.b32.xlu0 %v10224_v48, %s13468_s23  ;;  %v3256_v49 = vrot.slane %v3248_v5, %v13465_v20  ;;  %v3249_v29 = vcombine.high %v10198_v10, %v10224_v48  ;;  %v3180_v35 = vcombine.low %v10157_v26, %v10168_v21 }
 0x6c0   : > { %v10253_v53 = vrot.slane %v4678_v51, %v13465_v20  ;;  %v10256_v19 = vrot.slane %v4611_v15, %v13465_v20  ;;  %v10269_v50 = vrot.slane %v4679_v37, %v13465_v20  ;;  %v3240_v11 = vrot.slane %v3232_v55, %v13465_v20 }
 0x6c1   : > { %v3233_v57 = vcombine.high %v10179_v60, %v10200_v56  ;;  %v4610_v59 = vcombine.low %v10241_v36, %v10244_v34 }
 0x6c2   : > { %v4695_v6 = vcombine.high %v10263_v54, %v10253_v53  ;;  %v4642_v18 = vcombine.low %v10266_v33, %v10256_v19  ;;  %v4710_v9 = vcombine.low %v10279_v1, %v10269_v50  ;;  %v4711_v27 = vcombine.high %v10279_v1, %v10269_v50 }
 0x6c3   : > { %3628 = vrot.lane.b32.xlu1 %v10200_v56, %s13266_s24  ;;  %3624 = vrot.lane.b32.xlu0 %v10198_v10, %s13266_s24  ;;  %v4643_v61 = vcombine.high %v10266_v33, %v10256_v19  ;;  %v4694_v32 = vcombine.low %v10263_v54, %v10253_v53  ;;  %v3263_v10 = vrot.slane %v3249_v29, %v13465_v20 }
 0x6c4   : > { %v3264_v42 = vcombine.low %v3240_v11, %v3256_v49  ;;  %v4618_v63 = vrot.slane %v4610_v59, %v13465_v20  ;;  %v10498_v59 = vrot.slane %v4710_v9, %v13466_v39 }
 0x6c7   : > { %4804 = vrot.lane.b32.xlu1 %v4570_v25, %s13468_s23  ;;  %3632 = vrot.lane.b32.xlu0 %v10224_v48, %s13266_s24  ;;  %v3188_v48 = vrot.slane %v3180_v35, %v13465_v20 }
 0x6cb   : > { %4812 = vrot.lane.b32.xlu1 %v4580_v62, %s13468_s23  ;;  %4808 = vrot.lane.b32.xlu0 %v4575_v2, %s13468_s23 }
 0x6cf   : > { %5042 = vrot.lane.b32.xlu1 %v4570_v25, %s13266_s24  ;;  %4816 = vrot.lane.b32.xlu0 %v4585_v17, %s13468_s23  ;;  %v3859_v25 = vrot.slane %v10157_v26, 2  ;;  %v3247_v26 = vrot.slane %v3233_v57, %v13465_v20 }
 0x6d1   : > { %v10352_v4 = vsel %vm1441_vm4, %v3859_v25, %v3860_v16  ;;  %v3280_v56 = vcombine.low %v3247_v26, %v3263_v10  ;;  %v3281_v40 = vcombine.high %v3247_v26, %v3263_v10  ;;  %v10411_v16 = vrot.slane %v3264_v42, %v13466_v39 }
 0x6d2   : > { %v3966_v25 = vcombine.low %v10327_v3, %v10340_v22 }
 0x6d3   : > { %5050 = vrot.lane.b32.xlu1 %v4580_v62, %s13266_s24  ;;  %5046 = vrot.lane.b32.xlu0 %v4575_v2, %s13266_s24  ;;  %v10349_v62 = vsel %vm1441_vm4, %v3864_v7, %v3865_v14  ;;  %v3164_v2 = vcombine.low %v10152_v0, %v10163_v44  ;;  %v3212_v0 = vcombine.low %v10184_v28, %v10187_v43 }
 0x6d4   : > { %v3288_v37 = vrot.slane %v3280_v56, %v13466_v39  ;;  %v10407_v14 = vrot.slane %v3281_v40, %v13466_v39  ;;  %13472 = vst [vmem:[#allocation42_spill] sm:$0xff] %v10411_v16  ;;  %v3296_v46 = vcombine.high %v10411_v16, %v13461_v23  ;;  %v4594_v7 = vcombine.low %v10216_v41, %v10222_v13 }
 0x6d5   : > { %v3172_v21 = vrot.slane %v3164_v2, %v13465_v20  ;;  %v3220_v12 = vrot.slane %v3212_v0, %v13466_v39  ;;  %v10464_v56 = vrot.slane %v4695_v6, %v13466_v39 }
 0x6d6   : > { %13471 = vst [vmem:[#allocation49_spill] sm:$0xff] %v10407_v14  ;;  %v4602_v55 = vrot.slane %v4594_v7, %v13465_v20 }
 0x6d7   : > { %4802 = vrot.lane.b32.xlu1 %v10216_v41, %s13468_s23  ;;  %5054 = vrot.lane.b32.xlu0 %v4585_v17, %s13266_s24  ;;  %v3265_v17 = vcombine.high %v3240_v11, %v3256_v49  ;;  %v3197_v51 = vcombine.high %v3172_v21, %v3188_v48  ;;  %v3196_v44 = vcombine.low %v3172_v21, %v3188_v48 }
 0x6d8   : > { %v3974_v49 = vrot.slane %v3966_v25, %v13465_v20  ;;  %v3298_v11 = vcombine.high %v3288_v37, %v13461_v23  ;;  %v3230_v57 = vcombine.high %v3220_v12, %v13461_v23  ;;  %v4627_v2 = vcombine.high %v4602_v55, %v4618_v63 }
 0x6d9   : > { %v3279_v60 = vrot.slane %v3265_v17, %v13466_v39  ;;  %v3211_v15 = vrot.slane %v3197_v51, %v13466_v39  ;;  %v10414_v58 = vrot.slane %v3196_v44, %v13466_v39  ;;  %v3967_v48 = vcombine.high %v10327_v3, %v10340_v22 }
 0x6da   : > { %v3951_v44 = vcombine.high %v10313_v30, %v10324_v52  ;;  %v4626_v7 = vcombine.low %v4602_v55, %v4618_v63 }
 0x6db   : > { %4810 = vrot.lane.b32.xlu1 %v10222_v13, %s13468_s23  ;;  %4806 = vrot.lane.b32.xlu0 %v10241_v36, %s13468_s23  ;;  %13473 = vst [vmem:[#allocation46_spill] sm:$0xff] %v10414_v58  ;;  %v3228_v38 = vcombine.high %v10414_v58, %v13461_v23  ;;  %v3229_v5 = vcombine.high %v3211_v15, %v13461_v23 }
 0x6dc   : > { %v3965_v40 = vrot.slane %v3951_v44, %v13465_v20  ;;  %v10515_v63 = vrot.slane %v4626_v7, %v13466_v39 }
 0x6df   : > { %5040 = vrot.lane.b32.xlu1 %v10216_v41, %s13266_s24  ;;  %4814 = vrot.lane.b32.xlu0 %v10244_v34, %s13468_s23  ;;  %v3950_v41 = vcombine.low %v10313_v30, %v10324_v52 }
 0x6e1   : > { %v3958_v17 = vrot.slane %v3950_v41, %v13465_v20  ;;  %v4658_v41 = vcombine.high %v10515_v63, %v13461_v23 }
 0x6e3   : > { %5048 = vrot.lane.b32.xlu1 %v10222_v13, %s13266_s24  ;;  %5044 = vrot.lane.b32.xlu0 %v10241_v36, %s13266_s24  ;;  %v3898_v36 = vcombine.low %v10352_v4, %v10360_v8  ;;  %v3882_v13 = vcombine.low %v10337_v47, %v10349_v62  ;;  %v3983_v0 = vcombine.high %v3958_v17, %v3974_v49 }
 0x6e5   : > { %v3906_v29 = vrot.slane %v3898_v36, %v13465_v20  ;;  %v3890_v10 = vrot.slane %v3882_v13, %v13465_v20  ;;  %v10478_v6 = vrot.slane %v3983_v0, %v13466_v39  ;;  %v4725_v13 = vrot.slane %v4711_v27, %v13466_v39 }
 0x6e7   : > { %4330 = vrot.lane.b32.xlu1 %v10313_v30, %s13266_s24  ;;  %5052 = vrot.lane.b32.xlu0 %v10244_v34, %s13266_s24  ;;  %v3297_v34 = vcombine.high %v3279_v60, %v13461_v23  ;;  %v3915_v51 = vcombine.high %v3890_v10, %v3906_v29 }
 0x6eb   : > { %4338 = vrot.lane.b32.xlu1 %v10324_v52, %s13266_s24  ;;  %4334 = vrot.lane.b32.xlu0 %v10327_v3, %s13266_s24 }
 0x6ef   : > { %4328 = vrot.lane.b32.xlu1 %v10337_v47, %s13266_s24  ;;  %4342 = vrot.lane.b32.xlu0 %v10340_v22, %s13266_s24 }
 0x6f3   : > { %4336 = vrot.lane.b32.xlu1 %v10349_v62, %s13266_s24  ;;  %4332 = vrot.lane.b32.xlu0 %v10352_v4, %s13266_s24 }
 0x6f7   : > { %4098 = vrot.lane.b32.xlu1 %v10313_v30, %s13468_s23  ;;  %4340 = vrot.lane.b32.xlu0 %v10360_v8, %s13266_s24  ;;  %v3899_v30 = vcombine.high %v10352_v4, %v10360_v8  ;;  %s13537_s24 = smov 48  }
 0x6fb   : > { %4106 = vrot.lane.b32.xlu1 %v10324_v52, %s13468_s23  ;;  %4102 = vrot.lane.b32.xlu0 %v10327_v3, %s13468_s23  ;;  %v3981_v3 = vrot.slane %v3967_v48, %v13465_v20  ;;  %v4650_v52 = vrot.slane %v4642_v18, %v13466_v39  ;;  %v3913_v18 = vrot.slane %v3899_v30, %v13465_v20 }
 0x6fc   : > { %v10570_v30 = vrot.slane %v4694_v32, %v13466_v39 }
 0x6fd   : > { %v4660_v32 = vcombine.high %v4650_v52, %v13461_v23 }
 0x6ff   : > { %4096 = vrot.lane.b32.xlu1 %v10337_v47, %s13468_s23  ;;  %4110 = vrot.lane.b32.xlu0 %v10340_v22, %s13468_s23 }
 0x703   : > { %4104 = vrot.lane.b32.xlu1 %v10349_v62, %s13468_s23  ;;  %4100 = vrot.lane.b32.xlu0 %v10352_v4, %s13468_s23  ;;  %v3883_v4 = vcombine.high %v10337_v47, %v10349_v62  ;;  %v3982_v47 = vcombine.low %v3958_v17, %v3974_v49 }
 0x705   : > { %v3897_v62 = vrot.slane %v3883_v4, %v13465_v20  ;;  %v10532_v49 = vrot.slane %v3982_v47, %v13466_v39 }
 0x707   : > { %3333 = vrot.lane.b32.xlu1 %v3279_v60, %s13270_s27  ;;  %4108 = vrot.lane.b32.xlu0 %v10360_v8, %s13468_s23  ;;  %v4641_v60 = vrot.slane %v4627_v2, %v13466_v39  ;;  %v4014_v17 = vcombine.high %v10532_v49, %v13461_v23 }
 0x70b   : > { %3341 = vrot.lane.b32.xlu1 %v3288_v37, %s8336_s16  ;;  %3305 = vrot.lane.b32.xlu0 %v3211_v15, %s13270_s27  ;;  %v3929_v15 = vrot.slane %v3915_v51, %v13466_v39  ;;  %v3931_v51 = vcombine.high %v3897_v62, %v3913_v18 }
 0x70f   : > { %3349 = vrot.lane.b32.xlu1 %v10407_v14, %s8337_s17  ;;  %3313 = vrot.lane.b32.xlu0 %v3220_v12, %s8336_s16 }
 0x713   : > { %3329 = vrot.lane.b32.xlu1 %v3296_v46, %s13464_s21  ;;  %3301 = vrot.lane.b32.xlu0 %v3228_v38, %s13464_s21  ;;  %v3999_v46 = vcombine.high %v3965_v40, %v3981_v3  ;;  %v3998_v38 = vcombine.low %v3965_v40, %v3981_v3  ;;  %v4659_v3 = vcombine.high %v4641_v60, %v13461_v23 }
 0x714   : > { %v3945_v40 = vrot.slane %v3931_v51, %v13466_v39 }
 0x715   : > { %v10445_v35 = vpop.permute.xlu1 %3380  ;;  %v10511_v9 = vrot.slane %v3999_v46, %v13466_v39  ;;  %v4006_v36 = vrot.slane %v3998_v38, %v13466_v39  ;;  %v4727_v46 = vcombine.high %v10464_v56, %v13461_v23 }
 0x717   : > { %3337 = vrot.lane.b32.xlu1 %v3297_v34, %s13268_s20  ;;  %3309 = vrot.lane.b32.xlu0 %v3229_v5, %s13268_s20  ;;  %v3930_v34 = vcombine.low %v3897_v62, %v3913_v18  ;;  %v4016_v4 = vcombine.high %v4006_v36, %v13461_v23  ;;  %v4015_v18 = vcombine.high %v10478_v6, %v13461_v23 }
 0x719   : > { %v10455_v26 = vpop.permute.xlu0 %3384  ;;  %v3938_v48 = vrot.slane %v3930_v34, %v13466_v39 }
 0x71b   : > { %3345 = vrot.lane.b32.xlu1 %v3298_v11, %s13272_s30  ;;  %3317 = vrot.lane.b32.xlu0 %v3230_v57, %s13272_s30  ;;  %v3914_v11 = vcombine.low %v3890_v10, %v3906_v29  ;;  %v4657_v10 = vrot.slane %v4643_v61, %v13466_v39  ;;  %v3947_v61 = vcombine.high %v3929_v15, %v13461_v23 }
 0x71d   : > { %v10457_v21 = vpop.permute.xlu1 %3388  ;;  %v10544_v50 = vrot.slane %v3914_v11, %v13466_v39 }
 0x71f   : > { %4735 = vrot.lane.b32.xlu1 %v4641_v60, %s13270_s27  ;;  %4763 = vrot.lane.b32.xlu0 %v10464_v56, %s13270_s27  ;;  %v3946_v29 = vcombine.high %v10544_v50, %v13461_v23  ;;  %v4726_v60 = vcombine.high %v10570_v30, %v13461_v23 }
 0x721   : > { %v10472_v22 = vpop.permute.xlu0 %3392  ;;  %v10474_v37 = vpop.permute.xlu1 %3618 }
 0x723   : > { %4023 = vrot.lane.b32.xlu1 %v3929_v15, %s13270_s27  ;;  %4051 = vrot.lane.b32.xlu0 %v10478_v6, %s13270_s27  ;;  %v3420_v15 = vcombine.low %v10455_v26, %v10472_v22  ;;  %v4728_v6 = vcombine.high %v10498_v59, %v13461_v23 }
 0x725   : > { %v10490_v42 = vpop.permute.xlu0 %3622  ;;  %v10492_v12 = vpop.permute.xlu1 %3626  ;;  %v3428_v56 = vrot.slane %v3420_v15, %v13465_v20 }
 0x726   : > { %v3642_v11 = vcombine.low %v10474_v37, %v10492_v12 }
 0x727   : > { %4743 = vrot.lane.b32.xlu1 %v4650_v52, %s8336_s16  ;;  %4771 = vrot.lane.b32.xlu0 %v10498_v59, %s8336_s16  ;;  %v3404_v52 = vcombine.low %v10445_v35, %v10457_v21  ;;  %v3948_v59 = vcombine.high %v3938_v48, %v13461_v23 }
 0x729   : > { %v10506_v8 = vpop.permute.xlu0 %3630  ;;  %v10508_v25 = vpop.permute.xlu1 %3382 }
 0x72a   : > { %v3658_v47 = vcombine.low %v10490_v42, %v10506_v8 }
 0x72b   : > { %4067 = vrot.lane.b32.xlu1 %v10511_v9, %s8337_s17  ;;  %4059 = vrot.lane.b32.xlu0 %v4006_v36, %s8336_s16  ;;  %v4729_v36 = vcombine.high %v4725_v13, %v13461_v23 }
 0x72d   : > { %v10521_v5 = vpop.permute.xlu0 %3386  ;;  %v10523_v55 = vpop.permute.xlu1 %3390 }
 0x72e   : > { %v3472_v45 = vcombine.low %v10508_v25, %v10523_v55 }
 0x72f   : > { %4731 = vrot.lane.b32.xlu1 %v4658_v41, %s13464_s21  ;;  %4779 = vrot.lane.b32.xlu0 %v4725_v13, %s8337_s17  ;;  %v3412_v41 = vrot.slane %v3404_v52, %v13465_v20  ;;  %v4661_v13 = vcombine.high %v4657_v10, %v13461_v23  ;;  %v3949_v52 = vcombine.high %v3945_v40, %v13461_v23 }
 0x731   : > { %v10536_v57 = vpop.permute.xlu0 %3394  ;;  %v10538_v2 = vpop.permute.xlu1 %3620 }
 0x733   : > { %4047 = vrot.lane.b32.xlu1 %v4014_v17, %s13464_s21  ;;  %4031 = vrot.lane.b32.xlu0 %v3938_v48, %s8336_s16  ;;  %v3436_v17 = vcombine.low %v3412_v41, %v3428_v56 }
 0x735   : > { %v10548_v1 = vpop.permute.xlu0 %3624  ;;  %v10550_v27 = vpop.permute.xlu1 %3628 }
 0x737   : > { %4019 = vrot.lane.b32.xlu1 %v3946_v29, %s13464_s21  ;;  %4751 = vrot.lane.b32.xlu0 %v4657_v10, %s8337_s17  ;;  %v3666_v29 = vrot.slane %v3658_v47, %v13465_v20  ;;  %v3659_v47 = vcombine.high %v10490_v42, %v10506_v8  ;;  %v3643_v8 = vcombine.high %v10474_v37, %v10492_v12 }
 0x739   : > { %v10560_v0 = vpop.permute.xlu0 %3632  ;;  %v10562_v44 = vpop.permute.xlu1 %4804 }
 0x73b   : > { %4739 = vrot.lane.b32.xlu1 %v4659_v3, %s13268_s20  ;;  %4039 = vrot.lane.b32.xlu0 %v3945_v40, %s8337_s17 }
 0x73d   : > { %v10574_v19 = vpop.permute.xlu0 %4808  ;;  %v10576_v33 = vpop.permute.xlu1 %4812 }
 0x73f   : > { %4027 = vrot.lane.b32.xlu1 %v3947_v61, %s13268_s20  ;;  %4759 = vrot.lane.b32.xlu0 %v4726_v60, %s13464_s21  ;;  %v3650_v61 = vrot.slane %v3642_v11, %v13465_v20  ;;  %v3421_v60 = vcombine.high %v10455_v26, %v10472_v22  ;;  %v3405_v26 = vcombine.high %v10445_v35, %v10457_v21 }
 0x740   : > { %v3473_v22 = vcombine.high %v10508_v25, %v10523_v55  ;;  %v3727_v21 = vcombine.high %v10548_v1, %v10560_v0  ;;  %v3480_v55 = vrot.slane %v3472_v45, %v13465_v20 }
 0x741   : > { %v10583_v53 = vpop.permute.xlu0 %4816  ;;  %v10585_v54 = vpop.permute.xlu1 %5042  ;;  %v3674_v15 = vcombine.low %v3650_v61, %v3666_v29  ;;  %v3675_v40 = vcombine.high %v3650_v61, %v3666_v29  ;;  %v3419_v42 = vrot.slane %v3405_v26, %v13465_v20  ;;  %v3711_v29 = vcombine.high %v10538_v2, %v10550_v27 }
 0x743   : > { %4747 = vrot.lane.b32.xlu1 %v4660_v32, %s13272_s30  ;;  %4767 = vrot.lane.b32.xlu0 %v4727_v46, %s13268_s20  ;;  %v3437_v32 = vcombine.high %v3412_v41, %v3428_v56  ;;  %v10633_v46 = vrot.slane %v3436_v17, %v13466_v39  ;;  %v3435_v56 = vrot.slane %v3421_v60, %v13465_v20 }
 0x744   : > { %v10666_v11 = vrot.slane %v3674_v15, %v13466_v39  ;;  %v3487_v17 = vrot.slane %v3473_v22, %v13465_v20  ;;  %v3741_v60 = vrot.slane %v3727_v21, %v13465_v20  ;;  %v10684_v37 = vrot.slane %v3675_v40, %v13466_v39 }
 0x745   : > { %v10594_v38 = vpop.permute.xlu0 %5046  ;;  %v10596_v7 = vpop.permute.xlu1 %5050  ;;  %13474 = vst [vmem:[#allocation47_spill] sm:$0xff] %v10633_v46  ;;  %v3453_v21 = vcombine.high %v3419_v42, %v3435_v56 }
 0x746   : > { %13475 = vst [vmem:[#allocation48_spill] sm:$0xff] %v10666_v11  ;;  %v3706_v12 = vcombine.high %v10666_v11, %v13461_v23 }
 0x747   : > { %4063 = vrot.lane.b32.xlu1 %v4016_v4, %s13272_s30  ;;  %4055 = vrot.lane.b32.xlu0 %v4015_v18, %s13268_s20  ;;  %v3489_v4 = vcombine.high %v10521_v5, %v10536_v57  ;;  %v4017_v18 = vcombine.high %v10511_v9, %v13461_v23  ;;  %v3468_v9 = vcombine.high %v10633_v46, %v13461_v23 }
 0x749   : > { %v10608_v62 = vpop.permute.xlu0 %5054  ;;  %v10610_v34 = vpop.permute.xlu1 %4802  ;;  %v3503_v35 = vrot.slane %v3489_v4, %v13465_v20  ;;  %v3657_v4 = vrot.slane %v3643_v8, %v13465_v20  ;;  %v3488_v8 = vcombine.low %v10521_v5, %v10536_v57  ;;  %v10726_v57 = vrot.slane %v3453_v21, %v13466_v39 }
 0x74b   : > { %4783 = vrot.lane.b32.xlu1 %v4729_v36, %s8335_s15  ;;  %4775 = vrot.lane.b32.xlu0 %v4728_v6, %s13272_s30  ;;  %v10654_v36 = vrot.slane %v3437_v32, %v13466_v39  ;;  %v3520_v61 = vcombine.low %v3487_v17, %v3503_v35 }
 0x74d   : > { %v10621_v51 = vpop.permute.xlu0 %4806  ;;  %v10623_v3 = vpop.permute.xlu1 %4810  ;;  %v10701_v40 = vrot.slane %v3520_v61, %v13466_v39 }
 0x74f   : > { %4755 = vrot.lane.b32.xlu1 %v4661_v13, %s8335_s15  ;;  %4035 = vrot.lane.b32.xlu0 %v3948_v59, %s13272_s30  ;;  %v3452_v13 = vcombine.low %v3419_v42, %v3435_v56  ;;  %v3673_v59 = vrot.slane %v3659_v47, %v13465_v20  ;;  %v3496_v56 = vrot.slane %v3488_v8, %v13465_v20 }
 0x751   : > { %v10637_v10 = vpop.permute.xlu0 %4814  ;;  %v10639_v48 = vpop.permute.xlu1 %5040  ;;  %v3691_v5 = vcombine.high %v3657_v4, %v3673_v59 }
 0x753   : > { %4071 = vrot.lane.b32.xlu1 %v4017_v18, %s8335_s15  ;;  %4043 = vrot.lane.b32.xlu0 %v3949_v52, %s8335_s15  ;;  %v3725_v18 = vrot.slane %v3711_v29, %v13465_v20  ;;  %v3690_v52 = vcombine.low %v3657_v4, %v3673_v59  ;;  %v3521_v29 = vcombine.high %v3487_v17, %v3503_v35 }
 0x754   : > { %v3726_v35 = vcombine.low %v10548_v1, %v10560_v0  ;;  %v3710_v59 = vcombine.low %v10538_v2, %v10550_v27  ;;  %v3705_v1 = vrot.slane %v3691_v5, %v13466_v39  ;;  %v3504_v0 = vcombine.low %v3480_v55, %v3496_v56 }
 0x755   : > { %v10661_v6 = vpop.permute.xlu0 %5044  ;;  %v10663_v41 = vpop.permute.xlu1 %5048  ;;  %v3758_v26 = vcombine.low %v3725_v18, %v3741_v60  ;;  %v3759_v42 = vcombine.high %v3725_v18, %v3741_v60  ;;  %v10736_v25 = vrot.slane %v3521_v29, %v13466_v39  ;;  %v3505_v60 = vcombine.high %v3480_v55, %v3496_v56 }
 0x756   : > { %v3734_v4 = vrot.slane %v3726_v35, %v13465_v20  ;;  %v3718_v2 = vrot.slane %v3710_v59, %v13465_v20  ;;  %v3709_v5 = vcombine.high %v3705_v1, %v13461_v23  ;;  %v10765_v56 = vrot.slane %v3504_v0, %v13466_v39 }
 0x757   : > { %3545 = vrot.lane.b32.xlu0 %v10654_v36, %s13270_s27  ;;  %3541 = vrot.lane.b32.xlu1 %v3468_v9, %s13464_s21  ;;  %v10698_v9 = vrot.slane %v3452_v13, %v13466_v39  ;;  %v10714_v13 = vrot.slane %v3690_v52, %v13466_v39  ;;  %v10717_v61 = vrot.slane %v3758_v26, %v13466_v39 }
 0x758   : > { %v10752_v45 = vrot.slane %v3759_v42, %v13466_v39  ;;  %v3743_v27 = vcombine.high %v3718_v2, %v3734_v4  ;;  %v3519_v29 = vrot.slane %v3505_v60, %v13466_v39  ;;  %13476 = vst [vmem:[#allocation11_spill] sm:$0xff] %v10765_v56  ;;  %v3536_v55 = vcombine.high %v10765_v56, %v13461_v23 }
 0x759   : > { %v10679_v32 = vpop.permute.xlu0 %5052  ;;  %v10681_v15 = vpop.permute.xlu1 %4330 }
 0x75a   : > { %v3757_v59 = vrot.slane %v3743_v27, %v13466_v39  ;;  %v3537_v60 = vcombine.high %v3519_v29, %v13461_v23 }
 0x75b   : > { %3783 = vrot.lane.b32.xlu0 %v10684_v37, %s13270_s27  ;;  %3779 = vrot.lane.b32.xlu1 %v3706_v12, %s13464_s21 }
 0x75c   : > { %v3775_v58 = vcombine.high %v3757_v59, %v13461_v23 }
 0x75d   : > { %v10693_v22 = vpop.permute.xlu0 %4334  ;;  %v10695_v47 = vpop.permute.xlu1 %4338 }
 0x75f   : > { %3553 = vrot.lane.b32.xlu0 %v10698_v9, %s8336_s16  ;;  %3581 = vrot.lane.b32.xlu1 %v10701_v40, %s8336_s16 }
 0x761   : > { %v10709_v12 = vpop.permute.xlu0 %4342  ;;  %v10711_v31 = vpop.permute.xlu1 %4328 }
 0x762   : > { %v4437_v46 = vcombine.high %v10693_v22, %v10709_v12 }
 0x763   : > { %3791 = vrot.lane.b32.xlu0 %v10714_v13, %s8336_s16  ;;  %3819 = vrot.lane.b32.xlu1 %v10717_v61, %s8336_s16 }
 0x765   : > { %v10731_v17 = vpop.permute.xlu0 %4332  ;;  %v10733_v52 = vpop.permute.xlu1 %4336 }
 0x766   : > { %v4352_v14 = vcombine.low %v10711_v31, %v10733_v52 }
 0x767   : > { %3561 = vrot.lane.b32.xlu0 %v10726_v57, %s8337_s17  ;;  %3589 = vrot.lane.b32.xlu1 %v10736_v25, %s8337_s17 }
 0x769   : > { %v10747_v18 = vpop.permute.xlu0 %4340  ;;  %v10749_v26 = vpop.permute.xlu1 %4098 }
 0x76b   : > { %3799 = vrot.lane.b32.xlu0 %v3705_v1, %s8337_s17  ;;  %3827 = vrot.lane.b32.xlu1 %v10752_v45, %s8337_s17 }
 0x76d   : > { %v10758_v21 = vpop.permute.xlu0 %4102  ;;  %v10760_v8 = vpop.permute.xlu1 %4106 }
 0x76e   : > { %v4188_v56 = vcombine.low %v10749_v26, %v10760_v8 }
 0x76f   : > { %3573 = vrot.lane.b32.xlu0 %v3519_v29, %s13270_s27  ;;  %3803 = vrot.lane.b32.xlu1 %v3709_v5, %s8335_s15  ;;  %v3469_v5 = vcombine.high %v10654_v36, %v13461_v23 }
 0x771   : > { %v10769_v35 = vpop.permute.xlu0 %4110  ;;  %v10771_v42 = vpop.permute.xlu1 %4096 }
 0x773   : > { %3569 = vrot.lane.b32.xlu1 %v3536_v55, %s13464_s21  ;;  %3811 = vrot.lane.b32.xlu0 %v3757_v59, %s13270_s27  ;;  %v3707_v55 = vcombine.high %v10684_v37, %v13461_v23  ;;  %v3742_v37 = vcombine.low %v3718_v2, %v3734_v4  ;;  %v4910_v59 = vcombine.low %v10574_v19, %v10583_v53 }
 0x774   : > { %v4826_v4 = vcombine.low %v10610_v34, %v10623_v3 }
 0x775   : > { %v10778_v1 = vpop.permute.xlu0 %4100  ;;  %v10780_v0 = vpop.permute.xlu1 %4104  ;;  %v10825_v2 = vrot.slane %v4910_v59, %v13465_v20  ;;  %v3471_v59 = vcombine.high %v10726_v57, %v13461_v23 }
 0x776   : > { %v4120_v11 = vcombine.low %v10771_v42, %v10780_v0 }
 0x777   : > { %3577 = vrot.lane.b32.xlu1 %v3537_v60, %s13268_s20  ;;  %3549 = vrot.lane.b32.xlu0 %v3469_v5, %s13268_s20  ;;  %v3470_v60 = vcombine.high %v10698_v9, %v13461_v23  ;;  %v3538_v5 = vcombine.high %v10701_v40, %v13461_v23  ;;  %v3708_v9 = vcombine.high %v10714_v13, %v13461_v23 }
 0x778   : > { %v3776_v40 = vcombine.high %v10717_v61, %v13461_v23  ;;  %v10830_v13 = vrot.slane %v3742_v37, %v13466_v39  ;;  %v5132_v37 = vcombine.low %v10585_v54, %v10596_v7 }
 0x779   : > { %v10787_v24 = vpop.permute.xlu0 %4108  ;;  %v10789_v27 = vpop.permute.xlu1 %3333 }
 0x77a   : > { %13477 = vst [vmem:[#allocation12_spill] sm:$0xff] %v10789_v27  ;;  %13482 = vst [vmem:[#allocation21_spill] sm:$0xff] %v10830_v13 }
 0x77b   : > { %3787 = vrot.lane.b32.xlu0 %v3707_v55, %s13268_s20  ;;  %3815 = vrot.lane.b32.xlu1 %v3775_v58, %s13268_s20  ;;  %v4842_v58 = vcombine.low %v10621_v51, %v10637_v10 }
 0x77d   : > { %v10796_v29 = vpop.permute.xlu0 %3305  ;;  %v10798_v36 = vpop.permute.xlu1 %3341  ;;  %v10833_v61 = vrot.slane %v4842_v58, %v13465_v20  ;;  %v10851_v58 = vrot.slane %v4826_v4, %v13465_v20  ;;  %v3777_v4 = vcombine.high %v10752_v45, %v13461_v23 }
 0x77e   : > { %13478 = vst [vmem:[#allocation16_spill] sm:$0xff] %v10796_v29  ;;  %13479 = vst [vmem:[#allocation23_spill] sm:$0xff] %v10798_v36 }
 0x77f   : > { %3557 = vrot.lane.b32.xlu0 %v3470_v60, %s13272_s30  ;;  %3585 = vrot.lane.b32.xlu1 %v3538_v5, %s13272_s30  ;;  %v4894_v60 = vcombine.low %v10562_v44, %v10576_v33  ;;  %v5148_v5 = vcombine.low %v10594_v38, %v10608_v62  ;;  %v4859_v27 = vcombine.high %v10851_v58, %v10833_v61 }
 0x781   : > { %v10810_v55 = vpop.permute.xlu0 %3313  ;;  %v10812_v29 = vpop.permute.xlu1 %3349  ;;  %v10846_v36 = vrot.slane %v4894_v60, %v13465_v20  ;;  %v3774_v60 = vcombine.high %v10830_v13, %v13461_v23  ;;  %v10880_v13 = vrot.slane %v5132_v37, %v13465_v20 }
 0x782   : > { %13480 = vst [vmem:[#allocation41_spill] sm:$0xff] %v10810_v55  ;;  %13481 = vst [vmem:[#allocation13_spill] sm:$0xff] %v10812_v29  ;;  %v5080_v55 = vcombine.low %v10661_v6, %v10679_v32 }
 0x783   : > { %3795 = vrot.lane.b32.xlu0 %v3708_v9, %s13272_s30  ;;  %3823 = vrot.lane.b32.xlu1 %v3776_v40, %s13272_s30  ;;  %v3539_v40 = vcombine.high %v10736_v25, %v13461_v23  ;;  %v4927_v57 = vcombine.high %v10846_v36, %v10825_v2  ;;  %v10860_v25 = vrot.slane %v5148_v5, %v13465_v20 }
 0x784   : > { %v10869_v16 = vrot.slane %v5080_v55, %v13465_v20  ;;  %v4420_v55 = vcombine.low %v10681_v15, %v10695_v47 }
 0x785   : > { %v10837_v29 = vpop.permute.xlu0 %3301  ;;  %v10839_v9 = vpop.permute.xlu1 %3329  ;;  %v5165_v37 = vcombine.high %v10880_v13, %v10860_v25 }
 0x786   : > { %13483 = vst [vmem:[#allocation14_spill] sm:$0xff] %v10837_v29  ;;  %13484 = vst [vmem:[#allocation31_spill] sm:$0xff] %v10839_v9  ;;  %v5064_v29 = vcombine.low %v10639_v48, %v10663_v41 }
 0x787   : > { %3565 = vrot.lane.b32.xlu0 %v3471_v59, %s8335_s15  ;;  %3593 = vrot.lane.b32.xlu1 %v3539_v40, %s8335_s15  ;;  %v4436_v59 = vcombine.low %v10693_v22, %v10709_v12  ;;  %v4368_v40 = vcombine.low %v10731_v17, %v10747_v18  ;;  %v11034_v22 = vrot.slane %v4188_v56, %v13465_v20 }
 0x788   : > { %v10883_v45 = vrot.slane %v5064_v29, %v13465_v20  ;;  %v4843_v29 = vcombine.high %v10621_v51, %v10637_v10  ;;  %v4895_v51 = vcombine.high %v10562_v44, %v10576_v33  ;;  %v4827_v10 = vcombine.high %v10610_v34, %v10623_v3 }
 0x789   : > { %v10875_v5 = vpop.permute.xlu0 %3309  ;;  %v10877_v9 = vpop.permute.xlu1 %3337  ;;  %v10903_v28 = vrot.slane %v4436_v59, %v13465_v20  ;;  %v10923_v59 = vrot.slane %v4352_v14, %v13465_v20  ;;  %v5149_v44 = vcombine.high %v10594_v38, %v10608_v62  ;;  %v5081_v34 = vcombine.high %v10661_v6, %v10679_v32 }
 0x78a   : > { %13485 = vst [vmem:[#allocation29_spill] sm:$0xff] %v10875_v5  ;;  %13486 = vst [vmem:[#allocation36_spill] sm:$0xff] %v10877_v9  ;;  %v4911_v5 = vcombine.high %v10574_v19, %v10583_v53  ;;  %v10898_v9 = vrot.slane %v4927_v57, %v13466_v39  ;;  %v5097_v43 = vcombine.high %v10883_v45, %v10869_v16 }
 0x78b   : > { %3807 = vrot.lane.b32.xlu0 %v3774_v60, %s13464_s21  ;;  %3831 = vrot.lane.b32.xlu1 %v3777_v4, %s8335_s15  ;;  %v10906_v60 = vrot.slane %v4368_v40, %v13465_v20  ;;  %v10913_v53 = vrot.slane %v4859_v27, %v13466_v39  ;;  %v10920_v57 = vrot.slane %v4420_v55, %v13465_v20 }
 0x78c   : > { %v10930_v27 = vrot.slane %v4911_v5, %v13465_v20  ;;  %v10935_v33 = vrot.slane %v4843_v29, %v13465_v20  ;;  %v10948_v5 = vrot.slane %v5165_v37, %v13466_v39  ;;  %v10951_v38 = vrot.slane %v5097_v43, %v13466_v39 }
 0x78d   : > { %v10908_v4 = vpop.permute.xlu0 %3317  ;;  %v10910_v19 = vpop.permute.xlu1 %3345  ;;  %13489 = vst [vmem:[#allocation27_spill] sm:$0xff] %v10913_v53  ;;  %v4453_v14 = vcombine.high %v10920_v57, %v10903_v28  ;;  %v4385_v3 = vcombine.high %v10923_v59, %v10906_v60  ;;  %v10954_v62 = vrot.slane %v4895_v51, %v13465_v20  ;;  %v5133_v6 = vcombine.high %v10585_v54, %v10596_v7 }
 0x78e   : > { %13487 = vst [vmem:[#allocation35_spill] sm:$0xff] %v10908_v4  ;;  %13488 = vst [vmem:[#allocation19_spill] sm:$0xff] %v10910_v19  ;;  %v10959_v32 = vrot.slane %v4827_v10, %v13465_v20  ;;  %v5065_v29 = vcombine.high %v10639_v48, %v10663_v41  ;;  %v10970_v37 = vrot.slane %v5149_v44, %v13465_v20 }
 0x78f   : > { %4995 = vrot.lane.b32.xlu0 %v10898_v9, %s13270_s27  ;;  %4967 = vrot.lane.b32.xlu1 %v10913_v53, %s13270_s27  ;;  %13490 = vst [vmem:[#allocation39_spill] sm:$0xff] %v10948_v5  ;;  %13491 = vst [vmem:[#allocation26_spill] sm:$0xff] %v10951_v38  ;;  %v4942_v43 = vcombine.low %v10954_v62, %v10930_v27  ;;  %v10975_v7 = vrot.slane %v5081_v34, %v13465_v20 }
 0x790   : > { %v4874_v54 = vcombine.low %v10959_v32, %v10935_v33  ;;  %v4204_v48 = vcombine.low %v10758_v21, %v10769_v35  ;;  %v4136_v41 = vcombine.low %v10778_v1, %v10787_v24  ;;  %v10986_v4 = vrot.slane %v4453_v14, %v13466_v39 }
 0x791   : > { %v10943_v40 = vpop.permute.xlu0 %4763  ;;  %v10945_v55 = vpop.permute.xlu1 %4735  ;;  %v10989_v44 = vrot.slane %v4385_v3, %v13466_v39  ;;  %v10992_v19 = vrot.slane %v5133_v6, %v13465_v20  ;;  %v10995_v34 = vrot.slane %v5065_v29, %v13465_v20  ;;  %v11010_v6 = vrot.slane %v4942_v43, %v13466_v39 }
 0x792   : > { %13492 = vst [vmem:[#allocation28_spill] sm:$0xff] %v10986_v4  ;;  %v11013_v29 = vrot.slane %v4874_v54, %v13466_v39  ;;  %v4421_v43 = vcombine.high %v10681_v15, %v10695_v47  ;;  %v4353_v54 = vcombine.high %v10711_v31, %v10733_v52  ;;  %v11037_v12 = vrot.slane %v4120_v11, %v13465_v20 }
 0x793   : > { %5233 = vrot.lane.b32.xlu0 %v10948_v5, %s13270_s27  ;;  %5205 = vrot.lane.b32.xlu1 %v10951_v38, %s13270_s27  ;;  %13493 = vst [vmem:[#allocation43_spill] sm:$0xff] %v10989_v44  ;;  %v5180_v14 = vcombine.low %v10992_v19, %v10970_v37  ;;  %v5112_v3 = vcombine.low %v10995_v34, %v10975_v7  ;;  %13494 = vst [vmem:[#allocation17_spill] sm:$0xff] %v11010_v6 }
 0x794   : > { %13495 = vst [vmem:[#allocation18_spill] sm:$0xff] %v11013_v29  ;;  %v11023_v38 = vrot.slane %v4136_v41, %v13465_v20  ;;  %v11050_v31 = vrot.slane %v4437_v46, %v13465_v20  ;;  %v11065_v41 = vrot.slane %v4353_v54, %v13465_v20  ;;  %v4943_v54 = vcombine.high %v10954_v62, %v10930_v27 }
 0x795   : > { %v10981_v51 = vpop.permute.xlu0 %4051  ;;  %v10983_v10 = vpop.permute.xlu1 %4023  ;;  %v11047_v15 = vrot.slane %v5112_v3, %v13466_v39 }
 0x796   : > { %v4153_v52 = vcombine.high %v11037_v12, %v11023_v38 }
 0x797   : > { %4521 = vrot.lane.b32.xlu0 %v10986_v4, %s13270_s27  ;;  %4493 = vrot.lane.b32.xlu1 %v10989_v44, %s13270_s27  ;;  %v4369_v4 = vcombine.high %v10731_v17, %v10747_v18  ;;  %v11020_v44 = vrot.slane %v4204_v48, %v13465_v20  ;;  %v11044_v17 = vrot.slane %v5180_v14, %v13466_v39 }
 0x798   : > { %13497 = vst [vmem:[#allocation22_spill] sm:$0xff] %v11047_v15  ;;  %v4435_v48 = vrot.slane %v4421_v43, %v13465_v20  ;;  %v11080_v43 = vrot.slane %v4153_v52, %v13466_v39 }
 0x799   : > { %v11025_v5 = vpop.permute.xlu0 %4771  ;;  %v11027_v53 = vpop.permute.xlu1 %4743  ;;  %13496 = vst [vmem:[#allocation40_spill] sm:$0xff] %v11044_v17  ;;  %v11053_v47 = vrot.slane %v4369_v4, %v13465_v20  ;;  %v4221_v11 = vcombine.high %v11034_v22, %v11020_v44 }
 0x79a   : > { %v4468_v46 = vcombine.low %v4435_v48, %v11050_v31  ;;  %13499 = vst [vmem:[#allocation20_spill] sm:$0xff] %v11080_v43 }
 0x79b   : > { %5003 = vrot.lane.b32.xlu0 %v11010_v6, %s8336_s16  ;;  %4975 = vrot.lane.b32.xlu1 %v11013_v29, %s8336_s16  ;;  %v4400_v4 = vcombine.low %v11065_v41, %v11053_v47  ;;  %v11077_v29 = vrot.slane %v4221_v11, %v13466_v39 }
 0x79c   : > { %v11095_v52 = vrot.slane %v4468_v46, %v13466_v39 }
 0x79d   : > { %v11059_v18 = vpop.permute.xlu0 %4059  ;;  %v11061_v56 = vpop.permute.xlu1 %4067  ;;  %13498 = vst [vmem:[#allocation30_spill] sm:$0xff] %v11077_v29 }
 0x79f   : > { %5241 = vrot.lane.b32.xlu0 %v11044_v17, %s8336_s16  ;;  %5213 = vrot.lane.b32.xlu1 %v11047_v15, %s8336_s16  ;;  %v4875_v15 = vcombine.high %v10959_v32, %v10935_v33  ;;  %v4205_v17 = vcombine.high %v10758_v21, %v10769_v35  ;;  %v5181_v21 = vcombine.high %v10992_v19, %v10970_v37 }
 0x7a0   : > { %v5113_v35 = vcombine.high %v10995_v34, %v10975_v7  ;;  %v11114_v32 = vrot.slane %v4943_v54, %v13466_v39  ;;  %v4926_v19 = vcombine.low %v10846_v36, %v10825_v2  ;;  %v4858_v36 = vcombine.low %v10851_v58, %v10833_v61 }
 0x7a1   : > { %v11074_v14 = vpop.permute.xlu0 %4779  ;;  %v4732_v3 = vpop.permute.xlu1 %4731  ;;  %v4219_v27 = vrot.slane %v4205_v17, %v13465_v20  ;;  %v11127_v37 = vrot.slane %v5181_v21, %v13466_v39  ;;  %v4137_v17 = vcombine.high %v10778_v1, %v10787_v24  ;;  %v4469_v1 = vcombine.high %v4435_v48, %v11050_v31 }
 0x7a2   : > { %v11145_v24 = vrot.slane %v4926_v19, %v13466_v39 }
 0x7a3   : > { %4289 = vrot.lane.b32.xlu0 %v11077_v29, %s13270_s27  ;;  %4261 = vrot.lane.b32.xlu1 %v11080_v43, %s13270_s27  ;;  %v11098_v29 = vrot.slane %v4400_v4, %v13466_v39  ;;  %v4189_v43 = vcombine.high %v10749_v26, %v10760_v8  ;;  %v11117_v26 = vrot.slane %v4875_v15, %v13466_v39  ;;  %s13536_s27 = smov 32  }
 0x7a4   : > { %v11134_v4 = vrot.slane %v5113_v35, %v13466_v39  ;;  %v11149_v2 = vrot.slane %v4137_v17, %v13465_v20  ;;  %v5096_v35 = vcombine.low %v10883_v45, %v10869_v16  ;;  %v11171_v16 = vrot.slane %v4858_v36, %v13466_v39 }
 0x7a5   : > { %v11092_v11 = vpop.permute.xlu0 %4031  ;;  %v4048_v6 = vpop.permute.xlu1 %4047  ;;  %v4203_v8 = vrot.slane %v4189_v43, %v13465_v20  ;;  %v4121_v43 = vcombine.high %v10771_v42, %v10780_v0  ;;  %v4786_v45 = vsel %vm948_vm6, %v10515_v63, %v4732_v3  ;;  %v4401_v17 = vcombine.high %v11065_v41, %v11053_v47 }
 0x7a6   : > { %v4081_v63 = vsel %vm948_vm6, %v10532_v49, %v4048_v6 }
 0x7a7   : > { %4529 = vrot.lane.b32.xlu0 %v11095_v52, %s8336_s16  ;;  %4501 = vrot.lane.b32.xlu1 %v11098_v29, %s8336_s16  ;;  %v4236_v7 = vcombine.low %v4203_v8, %v4219_v27  ;;  %v4237_v34 = vcombine.high %v4203_v8, %v4219_v27  ;;  %v4135_v61 = vrot.slane %v4121_v43, %v13465_v20 }
 0x7a8   : > { %v11166_v27 = vrot.slane %v4469_v1, %v13466_v39  ;;  %v4958_v8 = vcombine.high %v11145_v24, %v13461_v23 }
 0x7a9   : > { %v11111_v33 = vpop.permute.xlu0 %4751  ;;  %v4020_v62 = vpop.permute.xlu1 %4019  ;;  %v11152_v42 = vrot.slane %v4236_v7, %v13466_v39  ;;  %v11155_v0 = vrot.slane %v4237_v34, %v13466_v39  ;;  %v4168_v58 = vcombine.low %v4135_v61, %v11149_v2  ;;  %v11181_v7 = vrot.slane %v5096_v35, %v13466_v39 }
 0x7aa   : > { %v4452_v34 = vcombine.low %v10920_v57, %v10903_v28  ;;  %v4890_v28 = vcombine.high %v11171_v16, %v13461_v23  ;;  %v4074_v57 = vsel %vm948_vm6, %v10544_v50, %v4020_v62  ;;  %v4384_v50 = vcombine.low %v10923_v59, %v10906_v60 }
 0x7ab   : > { %5011 = vrot.lane.b32.xlu0 %v11114_v32, %s8337_s17  ;;  %4983 = vrot.lane.b32.xlu1 %v11117_v26, %s8337_s17  ;;  %v11194_v1 = vrot.slane %v4168_v58, %v13466_v39  ;;  %v5128_v6 = vcombine.high %v11181_v7, %v13461_v23  ;;  %v11215_v62 = vrot.slane %v4401_v17, %v13466_v39 }
 0x7ad   : > { %v11131_v15 = vpop.permute.xlu0 %4039  ;;  %v4740_v46 = vpop.permute.xlu1 %4739 }
 0x7af   : > { %5249 = vrot.lane.b32.xlu0 %v11127_v37, %s8337_s17  ;;  %5221 = vrot.lane.b32.xlu1 %v11134_v4, %s8337_s17 }
 0x7b1   : > { %v4760_v54 = vpop.permute.xlu0 %4759  ;;  %v4028_v21 = vpop.permute.xlu1 %4027 }
 0x7b2   : > { %v4793_v19 = vsel %vm948_vm6, %v10570_v30, %v4760_v54  ;;  %v4787_v30 = vsel %vm950_vm7, %v4786_v45, %v10945_v55  ;;  %v5164_v55 = vcombine.low %v10880_v13, %v10860_v25  ;;  %v11218_v13 = vrot.slane %v4452_v34, %v13466_v39 }
 0x7b3   : > { %4297 = vrot.lane.b32.xlu0 %v11152_v42, %s8336_s16  ;;  %4305 = vrot.lane.b32.xlu1 %v11155_v0, %s8337_s17  ;;  %v4794_v3 = vsel %vm950_vm7, %v4793_v19, %v10943_v40  ;;  %v4788_v47 = vsel %vm952_vm8, %v4787_v30, %v4740_v46  ;;  %v4082_v40 = vsel %vm950_vm7, %v4081_v63, %v10981_v51 }
 0x7b4   : > { %v4169_v25 = vcombine.high %v4135_v61, %v11149_v2  ;;  %v4075_v51 = vsel %vm950_vm7, %v4074_v57, %v10983_v10  ;;  %v4789_v46 = vsel %vm954_vm9, %v4788_v47, %v11027_v53  ;;  %v11251_v45 = vrot.slane %v4384_v50, %v13466_v39 }
 0x7b5   : > { %v4768_v31 = vpop.permute.xlu0 %4767  ;;  %v4748_v48 = vpop.permute.xlu1 %4747  ;;  %v4076_v35 = vsel %vm952_vm8, %v4075_v51, %v4028_v21  ;;  %v11241_v21 = vrot.slane %v5164_v55, %v13466_v39 }
 0x7b6   : > { %v4795_v49 = vsel %vm952_vm8, %v4794_v3, %v4768_v31  ;;  %v4790_v58 = vsel %vm956_vm10, %v4789_v46, %v4748_v48 }
 0x7b7   : > { %4537 = vrot.lane.b32.xlu0 %v11166_v27, %s8337_s17  ;;  %4991 = vrot.lane.b32.xlu1 %v4958_v8, %s13464_s21  ;;  %v4796_v54 = vsel %vm954_vm9, %v4795_v49, %v11025_v5  ;;  %v4484_v5 = vcombine.high %v11218_v13, %v13461_v23  ;;  %v11248_v8 = vrot.slane %v4169_v25, %v13466_v39 }
 0x7b8   : > { %v5196_v3 = vcombine.high %v11241_v21, %v13461_v23 }
 0x7b9   : > { %v4056_v43 = vpop.permute.xlu0 %4055  ;;  %v4064_v36 = vpop.permute.xlu1 %4063 }
 0x7ba   : > { %v4083_v41 = vsel %vm952_vm8, %v4082_v40, %v4056_v43  ;;  %v4416_v43 = vcombine.high %v11251_v45, %v13461_v23  ;;  %v4959_v40 = vcombine.high %v10898_v9, %v13461_v23 }
 0x7bb   : > { %4269 = vrot.lane.b32.xlu0 %v11194_v1, %s8336_s16  ;;  %4963 = vrot.lane.b32.xlu1 %v4890_v28, %s13464_s21  ;;  %v4084_v2 = vsel %vm954_vm9, %v4083_v41, %v11059_v18  ;;  %v4077_v18 = vsel %vm954_vm9, %v4076_v35, %v11092_v11 }
 0x7bc   : > { %v4085_v19 = vsel %vm956_vm10, %v4084_v2, %v4064_v36 }
 0x7bd   : > { %v4776_v60 = vpop.permute.xlu0 %4775  ;;  %v4784_v59 = vpop.permute.xlu1 %4783  ;;  %v4086_v63 = vsel %vm958_vm11, %v4085_v19, %v11061_v56  ;;  %v4220_v56 = vcombine.low %v11034_v22, %v11020_v44 }
 0x7be   : > { %v4797_v31 = vsel %vm956_vm10, %v4796_v54, %v4776_v60 }
 0x7bf   : > { %v4798_v10 = vsel %vm958_vm11, %v4797_v31, %v11074_v14  ;;  %4509 = vrot.lane.b32.xlu0 %v11215_v62, %s8337_s17  ;;  %5201 = vrot.lane.b32.xlu1 %v5128_v6, %s13464_s21  ;;  %v4791_v14 = vsel %vm958_vm11, %v4790_v58, %v11111_v33  ;;  %v13500_v6 = vld [vmem:[#allocation27_spill] sm:$0xff]  ;;  %v11290_v51 = vrot.slane %v4220_v56, %v13466_v39  ;;  %v13503_v31 = vld [vmem:[#allocation28_spill] sm:$0xff] }
 0x7c0   : > { %v4799_v53 = vsel %vm960_vm12, %v4798_v10, %v4784_v59  ;;  %v4891_v50 = vcombine.high %v13500_v6, %v13461_v23  ;;  %v4485_v2 = vcombine.high %v13503_v31, %v13461_v23  ;;  %v13504_v10 = vld [vmem:[#allocation43_spill] sm:$0xff]  ;;  %v4418_v6 = vcombine.high %v11098_v29, %v13461_v23 }
 0x7c1   : > { %4801 = vst [vmem:[#allocation3 + $0x20] sm:$0xf] %v4799_v53  ;;  %v4036_v61 = vpop.permute.xlu0 %4035  ;;  %v4756_v48 = vpop.permute.xlu1 %4755  ;;  %v4252_v60 = vcombine.high %v11290_v51, %v13461_v23  ;;  %v4417_v53 = vcombine.high %v13504_v10, %v13461_v23  ;;  %v5199_v29 = vcombine.high %v11127_v37, %v13461_v23  ;;  %v13513_v10 = vld [vmem:[#allocation11_spill] sm:$0xff] }
 0x7c2   : > { %v4078_v34 = vsel %vm956_vm10, %v4077_v18, %v4036_v61  ;;  %v4792_v17 = vsel %vm960_vm12, %v4791_v14, %v4756_v48  ;;  %v13505_v18 = vld [vmem:[#allocation17_spill] sm:$0xff]  ;;  %v13506_v48 = vld [vmem:[#allocation18_spill] sm:$0xff] }
 0x7c3   : > { %4800 = vst [vmem:[#allocation3 + $0x8] sm:$0xf] %v4792_v17  ;;  %4277 = vrot.lane.b32.xlu0 %v11248_v8, %s8337_s17  ;;  %4517 = vrot.lane.b32.xlu1 %v4484_v5, %s13464_s21  ;;  %v4079_v33 = vsel %vm958_vm11, %v4078_v34, %v11131_v15  ;;  %v4152_v15 = vcombine.low %v11037_v12, %v11023_v38  ;;  %v13501_v38 = vld [vmem:[#allocation39_spill] sm:$0xff]  ;;  %v13502_v12 = vld [vmem:[#allocation26_spill] sm:$0xff] }
 0x7c4   : > { %v5197_v22 = vcombine.high %v13501_v38, %v13461_v23  ;;  %v5129_v25 = vcombine.high %v13502_v12, %v13461_v23  ;;  %v4960_v14 = vcombine.high %v13505_v18, %v13461_v23  ;;  %v4892_v19 = vcombine.high %v13506_v48, %v13461_v23 }
 0x7c5   : > { %v4044_v11 = vpop.permute.xlu0 %4043  ;;  %v4072_v30 = vpop.permute.xlu1 %4071  ;;  %v11293_v9 = vrot.slane %v4152_v15, %v13466_v39  ;;  %v4893_v12 = vcombine.high %v11117_v26, %v13461_v23 }
 0x7c6   : > { %v4080_v36 = vsel %vm960_vm12, %v4079_v33, %v4044_v11  ;;  %v4087_v28 = vsel %vm960_vm12, %v4086_v63, %v4072_v30  ;;  %v13507_v11 = vld [vmem:[#allocation40_spill] sm:$0xff]  ;;  %v13508_v63 = vld [vmem:[#allocation22_spill] sm:$0xff] }
 0x7c7   : > { %v4090_v57 = vrot.slane %v4080_v36, 4  ;;  %v4091_v47 = vrot.slane %v4087_v28, 4  ;;  %5229 = vrot.lane.b32.xlu0 %v5196_v3, %s13464_s21  ;;  %4489 = vrot.lane.b32.xlu1 %v4416_v43, %s13464_s21  ;;  %v4184_v59 = vcombine.high %v11293_v9, %v13461_v23  ;;  %v5198_v33 = vcombine.high %v13507_v11, %v13461_v23  ;;  %v13509_v36 = vld [vmem:[#allocation30_spill] sm:$0xff] }
 0x7c8   : > { %v5130_v30 = vcombine.high %v13508_v63, %v13461_v23  ;;  %v4253_v28 = vcombine.high %v13509_v36, %v13461_v23 }
 0x7c9   : > { %4094 = vst [vmem:[#allocation3 + $0x18] sm:$0xf0] %v4090_v57  ;;  %4095 = vst [vmem:[#allocation3 + $0x10] sm:$0xf0] %v4091_v47  ;;  %v11275_v49 = vpop.permute.xlu0 %3545  ;;  %v3542_v55 = vpop.permute.xlu1 %3541  ;;  %v13510_v57 = vld [vmem:[#allocation20_spill] sm:$0xff] }
 0x7ca   : > { %v4185_v47 = vcombine.high %v13510_v57, %v13461_v23 }
 0x7cb   : > { %4999 = vrot.lane.b32.xlu0 %v4959_v40, %s13268_s20  ;;  %4971 = vrot.lane.b32.xlu1 %v4891_v50, %s13268_s20  ;;  %v4486_v40 = vcombine.high %v11095_v52, %v13461_v23 }
 0x7cd   : > { %v11283_v41 = vpop.permute.xlu0 %3783  ;;  %v3780_v44 = vpop.permute.xlu1 %3779 }
 0x7cf   : > { %5237 = vrot.lane.b32.xlu0 %v5197_v22, %s13268_s20  ;;  %5209 = vrot.lane.b32.xlu1 %v5129_v25, %s13268_s20  ;;  %v4961_v22 = vcombine.high %v11114_v32, %v13461_v23 }
 0x7d1   : > { %v11297_v46 = vpop.permute.xlu0 %3553  ;;  %v11299_v54 = vpop.permute.xlu1 %3581 }
 0x7d3   : > { %4285 = vrot.lane.b32.xlu0 %v4252_v60, %s13464_s21  ;;  %4257 = vrot.lane.b32.xlu1 %v4184_v59, %s13464_s21  ;;  %v4254_v60 = vcombine.high %v11152_v42, %v13461_v23  ;;  %v13511_v59 = vld [vmem:[#allocation47_spill] sm:$0xff] }
 0x7d4   : > { %v3596_v31 = vsel %vm948_vm6, %v13511_v59, %v3542_v55 }
 0x7d5   : > { %v3792_v35 = vpop.permute.xlu0 %3791  ;;  %v11307_v58 = vpop.permute.xlu1 %3819  ;;  %v3597_v37 = vsel %vm950_vm7, %v3596_v31, %v11275_v49  ;;  %v2931_v31 = vld [vmem:[%s13179_s8] sm:$0xf] }
 0x7d7   : > { %4525 = vrot.lane.b32.xlu0 %v4485_v2, %s13268_s20  ;;  %4497 = vrot.lane.b32.xlu1 %v4417_v53, %s13268_s20  ;;  %v13512_v2 = vld [vmem:[#allocation48_spill] sm:$0xff]  ;;  %v5131_v53 = vcombine.high %v11134_v4, %v13461_v23  ;;  %v4255_v4 = vcombine.high %v11155_v0, %v13461_v23 }
 0x7d8   : > { %v3834_v32 = vsel %vm948_vm6, %v13512_v2, %v3780_v44 }
 0x7d9   : > { %v11315_v5 = vpop.permute.xlu0 %3561  ;;  %v11317_v61 = vpop.permute.xlu1 %3589  ;;  %v3835_v55 = vsel %vm950_vm7, %v3834_v32, %v11283_v41 }
 0x7db   : > { %5007 = vrot.lane.b32.xlu0 %v4960_v14, %s13272_s30  ;;  %4979 = vrot.lane.b32.xlu1 %v4892_v19, %s13272_s30  ;;  %v4487_v14 = vcombine.high %v11166_v27, %v13461_v23 }
 0x7dd   : > { %v3800_v34 = vpop.permute.xlu0 %3799  ;;  %v11325_v17 = vpop.permute.xlu1 %3827 }
 0x7df   : > { %5245 = vrot.lane.b32.xlu0 %v5198_v33, %s13272_s30  ;;  %5217 = vrot.lane.b32.xlu1 %v5130_v30, %s13272_s30  ;;  %v4186_v30 = vcombine.high %v11194_v1, %v13461_v23 }
 0x7e1   : > { %v3574_v3 = vpop.permute.xlu0 %3573  ;;  %v3804_v43 = vpop.permute.xlu1 %3803 }
 0x7e3   : > { %4293 = vrot.lane.b32.xlu0 %v4253_v28, %s13268_s20  ;;  %4265 = vrot.lane.b32.xlu1 %v4185_v47, %s13268_s20  ;;  %v4419_v47 = vcombine.high %v11215_v62, %v13461_v23  ;;  %v13515_v62 = vld [vmem:[#allocation37_spill] sm:$0xff]  ;;  %s8206_s20 = sshll.u32 %s8442_s29, 7  ;;  %s8278_s29 = scalar_lea.vmem %s8277_s1, 256 }
 0x7e5   : > { %v11339_v56 = vpop.permute.xlu0 %3811  ;;  %v3570_v15 = vpop.permute.xlu1 %3569 }
 0x7e6   : > { %v3603_v26 = vsel %vm948_vm6, %v13513_v10, %v3570_v15 }
 0x7e7   : > { %4533 = vrot.lane.b32.xlu0 %v4486_v40, %s13272_s30  ;;  %4505 = vrot.lane.b32.xlu1 %v4418_v6, %s13272_s30  ;;  %v3604_v42 = vsel %vm950_vm7, %v3603_v26, %v3574_v3 }
 0x7e9   : > { %v3550_v50 = vpop.permute.xlu0 %3549  ;;  %v3578_v38 = vpop.permute.xlu1 %3577 }
 0x7ea   : > { %v3598_v48 = vsel %vm952_vm8, %v3597_v37, %v3550_v50  ;;  %v3605_v19 = vsel %vm952_vm8, %v3604_v42, %v3578_v38  ;;  %v13514_v50 = vld [vmem:[#allocation33_spill] sm:$0xff] }
 0x7eb   : > { %5015 = vrot.lane.b32.xlu0 %v4961_v22, %s8335_s15  ;;  %4987 = vrot.lane.b32.xlu1 %v4893_v12, %s8335_s15  ;;  %v3599_v49 = vsel %vm954_vm9, %v3598_v48, %v11297_v46  ;;  %v3606_v41 = vsel %vm954_vm9, %v3605_v19, %v11299_v54  ;;  %v13516_v38 = vcombine.high %v13514_v50, %v13515_v62  ;;  %v5453_v37 = vld [vmem:[%s13181_s10] sm:$0xf] }
 0x7ed   : > { %v3788_v52 = vpop.permute.xlu0 %3787  ;;  %v3816_v25 = vpop.permute.xlu1 %3815  ;;  %v3227_v22 = vrot.slane %v13516_v38, %v13466_v39 }
 0x7ee   : > { %v3836_v11 = vsel %vm952_vm8, %v3835_v55, %v3788_v52  ;;  %v13518_v52 = vld [vmem:[#allocation21_spill] sm:$0xff] }
 0x7ef   : > { %5253 = vrot.lane.b32.xlu0 %v5199_v29, %s8335_s15  ;;  %4301 = vrot.lane.b32.xlu1 %v4254_v60, %s13272_s30  ;;  %v3837_v33 = vsel %vm954_vm9, %v3836_v11, %v3792_v35  ;;  %v3231_v26 = vcombine.high %v3227_v22, %v13461_v23 }
 0x7f1   : > { %v3558_v18 = vpop.permute.xlu0 %3557  ;;  %v3586_v44 = vpop.permute.xlu1 %3585 }
 0x7f2   : > { %v3600_v3 = vsel %vm956_vm10, %v3599_v49, %v3558_v18  ;;  %v3607_v36 = vsel %vm956_vm10, %v3606_v41, %v3586_v44 }
 0x7f3   : > { %5225 = vrot.lane.b32.xlu0 %v5131_v53, %s8335_s15  ;;  %4541 = vrot.lane.b32.xlu1 %v4487_v14, %s8335_s15  ;;  %v3601_v35 = vsel %vm958_vm11, %v3600_v3, %v11315_v5  ;;  %v3608_v1 = vsel %vm958_vm11, %v3607_v36, %v11317_v61 }
 0x7f5   : > { %v3796_v27 = vpop.permute.xlu0 %3795  ;;  %v3824_v63 = vpop.permute.xlu1 %3823 }
 0x7f6   : > { %v3838_v28 = vsel %vm956_vm10, %v3837_v33, %v3796_v27 }
 0x7f7   : > { %v3839_v0 = vsel %vm958_vm11, %v3838_v28, %v3800_v34  ;;  %4273 = vrot.lane.b32.xlu0 %v4186_v30, %s13272_s30  ;;  %4309 = vrot.lane.b32.xlu1 %v4255_v4, %s8335_s15  ;;  %v4187_v34 = vcombine.high %v11248_v8, %v13461_v23  ;;  %v13517_v8 = vld [vmem:[#allocation49_spill] sm:$0xff]  ;;  %s13534_s30 = smov 80  }
 0x7f8   : > { %v3840_v46 = vsel %vm960_vm12, %v3839_v0, %v3804_v43  ;;  %v3299_v12 = vcombine.high %v13517_v8, %v13461_v23 }
 0x7f9   : > { %3848 = vst [vmem:[#allocation3 + $0x18] sm:$0xf] %v3840_v46  ;;  %v3566_v54 = vpop.permute.xlu0 %3565  ;;  %v3594_v57 = vpop.permute.xlu1 %3593 }
 0x7fa   : > { %v3602_v15 = vsel %vm960_vm12, %v3601_v35, %v3566_v54  ;;  %v3609_v40 = vsel %vm960_vm12, %v3608_v1, %v3594_v57 }
 0x7fb   : > { %v3612_v43 = vrot.slane %v3602_v15, 4  ;;  %v3613_v6 = vrot.slane %v3609_v40, 4  ;;  %4513 = vrot.lane.b32.xlu0 %v4419_v47, %s8335_s15  ;;  %4281 = vrot.lane.b32.xlu1 %v4187_v34, %s8335_s15 }
 0x7fd   : > { %3616 = vst [vmem:[#allocation3 + $0x30] sm:$0xf0] %v3612_v43  ;;  %3617 = vst [vmem:[#allocation3] sm:$0xf0] %v3613_v6  ;;  %v3808_v5 = vpop.permute.xlu0 %3807  ;;  %v3832_v61 = vpop.permute.xlu1 %3831 }
 0x7fe   : > { %v3841_v29 = vsel %vm948_vm6, %v13518_v52, %v3808_v5 }
 0x7ff   : > { %v3842_v60 = vsel %vm950_vm7, %v3841_v29, %v11339_v56  ;;  %3321 = vrot.lane.b32.xlu0 %v3227_v22, %s8337_s17  ;;  %3353 = vrot.lane.b32.xlu1 %v3299_v12, %s8335_s15 }
 0x800   : > { %v3843_v59 = vsel %vm952_vm8, %v3842_v60, %v3816_v25 }
 0x801   : > { %v3844_v2 = vsel %vm954_vm9, %v3843_v59, %v11307_v58  ;;  %v4996_v32 = vpop.permute.xlu0 %4995  ;;  %v4968_v10 = vpop.permute.xlu1 %4967 }
 0x802   : > { %v3845_v53 = vsel %vm956_vm10, %v3844_v2, %v3824_v63 }
 0x803   : > { %v3846_v56 = vsel %vm958_vm11, %v3845_v53, %v11325_v17  ;;  %3325 = vrot.lane.b32.xlu0 %v3231_v26, %s8335_s15  ;;  %5284 = vperm.xlu1 %8262, %v2931_v31  }
 0x804   : > { %v3847_v25 = vsel %vm960_vm12, %v3846_v56, %v3832_v61 }
 0x805   : > { %3849 = vst [vmem:[#allocation3 + $0x10] sm:$0xf] %v3847_v25  ;;  %v5234_v58 = vpop.permute.xlu0 %5233  ;;  %v5206_v42 = vpop.permute.xlu1 %5205 }
 0x807   : > { %5456 = vperm.xlu0 %8263, %v5453_v37  }
 0x809   : > { %v4522_v55 = vpop.permute.xlu0 %4521  ;;  %v11434_v18 = vpop.permute.xlu1 %4493 }
 0x80d   : > { %v5004_v44 = vpop.permute.xlu0 %5003  ;;  %v4976_v14 = vpop.permute.xlu1 %4975 }
 0x811   : > { %v5242_v48 = vpop.permute.xlu0 %5241  ;;  %v11436_v17 = vpop.permute.xlu1 %5213 }
 0x815   : > { %v11438_v19 = vpop.permute.xlu0 %4289  ;;  %v11440_v11 = vpop.permute.xlu1 %4261 }
 0x819   : > { %v11442_v4 = vpop.permute.xlu0 %4529  ;;  %v11444_v49 = vpop.permute.xlu1 %4501 }
 0x81d   : > { %v5012_v41 = vpop.permute.xlu0 %5011  ;;  %v4984_v27 = vpop.permute.xlu1 %4983 }
 0x821   : > { %v11446_v33 = vpop.permute.xlu0 %5249  ;;  %v11448_v63 = vpop.permute.xlu1 %5221 }
 0x825   : > { %v11450_v30 = vpop.permute.xlu0 %4297  ;;  %v11452_v3 = vpop.permute.xlu1 %4305 }
 0x829   : > { %v11454_v36 = vpop.permute.xlu0 %4537  ;;  %v4992_v28 = vpop.permute.xlu1 %4991 }
 0x82a   : > { %v5025_v52 = vsel %vm948_vm6, %v11145_v24, %v4992_v28 }
 0x82b   : > { %v5026_v60 = vsel %vm950_vm7, %v5025_v52, %v4996_v32 }
 0x82d   : > { %v11456_v0 = vpop.permute.xlu0 %4269  ;;  %v4964_v46 = vpop.permute.xlu1 %4963 }
 0x82e   : > { %v5018_v29 = vsel %vm948_vm6, %v11171_v16, %v4964_v46 }
 0x82f   : > { %v5019_v59 = vsel %vm950_vm7, %v5018_v29, %v4968_v10 }
 0x831   : > { %v11458_v54 = vpop.permute.xlu0 %4509  ;;  %v5202_v35 = vpop.permute.xlu1 %5201 }
 0x832   : > { %v5256_v25 = vsel %vm948_vm6, %v11181_v7, %v5202_v35 }
 0x835   : > { %v11460_v1 = vpop.permute.xlu0 %4277  ;;  %v4518_v57 = vpop.permute.xlu1 %4517 }
 0x836   : > { %v4551_v24 = vsel %vm948_vm6, %v11218_v13, %v4518_v57 }
 0x837   : > { %v4552_v13 = vsel %vm950_vm7, %v4551_v24, %v4522_v55  ;;  %v13521_v24 = vld [vmem:[#allocation12_spill] sm:$0xff] }
 0x839   : > { %v5230_v47 = vpop.permute.xlu0 %5229  ;;  %v4490_v34 = vpop.permute.xlu1 %4489 }
 0x83a   : > { %v5263_v26 = vsel %vm948_vm6, %v11241_v21, %v5230_v47 }
 0x83b   : > { %v5264_v16 = vsel %vm950_vm7, %v5263_v26, %v5234_v58 }
 0x83d   : > { %v5000_v15 = vpop.permute.xlu0 %4999  ;;  %v4972_v40 = vpop.permute.xlu1 %4971 }
 0x83e   : > { %v5027_v53 = vsel %vm952_vm8, %v5026_v60, %v5000_v15  ;;  %v5020_v56 = vsel %vm952_vm8, %v5019_v59, %v4972_v40  ;;  %v5257_v15 = vsel %vm950_vm7, %v5256_v25, %v5206_v42 }
 0x83f   : > { %v5028_v32 = vsel %vm954_vm9, %v5027_v53, %v5004_v44  ;;  %v5021_v10 = vsel %vm954_vm9, %v5020_v56, %v4976_v14 }
 0x841   : > { %v5238_v43 = vpop.permute.xlu0 %5237  ;;  %v5210_v6 = vpop.permute.xlu1 %5209 }
 0x842   : > { %v5265_v21 = vsel %vm952_vm8, %v5264_v16, %v5238_v43  ;;  %v5258_v7 = vsel %vm952_vm8, %v5257_v15, %v5210_v6 }
 0x843   : > { %v5266_v44 = vsel %vm954_vm9, %v5265_v21, %v5242_v48  ;;  %v5259_v48 = vsel %vm954_vm9, %v5258_v7, %v11436_v17  ;;  %v13524_v7 = vld [vmem:[#allocation46_spill] sm:$0xff] }
 0x845   : > { %v4286_v5 = vpop.permute.xlu0 %4285  ;;  %v4258_v61 = vpop.permute.xlu1 %4257 }
 0x846   : > { %v4319_v58 = vsel %vm948_vm6, %v11290_v51, %v4286_v5  ;;  %v4544_v51 = vsel %vm948_vm6, %v11251_v45, %v4490_v34 }
 0x847   : > { %v4545_v29 = vsel %vm950_vm7, %v4544_v51, %v11434_v18 }
 0x849   : > { %v4526_v50 = vpop.permute.xlu0 %4525  ;;  %v4498_v62 = vpop.permute.xlu1 %4497 }
 0x84a   : > { %v4553_v43 = vsel %vm952_vm8, %v4552_v13, %v4526_v50  ;;  %v4546_v60 = vsel %vm952_vm8, %v4545_v29, %v4498_v62  ;;  %v13525_v13 = vld [vmem:[#allocation23_spill] sm:$0xff] }
 0x84b   : > { %v4554_v5 = vsel %vm954_vm9, %v4553_v43, %v11442_v4  ;;  %v5275_v29 = vld [vmem:[#allocation3 + $0x10] sm:$0xff] }
 0x84d   : > { %v5008_v38 = vpop.permute.xlu0 %5007  ;;  %v4980_v22 = vpop.permute.xlu1 %4979 }
 0x84e   : > { %v5029_v46 = vsel %vm956_vm10, %v5028_v32, %v5008_v38  ;;  %v5022_v47 = vsel %vm956_vm10, %v5021_v10, %v4980_v22  ;;  %v13522_v10 = vld [vmem:[#allocation36_spill] sm:$0xff] }
 0x84f   : > { %v5030_v35 = vsel %vm958_vm11, %v5029_v46, %v5012_v41  ;;  %v5023_v57 = vsel %vm958_vm11, %v5022_v47, %v4984_v27  ;;  %v4312_v41 = vsel %vm948_vm6, %v11293_v9, %v4258_v61  ;;  %v4320_v27 = vsel %vm950_vm7, %v4319_v58, %v11438_v19  ;;  %v13519_v19 = vld [vmem:[#allocation31_spill] sm:$0xff]  ;;  %v13520_v61 = vld [vmem:[#allocation42_spill] sm:$0xff] }
 0x850   : > { %v3363_v4 = vsel %vm948_vm6, %v13520_v61, %v13519_v19 }
 0x851   : > { %v5246_v8 = vpop.permute.xlu0 %5245  ;;  %v5218_v12 = vpop.permute.xlu1 %5217 }
 0x852   : > { %v5267_v38 = vsel %vm956_vm10, %v5266_v44, %v5246_v8  ;;  %v5260_v45 = vsel %vm956_vm10, %v5259_v48, %v5218_v12 }
 0x853   : > { %v5268_v50 = vsel %vm958_vm11, %v5267_v38, %v11446_v33  ;;  %v4313_v33 = vsel %vm950_vm7, %v4312_v41, %v11440_v11  ;;  %v13529_v41 = vld [vmem:[#allocation13_spill] sm:$0xff] }
 0x855   : > { %v4294_v31 = vpop.permute.xlu0 %4293  ;;  %v4266_v2 = vpop.permute.xlu1 %4265 }
 0x856   : > { %v4321_v17 = vsel %vm952_vm8, %v4320_v27, %v4294_v31  ;;  %v5261_v31 = vsel %vm958_vm11, %v5260_v45, %v11448_v63  ;;  %v4314_v56 = vsel %vm952_vm8, %v4313_v33, %v4266_v2  ;;  %v4547_v63 = vsel %vm954_vm9, %v4546_v60, %v11444_v49  ;;  %v13523_v49 = vld [vmem:[#allocation14_spill] sm:$0xff]  ;;  %v5274_v33 = vld [vmem:[#allocation3 + $0x18] sm:$0xff] }
 0x857   : > { %v4322_v12 = vsel %vm954_vm9, %v4321_v17, %v11450_v30  ;;  %v3364_v30 = vsel %vm950_vm7, %v3363_v4, %v13521_v24  ;;  %v13531_v17 = vld [vmem:[#allocation35_spill] sm:$0xff] }
 0x859   : > { %v4534_v37 = vpop.permute.xlu0 %4533  ;;  %v4506_v28 = vpop.permute.xlu1 %4505 }
 0x85a   : > { %v4555_v34 = vsel %vm956_vm10, %v4554_v5, %v4534_v37  ;;  %v3365_v37 = vsel %vm952_vm8, %v3364_v30, %v13522_v10  ;;  %v4548_v21 = vsel %vm956_vm10, %v4547_v63, %v4506_v28  ;;  %v13532_v30 = vld [vmem:[#allocation32_spill] sm:$0xff] }
 0x85b   : > { %v4556_v26 = vsel %vm958_vm11, %v4555_v34, %v11454_v36  ;;  %v4315_v36 = vsel %vm954_vm9, %v4314_v56, %v11456_v0  ;;  %v3356_v0 = vsel %vm948_vm6, %v13524_v7, %v13523_v49  ;;  %v4549_v44 = vsel %vm958_vm11, %v4548_v21, %v11458_v54 }
 0x85d   : > { %v5016_v14 = vpop.permute.xlu0 %5015  ;;  %v4988_v40 = vpop.permute.xlu1 %4987 }
 0x85e   : > { %v5031_v42 = vsel %vm960_vm12, %v5030_v35, %v5016_v14  ;;  %v5024_v6 = vsel %vm960_vm12, %v5023_v57, %v4988_v40  ;;  %v13526_v35 = vld [vmem:[#allocation19_spill] sm:$0xff] }
 0x85f   : > { %v5035_v55 = vrot.slane %v5031_v42, 4  ;;  %v5034_v22 = vrot.slane %v5024_v6, 4  ;;  %v13527_v42 = vld [vmem:[#allocation16_spill] sm:$0xff] }
 0x860   : > { %v3357_v6 = vsel %vm950_vm7, %v3356_v0, %v13527_v42 }
 0x861   : > { %5039 = vst [vmem:[#allocation3 + $0x20] sm:$0xf0] %v5035_v55  ;;  %5038 = vst [vmem:[#allocation3 + $0x8] sm:$0xf0] %v5034_v22  ;;  %v5254_v8 = vpop.permute.xlu0 %5253  ;;  %v4302_v52 = vpop.permute.xlu1 %4301  ;;  %v13528_v22 = vld [vmem:[#allocation29_spill] sm:$0xff] }
 0x862   : > { %v5269_v9 = vsel %vm960_vm12, %v5268_v50, %v5254_v8  ;;  %v4323_v18 = vsel %vm956_vm10, %v4322_v12, %v4302_v52  ;;  %v13530_v52 = vld [vmem:[#allocation41_spill] sm:$0xff] }
 0x863   : > { %5271 = vst [vmem:[#allocation3 + $0x38] sm:$0xf] %v5269_v9  ;;  %v4324_v2 = vsel %vm958_vm11, %v4323_v18, %v11452_v3  ;;  %v3366_v3 = vsel %vm954_vm9, %v3365_v37, %v13525_v13  ;;  %v2930_v12 = vld [vmem:[%s13178_s7] sm:$0xf] }
 0x864   : > { %v3367_v57 = vsel %vm956_vm10, %v3366_v3, %v13526_v35 }
 0x865   : > { %v5226_v59 = vpop.permute.xlu0 %5225  ;;  %v4542_v53 = vpop.permute.xlu1 %4541  ;;  %v3368_v27 = vsel %vm958_vm11, %v3367_v57, %v13529_v41 }
 0x866   : > { %v5262_v25 = vsel %vm960_vm12, %v5261_v31, %v5226_v59  ;;  %v4557_v11 = vsel %vm960_vm12, %v4556_v26, %v4542_v53 }
 0x867   : > { %5270 = vst [vmem:[#allocation3 + $0x40] sm:$0xf] %v5262_v25  ;;  %v4561_v62 = vrot.slane %v4557_v11, 4 }
 0x868   : > { %v5279_v54 = vld [vmem:[#allocation3 + $0x20] sm:$0xff]  ;;  %v5278_v51 = vld [vmem:[#allocation3 + $0x8] sm:$0xff] }
 0x869   : > { %4565 = vst [vmem:[#allocation3 + $0x28] sm:$0xf0] %v4561_v62  ;;  %v4274_v16 = vpop.permute.xlu0 %4273  ;;  %v4310_v32 = vpop.permute.xlu1 %4309  ;;  %v5370_v62 = vld [vmem:[%s13180_s9] sm:$0xf] }
 0x86a   : > { %v4316_v46 = vsel %vm956_vm10, %v4315_v36, %v4274_v16  ;;  %v4325_v47 = vsel %vm960_vm12, %v4324_v2, %v4310_v32  ;;  %v5281_v15 = vld [vmem:[#allocation3 + $0x38] sm:$0xf]  ;;  %v13535_v32 = vld [vmem:[#allocation45_spill] sm:$0xff] }
 0x86b   : > { %4327 = vst [vmem:[#allocation3 + $0x28] sm:$0xf] %v4325_v47  ;;  %8181 = vmatprep.subr.msk.mxu1 %vm2761_vm13, %v5281_v15  ;;  %v4317_v28 = vsel %vm958_vm11, %v4316_v46, %v11460_v1  ;;  %v3358_v1 = vsel %vm952_vm8, %v3357_v6, %v13528_v22 }
 0x86c   : > { %v3359_v45 = vsel %vm954_vm9, %v3358_v1, %v13530_v52 }
 0x86d   : > { %v4514_v58 = vpop.permute.xlu0 %4513  ;;  %v4282_v14 = vpop.permute.xlu1 %4281  ;;  %v3360_v34 = vsel %vm956_vm10, %v3359_v45, %v13531_v17 }
 0x86e   : > { %v4550_v40 = vsel %vm960_vm12, %v4549_v44, %v4514_v58  ;;  %v4318_v43 = vsel %vm960_vm12, %v4317_v28, %v4282_v14  ;;  %v5280_v38 = vld [vmem:[#allocation3 + $0x40] sm:$0xf] }
 0x86f   : > { %v4560_v55 = vrot.slane %v4550_v40, 4  ;;  %4326 = vst [vmem:[#allocation3 + $0x48] sm:$0xf] %v4318_v43  ;;  %8182 = vmatpush1.msk.msra.mxu1 %vm2761_vm13, %v5280_v38 }
 0x870   : > { %5321 = vmatprep.subr.mxu1 %v5279_v54 }
 0x871   : > { %4564 = vst [vmem:[#allocation3 + $0x48] sm:$0xf0] %v4560_v55  ;;  %v3322_v48 = vpop.permute.xlu0 %3321  ;;  %5322 = vmatpush1.msra.mxu1 %v5278_v51  ;;  %v3354_v5 = vpop.permute.xlu1 %3353 }
 0x872   : > { %v3369_v50 = vsel %vm960_vm12, %v3368_v27, %v3354_v5  ;;  %v5277_v8 = vld [vmem:[#allocation3 + $0x28] sm:$0xff]  ;;  %v3361_v9 = vsel %vm958_vm11, %v3360_v34, %v3322_v48 }
 0x873   : > { %3371 = vst [vmem:[#allocation3] sm:$0xf] %v3369_v50  ;;  %5323 = vmatprep.subr.mxu1 %v5277_v8 }
 0x875   : > { %v3326_v19 = vpop.permute.xlu0 %3325 }
 0x876   : > { %v3362_v61 = vsel %vm960_vm12, %v3361_v9, %v3326_v19 }
 0x877   : > { %3370 = vst [vmem:[#allocation3 + $0x30] sm:$0xf] %v3362_v61 }
 0x878   : > { %v5276_v4 = vld [vmem:[#allocation3 + $0x48] sm:$0xff] }
 0x879   : > { %5324 = vmatpush1.msra.mxu1 %v5276_v4 }
 0x87a   : > { %5325 = vmatprep.subr.mxu1 %v5275_v29  ;;  %v5273_v60 = vld [vmem:[#allocation3] sm:$0xff] }
 0x87b   : > { %5326 = vmatpush1.msra.mxu1 %v5274_v33 }
 0x87c   : > { %5327 = vmatprep.subr.mxu1 %v5273_v60 }
 0x87e   : > { %v5272_v59 = vld [vmem:[#allocation3 + $0x30] sm:$0xff]  ;;  %v5285_v26 = vpop.permute.xlu1 %5284 }
 0x87f   : > { %5328 = vmatpush1.msra.mxu1 %v5272_v59 }
 0x880   : > { %8183 = vmatmul.mubr.msk.f32.vlgmr.msra.gmra.mxu1 %vm5287_vm15, %v2930_v12 }
 0x881   : > { %7977 = vmatprep.mubr.f32.mxu1 %v13461_v23 }
 0x882   : > { %v5457_v16 = vpop.permute.xlu0 %5456 }
 0x940   : > { %v5363_v31 = vpop.f32.mrf.mxu1 }
 0x941   : > { %v5364_v53 = vadd.f32 %v5363_v31, %v5285_v26 }
 0x942   : > { %v5365_v56 = vpop.f32.mrf.mxu1 }
 0x943   : > { %v5366_v18 = vadd.f32 %v5365_v56, %v5285_v26  ;;  %v5368_v11 = vmax.f32 %v5364_v53, 0.0 }
 0x945   : > { %v5369_v25 = vmax.f32 %v5366_v18, 0.0 }
 0x947   : > { %8184 = vmatprep.subr.msk.mxu0 %vm2761_vm13, %v5369_v25 }
 0x948   : > { %8185 = vmatpush1.msk.msra.mxu0 %vm2761_vm13, %v5368_v11 }
 0x949   : > { %8186 = vmatmul.mubr.msk.f32.vlgmr.msra.gmra.mxu0 %vm2757_vm14, %v5370_v62 }
 0x94a   : > { %7893 = vmatprep.mubr.f32.mxu0 %v13461_v23 }
 0xa09   : > { %v5446_v24 = vpop.f32.mrf.mxu0 }
 0xa0a   : > { %v5451_v63 = vadd.f32 %v5446_v24, %v13532_v30 }
 0xa0b   : > { %v5448_v2 = vpop.f32.mrf.mxu0 }
 0xa0c   : > { %v11582_v36 = vadd.f32 %v5457_v16, %v5451_v63  ;;  %v5452_v10 = vadd.f32 %v5448_v2, %v13535_v32 }
 0xa0e   : > { %13533 = vst [vmem:[#allocation44_spill] sm:$0xff] %v11582_v36  ;;  %5469 = vrot.lane.b32.xlu0 %v11582_v36, %s8337_s17  ;;  %5466 = vrot.lane.b32.xlu1 %v11582_v36, %s8335_s15  ;;  %v11597_v37 = vadd.f32 %v5457_v16, %v5452_v10 }
 0xa10   : > { %13538 = vst [vmem:[#allocation24_spill] sm:$0xff] %v11597_v37 }
 0xa12   : > { %5475 = vrot.lane.b32.xlu0 %v11582_v36, %s8336_s16  ;;  %5472 = vrot.lane.b32.xlu1 %v11582_v36, %s13534_s30 }
 0xa16   : > { %5481 = vrot.lane.b32.xlu0 %v11582_v36, %s13536_s27  ;;  %5478 = vrot.lane.b32.xlu1 %v11582_v36, %s13537_s24 }
 0xa1a   : > { %5484 = vrot.lane.b32.xlu1 %v11582_v36, %s13464_s21  ;;  %5488 = vrot.lane.b32.xlu0 %v11597_v37, %s8335_s15 }
 0xa1e   : > { %5491 = vrot.lane.b32.xlu1 %v11597_v37, %s8337_s17  ;;  %5494 = vrot.lane.b32.xlu0 %v11597_v37, %s13534_s30 }
 0xa22   : > { %5497 = vrot.lane.b32.xlu1 %v11597_v37, %s8336_s16  ;;  %5500 = vrot.lane.b32.xlu0 %v11597_v37, %s13537_s24 }
 0xa26   : > { %5503 = vrot.lane.b32.xlu1 %v11597_v37, %s13536_s27  ;;  %5506 = vrot.lane.b32.xlu0 %v11597_v37, %s13464_s21 }
 0xa80   : > { %v5470_v21 = vpop.permute.xlu0 %5469  ;;  %v5467_v46 = vpop.permute.xlu1 %5466 }
 0xa81   : > { %v5509_v13 = vcombine.low %v11582_v36, %v5470_v21 }
 0xa83   : > { %v5516_v14 = vrot.slane %v5509_v13, %v13465_v20 }
 0xa84   : > { %v5476_v47 = vpop.permute.xlu0 %5475  ;;  %v5473_v15 = vpop.permute.xlu1 %5472 }
 0xa85   : > { %v5517_v49 = vcombine.low %v5467_v46, %v5473_v15 }
 0xa87   : > { %v5524_v3 = vrot.slane %v5517_v49, %v13465_v20 }
 0xa88   : > { %v5482_v7 = vpop.permute.xlu0 %5481  ;;  %v5479_v0 = vpop.permute.xlu1 %5478 }
 0xa89   : > { %v5525_v58 = vcombine.low %v5476_v47, %v5482_v7  ;;  %v5541_v57 = vcombine.low %v5516_v14, %v5524_v3  ;;  %v5542_v5 = vcombine.high %v5516_v14, %v5524_v3 }
 0xa8b   : > { %v5532_v40 = vrot.slane %v5525_v58, %v13465_v20  ;;  %v5549_v55 = vrot.slane %v5541_v57, %v13466_v39  ;;  %v5556_v61 = vrot.slane %v5542_v5, %v13466_v39 }
 0xa8c   : > { %v5485_v44 = vpop.permute.xlu1 %5484  ;;  %v5489_v28 = vpop.permute.xlu0 %5488 }
 0xa8d   : > { %v5533_v35 = vcombine.low %v5479_v0, %v5485_v44 }
 0xa8f   : > { %v5540_v43 = vrot.slane %v5533_v35, %v13465_v20 }
 0xa90   : > { %v5492_v38 = vpop.permute.xlu1 %5491  ;;  %v5495_v42 = vpop.permute.xlu0 %5494 }
 0xa91   : > { %v5557_v6 = vcombine.low %v5532_v40, %v5540_v43  ;;  %v5577_v22 = vcombine.low %v11597_v37, %v5492_v38  ;;  %v5585_v1 = vcombine.low %v5489_v28, %v5495_v42  ;;  %v5558_v41 = vcombine.high %v5532_v40, %v5540_v43 }
 0xa93   : > { %v5565_v54 = vrot.slane %v5557_v6, %v13466_v39  ;;  %v5584_v50 = vrot.slane %v5577_v22, %v13465_v20  ;;  %v5592_v8 = vrot.slane %v5585_v1, %v13465_v20  ;;  %v5572_v17 = vrot.slane %v5558_v41, %v13466_v39 }
 0xa94   : > { %v5498_v51 = vpop.permute.xlu1 %5497  ;;  %v5501_v48 = vpop.permute.xlu0 %5500 }
 0xa95   : > { %v5573_v27 = vcombine.low %v5549_v55, %v5565_v54  ;;  %v5574_v19 = vcombine.high %v5549_v55, %v5565_v54  ;;  %v5609_v4 = vcombine.low %v5584_v50, %v5592_v8  ;;  %v5575_v12 = vcombine.low %v5556_v61, %v5572_v17 }
 0xa96   : > { %v5576_v53 = vcombine.high %v5556_v61, %v5572_v17  ;;  %v5610_v18 = vcombine.high %v5584_v50, %v5592_v8 }
 0xa97   : > { %5653 = vrot.lane.b32.xlu1 %v5573_v27, %s13467_s22  ;;  %v5617_v59 = vrot.slane %v5609_v4, %v13466_v39 }
 0xa98   : > { %v5504_v52 = vpop.permute.xlu1 %5503  ;;  %v5507_v45 = vpop.permute.xlu0 %5506  ;;  %v5624_v62 = vrot.slane %v5610_v18, %v13466_v39 }
 0xa99   : > { %v5593_v34 = vcombine.low %v5498_v51, %v5504_v52  ;;  %v5601_v9 = vcombine.low %v5501_v48, %v5507_v45 }
 0xa9b   : > { %v5600_v29 = vrot.slane %v5593_v34, %v13465_v20  ;;  %v5608_v33 = vrot.slane %v5601_v9, %v13465_v20  ;;  %5657 = vrot.lane.b32.xlu1 %v5574_v19, %s13467_s22 }
 0xa9d   : > { %v5625_v60 = vcombine.low %v5600_v29, %v5608_v33  ;;  %v5626_v26 = vcombine.high %v5600_v29, %v5608_v33 }
 0xa9f   : > { %v5633_v31 = vrot.slane %v5625_v60, %v13466_v39  ;;  %5661 = vrot.lane.b32.xlu1 %v5575_v12, %s13467_s22  ;;  %v5640_v25 = vrot.slane %v5626_v26, %v13466_v39 }
 0xaa1   : > { %v5641_v56 = vcombine.low %v5617_v59, %v5633_v31  ;;  %v5642_v11 = vcombine.high %v5617_v59, %v5633_v31  ;;  %v5643_v24 = vcombine.low %v5624_v62, %v5640_v25  ;;  %v5644_v30 = vcombine.high %v5624_v62, %v5640_v25 }
 0xaa3   : > { %5665 = vrot.lane.b32.xlu1 %v5576_v53, %s13467_s22  ;;  %5655 = vrot.lane.b32.xlu0 %v5641_v56, %s13467_s22 }
 0xaa7   : > { %5659 = vrot.lane.b32.xlu0 %v5642_v11, %s13467_s22 }
 0xaab   : > { %5663 = vrot.lane.b32.xlu0 %v5643_v24, %s13467_s22 }
 0xaaf   : > { %5667 = vrot.lane.b32.xlu0 %v5644_v30, %s13467_s22  ;;  %s13539_s22 = smov 124  }
 0xb09   : > { %v5654_v63 = vpop.permute.xlu1 %5653 }
 0xb0a   : > { %5677 = vst.msk [vmem:[#allocation2 + $0x2] sm:$0xff] %vm678_vm2, %v5654_v63 }
 0xb0d   : > { %v5658_v16 = vpop.permute.xlu1 %5657 }
 0xb0e   : > { %5679 = vst.msk [vmem:[#allocation2 + $0x1a] sm:$0xff] %vm678_vm2, %v5658_v16 }
 0xb11   : > { %v5662_v2 = vpop.permute.xlu1 %5661  ;;  %v11643_v32 = vld [vmem:[#allocation2] sm:$0xff] }
 0xb12   : > { %5681 = vst.msk [vmem:[#allocation2 + $0x32] sm:$0xff] %vm678_vm2, %v5662_v2  ;;  %5913 = vrot.lane.b32.xlu1 %v11643_v32, %s13468_s23  ;;  %v7099_v51 = vrot.slane %v11643_v32, 4  ;;  %v6387_v24 = vrot.slane %v11643_v32, 2 }
 0xb15   : > { %v5666_v10 = vpop.permute.xlu1 %5665  ;;  %v5656_v21 = vpop.permute.xlu0 %5655  ;;  %v11648_v46 = vld [vmem:[#allocation2 + $0x18] sm:$0xff] }
 0xb16   : > { %5683 = vst.msk [vmem:[#allocation2 + $0x4a] sm:$0xff] %vm678_vm2, %v5666_v10  ;;  %5678 = vst.msk [vmem:[#allocation2 + $0xa] sm:$0xff] %vm678_vm2, %v5656_v21  ;;  %5917 = vrot.lane.b32.xlu0 %v11648_v46, %s13468_s23  ;;  %v7104_v25 = vrot.slane %v11648_v46, 4  ;;  %v6392_v63 = vrot.slane %v11648_v46, 2 }
 0xb19   : > { %v5660_v47 = vpop.permute.xlu0 %5659  ;;  %v11654_v15 = vld [vmem:[#allocation2 + $0x30] sm:$0xff] }
 0xb1a   : > { %5680 = vst.msk [vmem:[#allocation2 + $0x22] sm:$0xff] %vm678_vm2, %v5660_v47  ;;  %5921 = vrot.lane.b32.xlu1 %v11654_v15, %s13468_s23  ;;  %v5697_v49 = vcombine.low %v11643_v32, %v11654_v15  ;;  %v5698_v7 = vcombine.high %v11643_v32, %v11654_v15  ;;  %v7109_v5 = vrot.slane %v11654_v15, 4  ;;  %v6397_v45 = vrot.slane %v11654_v15, 2 }
 0xb1c   : > { %v11679_v35 = vrot.slane %v5697_v49, %v13465_v20  ;;  %v11685_v40 = vrot.slane %v5698_v7, %v13465_v20 }
 0xb1d   : > { %v5664_v0 = vpop.permute.xlu0 %5663  ;;  %v11663_v13 = vld [vmem:[#allocation2 + $0x48] sm:$0xff]  ;;  %v11672_v58 = vld [vmem:[#allocation2 + $0x10] sm:$0xf] }
 0xb1e   : > { %5682 = vst.msk [vmem:[#allocation2 + $0x3a] sm:$0xff] %vm678_vm2, %v5664_v0  ;;  %6151 = vrot.lane.b32.xlu1 %v11643_v32, %s13539_s22  ;;  %5925 = vrot.lane.b32.xlu0 %v11663_v13, %s13468_s23  ;;  %v11670_v3 = vld [vmem:[#allocation2 + $0x8] sm:$0xff]  ;;  %v5713_v44 = vcombine.low %v11648_v46, %v11663_v13  ;;  %v5714_v28 = vcombine.high %v11648_v46, %v11663_v13  ;;  %13540 = vst [vmem:[#allocation15_spill] sm:$0xff] %v11685_v40  ;;  %v7102_v42 = vrot.slane %v11672_v58, 4 }
 0xb1f   : > { %v7100_v38 = vrot.slane %v11670_v3, 4  ;;  %v6388_v53 = vrot.slane %v11670_v3, 2  ;;  %v7114_v11 = vrot.slane %v11663_v13, 4 }
 0xb20   : > { %v11682_v57 = vrot.slane %v5713_v44, %v13465_v20  ;;  %v11688_v43 = vrot.slane %v5714_v28, %v13465_v20  ;;  %v6402_v44 = vrot.slane %v11663_v13, 2 }
 0xb21   : > { %v5668_v14 = vpop.permute.xlu0 %5667  ;;  %v11705_v1 = vld [vmem:[#allocation2 + $0x20] sm:$0xff]  ;;  %v11712_v27 = vld [vmem:[#allocation2 + $0x28] sm:$0xf]  ;;  %v11720_v50 = vsel %vm2761_vm13, %v7100_v38, %v7102_v42  ;;  %v11726_v17 = vsel %vm2761_vm13, %v7099_v51, %v7100_v38  ;;  %v11781_v49 = vsel %vm1441_vm4, %v6387_v24, %v6388_v53 }
 0xb22   : > { %13541 = vst [vmem:[#allocation34_spill] sm:$0xff] %v11688_v43  ;;  %5684 = vst.msk [vmem:[#allocation2 + $0x52] sm:$0xff] %vm678_vm2, %v5668_v14  ;;  %6159 = vrot.lane.b32.xlu1 %v11654_v15, %s13539_s22  ;;  %6155 = vrot.lane.b32.xlu0 %v11648_v46, %s13539_s22  ;;  %v5730_v6 = vcombine.high %v11679_v35, %v11682_v57  ;;  %v5745_v55 = vcombine.low %v11685_v40, %v11688_v43  ;;  %v7105_v4 = vrot.slane %v11705_v1, 4 }
 0xb23   : > { %v5729_v54 = vcombine.low %v11679_v35, %v11682_v57  ;;  %v7107_v29 = vrot.slane %v11712_v27, 4  ;;  %v6393_v62 = vrot.slane %v11705_v1, 2 }
 0xb24   : > { %v11771_v10 = vsel %vm2761_vm13, %v7104_v25, %v7105_v4 }
 0xb25   : > { %v11708_v48 = vld [vmem:[#allocation2 + $0x38] sm:$0xff]  ;;  %v11710_v41 = vld [vmem:[#allocation2 + $0x40] sm:$0xf]  ;;  %v7108_v16 = vsel %vm2761_vm13, %v7105_v4, %v7107_v29  ;;  %v11799_v14 = vsel %vm1441_vm4, %v6392_v63, %v6393_v62 }
 0xb26   : > { %6163 = vrot.lane.b32.xlu0 %v11663_v13, %s13539_s22  ;;  %5915 = vrot.lane.b32.xlu1 %v11670_v3, %s13468_s23  ;;  %v7110_v8 = vrot.slane %v11708_v48, 4  ;;  %v7112_v52 = vrot.slane %v11710_v41, 4  ;;  %v6398_v34 = vrot.slane %v11708_v48, 2  ;;  %v5765_v9 = vcombine.low %v11670_v3, %v11708_v48 }
 0xb27   : > { %v5766_v19 = vcombine.high %v11670_v3, %v11708_v48 }
 0xb28   : > { %v11734_v61 = vsel %vm2761_vm13, %v7110_v8, %v7112_v52  ;;  %v11739_v33 = vsel %vm2761_vm13, %v7109_v5, %v7110_v8  ;;  %v11765_v30 = vsel %vm1441_vm4, %v6397_v45, %v6398_v34  ;;  %v11832_v29 = vrot.slane %v5765_v9, %v13465_v20 }
 0xb29   : > { %v11741_v60 = vld [vmem:[#allocation2 + $0x50] sm:$0xff]  ;;  %v7195_v12 = vcombine.low %v11720_v50, %v11734_v61  ;;  %v7196_v59 = vcombine.high %v11720_v50, %v11734_v61  ;;  %v11747_v31 = vld [vmem:[#allocation2 + $0x58] sm:$0xf]  ;;  %v7128_v26 = vcombine.high %v11726_v17, %v11739_v33  ;;  %v6415_v7 = vcombine.low %v11781_v49, %v11765_v30 }
 0xb2a   : > { %5919 = vrot.lane.b32.xlu0 %v11705_v1, %s13468_s23  ;;  %5923 = vrot.lane.b32.xlu1 %v11708_v48, %s13468_s23  ;;  %v7115_v56 = vrot.slane %v11741_v60, 4  ;;  %v7117_v18 = vrot.slane %v11747_v31, 4  ;;  %v6403_v46 = vrot.slane %v11741_v60, 2  ;;  %v6416_v0 = vcombine.high %v11781_v49, %v11765_v30 }
 0xb2b   : > { %v11818_v5 = vrot.slane %v7195_v12, %v13465_v20  ;;  %v5781_v8 = vcombine.low %v11705_v1, %v11741_v60  ;;  %v11823_v52 = vrot.slane %v7196_v59, %v13465_v20  ;;  %v11826_v45 = vrot.slane %v6415_v7, %v13465_v20 }
 0xb2c   : > { %v7118_v2 = vsel %vm2761_vm13, %v7115_v56, %v7117_v18  ;;  %v11774_v21 = vsel %vm2761_vm13, %v7114_v11, %v7115_v56  ;;  %v11804_v38 = vsel %vm1441_vm4, %v6402_v44, %v6403_v46  ;;  %v5782_v12 = vcombine.high %v11705_v1, %v11741_v60 }
 0xb2d   : > { %v7211_v47 = vcombine.low %v7108_v16, %v7118_v2  ;;  %v7212_v15 = vcombine.high %v7108_v16, %v7118_v2  ;;  %v7144_v32 = vcombine.high %v11771_v10, %v11774_v21  ;;  %v6431_v51 = vcombine.low %v11799_v14, %v11804_v38 }
 0xb2e   : > { %6153 = vrot.lane.b32.xlu1 %v11670_v3, %s13539_s22  ;;  %5927 = vrot.lane.b32.xlu0 %v11741_v60, %s13468_s23  ;;  %v6432_v13 = vcombine.high %v11799_v14, %v11804_v38  ;;  %v11835_v56 = vrot.slane %v5781_v8, %v13465_v20  ;;  %v11845_v25 = vrot.slane %v5766_v19, %v13465_v20 }
 0xb2f   : > { %v11794_v28 = vrot.slane %v7211_v47, %v13465_v20  ;;  %v11807_v42 = vrot.slane %v7212_v15, %v13465_v20  ;;  %v11829_v4 = vrot.slane %v6431_v51, %v13465_v20  ;;  %v11842_v59 = vrot.slane %v7144_v32, %v13465_v20 }
 0xb30   : > { %v5798_v24 = vcombine.high %v11832_v29, %v11835_v56  ;;  %v5796_v63 = vrot.slane %v5782_v12, %v13465_v20  ;;  %v5797_v19 = vcombine.low %v11832_v29, %v11835_v56  ;;  %v11861_v47 = vrot.slane %v7128_v26, %v13465_v20 }
 0xb31   : > { %v7228_v18 = vcombine.high %v11818_v5, %v11794_v28  ;;  %v6448_v11 = vcombine.high %v11826_v45, %v11829_v4  ;;  %v7243_v9 = vcombine.low %v11823_v52, %v11807_v42  ;;  %v11864_v15 = vrot.slane %v6432_v13, %v13465_v20 }
 0xb32   : > { %6161 = vrot.lane.b32.xlu1 %v11708_v48, %s13539_s22  ;;  %6157 = vrot.lane.b32.xlu0 %v11705_v1, %s13539_s22  ;;  %v5813_v32 = vcombine.low %v11845_v25, %v5796_v63  ;;  %v5814_v7 = vcombine.high %v11845_v25, %v5796_v63  ;;  %v7175_v44 = vcombine.low %v11861_v47, %v11842_v59 }
 0xb33   : > { %v11874_v51 = vrot.slane %v6416_v0, %v13465_v20  ;;  %v7244_v26 = vcombine.high %v11823_v52, %v11807_v42  ;;  %v7176_v8 = vcombine.high %v11861_v47, %v11842_v59  ;;  %v6447_v29 = vcombine.low %v11826_v45, %v11829_v4 }
 0xb34   : > { %v7227_v0 = vcombine.low %v11818_v5, %v11794_v28  ;;  %v5812_v1 = vrot.slane %v5798_v24, %v13466_v39  ;;  %v5744_v48 = vrot.slane %v5730_v6, %v13466_v39  ;;  %v11982_v6 = vrot.slane %v5797_v19, %v13466_v39 }
 0xb35   : > { %v6463_v13 = vcombine.low %v11874_v51, %v11864_v15  ;;  %v6464_v56 = vcombine.high %v11874_v51, %v11864_v15  ;;  %v7127_v35 = vcombine.low %v11726_v17, %v11739_v33 }
 0xb36   : > { %7337 = vrot.lane.b32.xlu1 %v11720_v50, %s13468_s23  ;;  %6165 = vrot.lane.b32.xlu0 %v11741_v60, %s13539_s22  ;;  %v11973_v60 = vrot.slane %v5814_v7, %v13466_v39  ;;  %13544 = vst [vmem:[#allocation9_spill] sm:$0xff] %v11982_v6  ;;  %v12134_v59 = vrot.slane %v7227_v0, %v13466_v39 }
 0xb37   : > { %v6471_v42 = vrot.slane %v6463_v13, %v13466_v39  ;;  %v7190_v13 = vrot.slane %v7176_v8, %v13466_v39 }
 0xb38   : > { %13542 = vst [vmem:[#allocation38_spill] sm:$0xff] %v11973_v60  ;;  %v7259_v15 = vcombine.high %v12134_v59, %v13461_v23 }
 0xb3a   : > { %7345 = vrot.lane.b32.xlu1 %v11734_v61, %s13468_s23  ;;  %7341 = vrot.lane.b32.xlu0 %v7108_v16, %s13468_s23 }
 0xb3e   : > { %7575 = vrot.lane.b32.xlu1 %v11720_v50, %s13539_s22  ;;  %7349 = vrot.lane.b32.xlu0 %v7118_v2, %s13468_s23  ;;  %v6390_v50 = vrot.slane %v11672_v58, 2 }
 0xb42   : > { %7583 = vrot.lane.b32.xlu1 %v11734_v61, %s13539_s22  ;;  %7579 = vrot.lane.b32.xlu0 %v7108_v16, %s13539_s22  ;;  %v11913_v61 = vsel %vm1441_vm4, %v6388_v53, %v6390_v50  ;;  %v6400_v16 = vrot.slane %v11710_v41, 2  ;;  %v6405_v53 = vrot.slane %v11747_v31, 2  ;;  %v11979_v31 = vrot.slane %v5729_v54, %v13466_v39 }
 0xb44   : > { %v11924_v58 = vsel %vm1441_vm4, %v6398_v34, %v6400_v16  ;;  %v6406_v41 = vsel %vm1441_vm4, %v6403_v46, %v6405_v53  ;;  %v5753_v34 = vrot.slane %v5745_v55, %v13466_v39  ;;  %13543 = vst [vmem:[#allocation25_spill] sm:$0xff] %v11979_v31  ;;  %v7143_v55 = vcombine.low %v11771_v10, %v11774_v21 }
 0xb45   : > { %v6483_v46 = vcombine.low %v11913_v61, %v11924_v58  ;;  %v6484_v16 = vcombine.high %v11913_v61, %v11924_v58 }
 0xb46   : > { %7335 = vrot.lane.b32.xlu1 %v11726_v17, %s13468_s23  ;;  %7587 = vrot.lane.b32.xlu0 %v7118_v2, %s13539_s22  ;;  %v6395_v2 = vrot.slane %v11712_v27, 2  ;;  %v5821_v27 = vrot.slane %v5813_v32, %v13466_v39  ;;  %v7151_v57 = vrot.slane %v7143_v55, %v13465_v20  ;;  %v12021_v32 = vrot.slane %v7228_v18, %v13466_v39 }
 0xb47   : > { %v6491_v25 = vrot.slane %v6483_v46, %v13465_v20 }
 0xb48   : > { %v6396_v3 = vsel %vm1441_vm4, %v6393_v62, %v6395_v2  ;;  %v5761_v62 = vcombine.high %v11979_v31, %v13461_v23 }
 0xb49   : > { %v6499_v54 = vcombine.low %v6396_v3, %v6406_v41  ;;  %v6500_v24 = vcombine.high %v6396_v3, %v6406_v41 }
 0xb4a   : > { %7343 = vrot.lane.b32.xlu1 %v11739_v33, %s13468_s23  ;;  %7339 = vrot.lane.b32.xlu0 %v11771_v10, %s13468_s23 }
 0xb4b   : > { %v6514_v2 = vrot.slane %v6500_v24, %v13465_v20 }
 0xb4e   : > { %7573 = vrot.lane.b32.xlu1 %v11726_v17, %s13539_s22  ;;  %7347 = vrot.lane.b32.xlu0 %v11774_v21, %s13468_s23  ;;  %v6507_v17 = vrot.slane %v6499_v54, %v13465_v20 }
 0xb50   : > { %v6516_v50 = vcombine.high %v6491_v25, %v6507_v17 }
 0xb52   : > { %7581 = vrot.lane.b32.xlu1 %v11739_v33, %s13539_s22  ;;  %7577 = vrot.lane.b32.xlu0 %v11771_v10, %s13539_s22  ;;  %v5830_v10 = vcombine.high %v5812_v1, %v13461_v23  ;;  %v12035_v18 = vrot.slane %v6516_v50, %v13466_v39 }
 0xb56   : > { %6863 = vrot.lane.b32.xlu1 %v11913_v61, %s13539_s22  ;;  %7585 = vrot.lane.b32.xlu0 %v11774_v21, %s13539_s22  ;;  %v7135_v21 = vrot.slane %v7127_v35, %v13465_v20 }
 0xb58   : > { %v7160_v12 = vcombine.high %v7135_v21, %v7151_v57  ;;  %v7159_v55 = vcombine.low %v7135_v21, %v7151_v57 }
 0xb5a   : > { %6871 = vrot.lane.b32.xlu1 %v11924_v58, %s13539_s22  ;;  %6867 = vrot.lane.b32.xlu0 %v6396_v3, %s13539_s22  ;;  %v7174_v7 = vrot.slane %v7160_v12, %v13466_v39  ;;  %v12071_v54 = vrot.slane %v7159_v55, %v13466_v39 }
 0xb5c   : > { %v7191_v21 = vcombine.high %v12071_v54, %v13461_v23  ;;  %v7192_v24 = vcombine.high %v7174_v7, %v13461_v23 }
 0xb5e   : > { %6861 = vrot.lane.b32.xlu1 %v11781_v49, %s13539_s22  ;;  %6875 = vrot.lane.b32.xlu0 %v6406_v41, %s13539_s22 }
 0xb62   : > { %6869 = vrot.lane.b32.xlu1 %v11765_v30, %s13539_s22  ;;  %6865 = vrot.lane.b32.xlu0 %v11799_v14, %s13539_s22 }
 0xb66   : > { %6631 = vrot.lane.b32.xlu1 %v11913_v61, %s13468_s23  ;;  %6873 = vrot.lane.b32.xlu0 %v11804_v38, %s13539_s22  ;;  %v6498_v61 = vrot.slane %v6484_v16, %v13465_v20  ;;  %s8102_s22 = scalar_lea.hbm %s13184_s13, %s8206_s20 }
 0xb6a   : > { %6639 = vrot.lane.b32.xlu1 %v11924_v58, %s13468_s23  ;;  %6635 = vrot.lane.b32.xlu0 %v6396_v3, %s13468_s23  ;;  %v12049_v58 = vrot.slane %v7243_v9, %v13466_v39 }
 0xb6e   : > { %6629 = vrot.lane.b32.xlu1 %v11781_v49, %s13468_s23  ;;  %6643 = vrot.lane.b32.xlu0 %v6406_v41, %s13468_s23  ;;  %v5762_v49 = vcombine.high %v5744_v48, %v13461_v23  ;;  %v6462_v41 = vrot.slane %v6448_v11, %v13466_v39  ;;  %v7183_v11 = vrot.slane %v7175_v44, %v13466_v39 }
 0xb6f   : > { %v6515_v44 = vcombine.low %v6491_v25, %v6507_v17 }
 0xb70   : > { %v6480_v51 = vcombine.high %v6462_v41, %v13461_v23  ;;  %v7193_v0 = vcombine.high %v7183_v11, %v13461_v23 }
 0xb71   : > { %v12087_v46 = vrot.slane %v6515_v44, %v13466_v39 }
 0xb72   : > { %6637 = vrot.lane.b32.xlu1 %v11765_v30, %s13468_s23  ;;  %6633 = vrot.lane.b32.xlu0 %v11799_v14, %s13468_s23  ;;  %v5829_v30 = vcombine.high %v11982_v6, %v13461_v23  ;;  %v5763_v14 = vcombine.high %v5753_v34, %v13461_v23 }
 0xb73   : > { %v6547_v52 = vcombine.high %v12087_v46, %v13461_v23 }
 0xb76   : > { %6641 = vrot.lane.b32.xlu0 %v11804_v38, %s13468_s23  ;;  %5866 = vrot.lane.b32.xlu1 %v5812_v1, %s13536_s27  ;;  %v5831_v38 = vcombine.high %v5821_v27, %v13461_v23 }
 0xb7a   : > { %5838 = vrot.lane.b32.xlu0 %v5744_v48, %s13536_s27  ;;  %5874 = vrot.lane.b32.xlu1 %v5821_v27, %s8336_s16  ;;  %v6531_v27 = vcombine.low %v6498_v61, %v6514_v2 }
 0xb7e   : > { %5846 = vrot.lane.b32.xlu0 %v5753_v34, %s8336_s16  ;;  %5882 = vrot.lane.b32.xlu1 %v11973_v60, %s8337_s17  ;;  %v6532_v34 = vcombine.high %v6498_v61, %v6514_v2  ;;  %v6548_v2 = vcombine.high %v12035_v18, %v13461_v23 }
 0xb80   : > { %v12068_v35 = vrot.slane %v6532_v34, %v13466_v39 }
 0xb82   : > { %5834 = vrot.lane.b32.xlu0 %v5761_v62, %s13464_s21  ;;  %5862 = vrot.lane.b32.xlu1 %v5829_v30, %s13464_s21  ;;  %v6539_v30 = vrot.slane %v6531_v27, %v13466_v39 }
 0xb84   : > { %v12006_v33 = vpop.permute.xlu1 %5913 }
 0xb86   : > { %5842 = vrot.lane.b32.xlu0 %v5762_v49, %s13537_s24  ;;  %5870 = vrot.lane.b32.xlu1 %v5830_v10, %s13537_s24  ;;  %v7258_v10 = vrot.slane %v7244_v26, %v13466_v39  ;;  %v12105_v26 = vrot.slane %v6447_v29, %v13466_v39  ;;  %v6478_v29 = vrot.slane %v6464_v56, %v13466_v39 }
 0xb87   : > { %v7260_v56 = vcombine.high %v12021_v32, %v13461_v23 }
 0xb88   : > { %v12013_v63 = vpop.permute.xlu0 %5917  ;;  %v6479_v25 = vcombine.high %v12105_v26, %v13461_v23  ;;  %v7262_v55 = vcombine.high %v7258_v10, %v13461_v23 }
 0xb8a   : > { %5850 = vrot.lane.b32.xlu0 %v5763_v14, %s13534_s30  ;;  %5878 = vrot.lane.b32.xlu1 %v5831_v38, %s13534_s30 }
 0xb8c   : > { %v12015_v19 = vpop.permute.xlu1 %5921 }
 0xb8e   : > { %7296 = vrot.lane.b32.xlu0 %v12021_v32, %s13536_s27  ;;  %7268 = vrot.lane.b32.xlu1 %v7174_v7, %s13536_s27  ;;  %v5937_v32 = vcombine.low %v12006_v33, %v12015_v19 }
 0xb90   : > { %v12030_v3 = vpop.permute.xlu1 %6151  ;;  %v12032_v53 = vpop.permute.xlu0 %5925 }
 0xb91   : > { %v5953_v7 = vcombine.low %v12013_v63, %v12032_v53 }
 0xb92   : > { %6584 = vrot.lane.b32.xlu0 %v12035_v18, %s13536_s27  ;;  %6556 = vrot.lane.b32.xlu1 %v6462_v41, %s13536_s27  ;;  %v6549_v41 = vcombine.high %v6539_v30, %v13461_v23  ;;  %v7261_v18 = vcombine.high %v12049_v58, %v13461_v23 }
 0xb93   : > { %v5961_v61 = vrot.slane %v5953_v7, %v13465_v20 }
 0xb94   : > { %v12051_v1 = vpop.permute.xlu1 %6159  ;;  %v12053_v48 = vpop.permute.xlu0 %6155 }
 0xb95   : > { %v6175_v44 = vcombine.low %v12030_v3, %v12051_v1 }
 0xb96   : > { %7304 = vrot.lane.b32.xlu0 %v12049_v58, %s8336_s16  ;;  %7276 = vrot.lane.b32.xlu1 %v7183_v11, %s8336_s16  ;;  %v6481_v58 = vcombine.high %v6471_v42, %v13461_v23 }
 0xb98   : > { %v12062_v62 = vpop.permute.xlu1 %5915  ;;  %v12064_v9 = vpop.permute.xlu0 %6163 }
 0xb99   : > { %v6191_v11 = vcombine.low %v12053_v48, %v12064_v9 }
 0xb9a   : > { %6592 = vrot.lane.b32.xlu0 %v6539_v30, %s8336_s16  ;;  %6600 = vrot.lane.b32.xlu1 %v12068_v35, %s8337_s17  ;;  %v5945_v30 = vrot.slane %v5937_v32, %v13465_v20  ;;  %v6550_v32 = vcombine.high %v12068_v35, %v13461_v23 }
 0xb9c   : > { %v12076_v57 = vpop.permute.xlu1 %5923  ;;  %v12078_v49 = vpop.permute.xlu0 %5919 }
 0xb9d   : > { %v6005_v37 = vcombine.low %v12062_v62, %v12076_v57 }
 0xb9e   : > { %7312 = vrot.lane.b32.xlu0 %v7258_v10, %s8337_s17  ;;  %7264 = vrot.lane.b32.xlu1 %v7191_v21, %s13464_s21  ;;  %v5969_v21 = vcombine.low %v5945_v30, %v5961_v61  ;;  %v7194_v10 = vcombine.high %v7190_v13, %v13461_v23 }
 0xba0   : > { %v12091_v17 = vpop.permute.xlu1 %6153  ;;  %v12093_v14 = vpop.permute.xlu0 %5927 }
 0xba2   : > { %6564 = vrot.lane.b32.xlu0 %v6471_v42, %s8336_s16  ;;  %6580 = vrot.lane.b32.xlu1 %v6547_v52, %s13464_s21  ;;  %v6199_v52 = vrot.slane %v6191_v11, %v13465_v20  ;;  %v6192_v11 = vcombine.high %v12053_v48, %v12064_v9  ;;  %v6176_v9 = vcombine.high %v12030_v3, %v12051_v1 }
 0xba4   : > { %v12109_v38 = vpop.permute.xlu1 %6161  ;;  %v12111_v12 = vpop.permute.xlu0 %6157 }
 0xba6   : > { %7284 = vrot.lane.b32.xlu0 %v7190_v13, %s8337_s17  ;;  %6552 = vrot.lane.b32.xlu1 %v6479_v25, %s13464_s21 }
 0xba8   : > { %v12121_v45 = vpop.permute.xlu1 %7337  ;;  %v12123_v4 = vpop.permute.xlu0 %6165 }
 0xbaa   : > { %6572 = vrot.lane.b32.xlu0 %v6478_v29, %s8337_s17  ;;  %7272 = vrot.lane.b32.xlu1 %v7192_v24, %s13537_s24 }
 0xbac   : > { %v12138_v47 = vpop.permute.xlu1 %7345  ;;  %v12140_v8 = vpop.permute.xlu0 %7341 }
 0xbae   : > { %7292 = vrot.lane.b32.xlu0 %v7259_v15, %s13464_s21  ;;  %6560 = vrot.lane.b32.xlu1 %v6480_v51, %s13537_s24  ;;  %v6183_v15 = vrot.slane %v6175_v44, %v13465_v20  ;;  %v5954_v51 = vcombine.high %v12013_v63, %v12032_v53  ;;  %v5938_v63 = vcombine.high %v12006_v33, %v12015_v19 }
 0xbaf   : > { %v6006_v53 = vcombine.high %v12062_v62, %v12076_v57  ;;  %v6260_v19 = vcombine.high %v12111_v12, %v12123_v4  ;;  %v6013_v57 = vrot.slane %v6005_v37, %v13465_v20 }
 0xbb0   : > { %v12147_v28 = vpop.permute.xlu1 %7575  ;;  %v12149_v5 = vpop.permute.xlu0 %7349  ;;  %v6207_v7 = vcombine.low %v6183_v15, %v6199_v52  ;;  %v5952_v48 = vrot.slane %v5938_v63, %v13465_v20 }
 0xbb2   : > { %7300 = vrot.lane.b32.xlu0 %v7260_v56, %s13537_s24  ;;  %7280 = vrot.lane.b32.xlu1 %v7193_v0, %s13534_s30  ;;  %v5970_v56 = vcombine.high %v5945_v30, %v5961_v61  ;;  %v12197_v0 = vrot.slane %v5969_v21, %v13466_v39  ;;  %v5968_v61 = vrot.slane %v5954_v51, %v13465_v20 }
 0xbb3   : > { %v12230_v44 = vrot.slane %v6207_v7, %v13466_v39  ;;  %v6020_v21 = vrot.slane %v6006_v53, %v13465_v20  ;;  %v6274_v51 = vrot.slane %v6260_v19, %v13465_v20 }
 0xbb4   : > { %v12158_v50 = vpop.permute.xlu1 %7583  ;;  %v12160_v16 = vpop.permute.xlu0 %7579  ;;  %13545 = vst [vmem:[#allocation10_spill] sm:$0xff] %v12197_v0  ;;  %v6001_v35 = vcombine.high %v12197_v0, %v13461_v23  ;;  %v5986_v19 = vcombine.high %v5952_v48, %v5968_v61 }
 0xbb5   : > { %13546 = vst [vmem:[#allocation27_spill] sm:$0xff] %v12230_v44  ;;  %v6239_v1 = vcombine.high %v12230_v44, %v13461_v23 }
 0xbb6   : > { %6588 = vrot.lane.b32.xlu0 %v6548_v2, %s13537_s24  ;;  %6596 = vrot.lane.b32.xlu1 %v6549_v41, %s13534_s30  ;;  %v6022_v2 = vcombine.high %v12078_v49, %v12093_v14  ;;  %v6482_v41 = vcombine.high %v6478_v29, %v13461_v23  ;;  %v12218_v29 = vrot.slane %v5970_v56, %v13466_v39 }
 0xbb8   : > { %v12172_v27 = vpop.permute.xlu1 %7335  ;;  %v12174_v34 = vpop.permute.xlu0 %7587  ;;  %v6036_v33 = vrot.slane %v6022_v2, %v13465_v20  ;;  %v6190_v2 = vrot.slane %v6176_v9, %v13465_v20  ;;  %v6021_v9 = vcombine.low %v12078_v49, %v12093_v14  ;;  %v12290_v14 = vrot.slane %v5986_v19, %v13466_v39 }
 0xbba   : > { %7308 = vrot.lane.b32.xlu0 %v7261_v18, %s13534_s30  ;;  %7316 = vrot.lane.b32.xlu1 %v7262_v55, %s8335_s15  ;;  %v6208_v18 = vcombine.high %v6183_v15, %v6199_v52  ;;  %v6244_v52 = vcombine.high %v12091_v17, %v12109_v38  ;;  %v6053_v15 = vcombine.low %v6020_v21, %v6036_v33 }
 0xbbc   : > { %v12185_v25 = vpop.permute.xlu1 %7343  ;;  %v12187_v24 = vpop.permute.xlu0 %7339  ;;  %v12248_v3 = vrot.slane %v6208_v18, %v13466_v39  ;;  %v12265_v18 = vrot.slane %v6053_v15, %v13466_v39 }
 0xbbe   : > { %6568 = vrot.lane.b32.xlu0 %v6481_v58, %s13534_s30  ;;  %7288 = vrot.lane.b32.xlu1 %v7194_v10, %s8335_s15  ;;  %v5985_v58 = vcombine.low %v5952_v48, %v5968_v61  ;;  %v6206_v10 = vrot.slane %v6192_v11, %v13465_v20  ;;  %v6029_v61 = vrot.slane %v6021_v9, %v13465_v20 }
 0xbc0   : > { %v12201_v42 = vpop.permute.xlu1 %7573  ;;  %v12203_v13 = vpop.permute.xlu0 %7347  ;;  %v6224_v49 = vcombine.high %v6190_v2, %v6206_v10 }
 0xbc2   : > { %6576 = vrot.lane.b32.xlu0 %v6482_v41, %s8335_s15  ;;  %6604 = vrot.lane.b32.xlu1 %v6550_v32, %s8335_s15  ;;  %v6258_v41 = vrot.slane %v6244_v52, %v13465_v20  ;;  %v6223_v32 = vcombine.low %v6190_v2, %v6206_v10  ;;  %v6054_v52 = vcombine.high %v6020_v21, %v6036_v33 }
 0xbc3   : > { %v6259_v33 = vcombine.low %v12111_v12, %v12123_v4  ;;  %v6243_v10 = vcombine.low %v12091_v17, %v12109_v38  ;;  %v6238_v12 = vrot.slane %v6224_v49, %v13466_v39  ;;  %v6037_v4 = vcombine.low %v6013_v57, %v6029_v61 }
 0xbc4   : > { %v12225_v55 = vpop.permute.xlu1 %7581  ;;  %v12227_v30 = vpop.permute.xlu0 %7577  ;;  %v6291_v63 = vcombine.low %v6258_v41, %v6274_v51  ;;  %v6292_v48 = vcombine.high %v6258_v41, %v6274_v51  ;;  %v12300_v62 = vrot.slane %v6054_v52, %v13466_v39  ;;  %v6038_v51 = vcombine.high %v6013_v57, %v6029_v61 }
 0xbc5   : > { %v6267_v2 = vrot.slane %v6259_v33, %v13465_v20  ;;  %v6251_v17 = vrot.slane %v6243_v10, %v13465_v20  ;;  %v6242_v49 = vcombine.high %v6238_v12, %v13461_v23  ;;  %v12329_v61 = vrot.slane %v6037_v4, %v13466_v39 }
 0xbc6   : > { %6078 = vrot.lane.b32.xlu0 %v12218_v29, %s13536_s27  ;;  %6074 = vrot.lane.b32.xlu1 %v6001_v35, %s13464_s21  ;;  %v12262_v35 = vrot.slane %v5985_v58, %v13466_v39  ;;  %v12278_v58 = vrot.slane %v6223_v32, %v13466_v39  ;;  %v12281_v15 = vrot.slane %v6291_v63, %v13466_v39 }
 0xbc7   : > { %v12316_v37 = vrot.slane %v6292_v48, %v13466_v39  ;;  %v6276_v38 = vcombine.high %v6251_v17, %v6267_v2  ;;  %v6052_v52 = vrot.slane %v6038_v51, %v13466_v39  ;;  %13547 = vst [vmem:[#allocation39_spill] sm:$0xff] %v12329_v61  ;;  %v6069_v57 = vcombine.high %v12329_v61, %v13461_v23 }
 0xbc8   : > { %v12243_v56 = vpop.permute.xlu1 %6863  ;;  %v12245_v7 = vpop.permute.xlu0 %7585 }
 0xbc9   : > { %v6290_v10 = vrot.slane %v6276_v38, %v13466_v39  ;;  %v6070_v51 = vcombine.high %v6052_v52, %v13461_v23 }
 0xbca   : > { %6316 = vrot.lane.b32.xlu0 %v12248_v3, %s13536_s27  ;;  %6312 = vrot.lane.b32.xlu1 %v6239_v1, %s13464_s21 }
 0xbcb   : > { %v6308_v31 = vcombine.high %v6290_v10, %v13461_v23 }
 0xbcc   : > { %v12257_v53 = vpop.permute.xlu1 %6871  ;;  %v12259_v11 = vpop.permute.xlu0 %6867 }
 0xbce   : > { %6086 = vrot.lane.b32.xlu0 %v12262_v35, %s8336_s16  ;;  %6114 = vrot.lane.b32.xlu1 %v12265_v18, %s8336_s16 }
 0xbd0   : > { %v12273_v1 = vpop.permute.xlu1 %6861  ;;  %v12275_v22 = vpop.permute.xlu0 %6875 }
 0xbd1   : > { %v6970_v0 = vcombine.high %v12259_v11, %v12275_v22 }
 0xbd2   : > { %6324 = vrot.lane.b32.xlu0 %v12278_v58, %s8336_s16  ;;  %6352 = vrot.lane.b32.xlu1 %v12281_v15, %s8336_s16 }
 0xbd4   : > { %v12295_v21 = vpop.permute.xlu1 %6869  ;;  %v12297_v32 = vpop.permute.xlu0 %6865 }
 0xbd5   : > { %v6885_v43 = vcombine.low %v12273_v1, %v12295_v21 }
 0xbd6   : > { %6094 = vrot.lane.b32.xlu0 %v12290_v14, %s8337_s17  ;;  %6122 = vrot.lane.b32.xlu1 %v12300_v62, %s8337_s17 }
 0xbd8   : > { %v12311_v41 = vpop.permute.xlu1 %6631  ;;  %v12313_v63 = vpop.permute.xlu0 %6873 }
 0xbda   : > { %6332 = vrot.lane.b32.xlu0 %v6238_v12, %s8337_s17  ;;  %6360 = vrot.lane.b32.xlu1 %v12316_v37, %s8337_s17 }
 0xbdc   : > { %v12322_v19 = vpop.permute.xlu1 %6639  ;;  %v12324_v9 = vpop.permute.xlu0 %6635 }
 0xbdd   : > { %v6721_v61 = vcombine.low %v12311_v41, %v12322_v19 }
 0xbde   : > { %6106 = vrot.lane.b32.xlu0 %v6052_v52, %s13536_s27  ;;  %6336 = vrot.lane.b32.xlu1 %v6242_v49, %s8335_s15  ;;  %v6002_v49 = vcombine.high %v12218_v29, %v13461_v23 }
 0xbe0   : > { %v12333_v33 = vpop.permute.xlu1 %6629  ;;  %v12335_v48 = vpop.permute.xlu0 %6643 }
 0xbe2   : > { %6102 = vrot.lane.b32.xlu1 %v6069_v57, %s13464_s21  ;;  %6344 = vrot.lane.b32.xlu0 %v6290_v10, %s13536_s27  ;;  %v6240_v57 = vcombine.high %v12248_v3, %v13461_v23  ;;  %v6275_v3 = vcombine.low %v6251_v17, %v6267_v2  ;;  %v7443_v10 = vcombine.low %v12140_v8, %v12149_v5 }
 0xbe3   : > { %v7359_v2 = vcombine.low %v12172_v27, %v12185_v25 }
 0xbe4   : > { %v12342_v12 = vpop.permute.xlu1 %6637  ;;  %v12344_v4 = vpop.permute.xlu0 %6633  ;;  %v12389_v17 = vrot.slane %v7443_v10, %v13465_v20  ;;  %v6004_v10 = vcombine.high %v12290_v14, %v13461_v23 }
 0xbe5   : > { %v6653_v44 = vcombine.low %v12333_v33, %v12342_v12 }
 0xbe6   : > { %6110 = vrot.lane.b32.xlu1 %v6070_v51, %s13537_s24  ;;  %6082 = vrot.lane.b32.xlu0 %v6002_v49, %s13537_s24  ;;  %v6003_v51 = vcombine.high %v12262_v35, %v13461_v23  ;;  %v6071_v49 = vcombine.high %v12265_v18, %v13461_v23  ;;  %v6241_v35 = vcombine.high %v12278_v58, %v13461_v23 }
 0xbe7   : > { %v6309_v18 = vcombine.high %v12281_v15, %v13461_v23  ;;  %v12394_v58 = vrot.slane %v6275_v3, %v13466_v39  ;;  %v7665_v3 = vcombine.low %v12147_v28, %v12158_v50 }
 0xbe8   : > { %v12351_v36 = vpop.permute.xlu1 %5866  ;;  %v12353_v38 = vpop.permute.xlu0 %6641 }
 0xbe9   : > { %13548 = vst [vmem:[#allocation26_spill] sm:$0xff] %v12351_v36  ;;  %13553 = vst [vmem:[#allocation40_spill] sm:$0xff] %v12394_v58  ;;  %v7597_v36 = vcombine.low %v12201_v42, %v12225_v55 }
 0xbea   : > { %6320 = vrot.lane.b32.xlu0 %v6240_v57, %s13537_s24  ;;  %6348 = vrot.lane.b32.xlu1 %v6308_v31, %s13537_s24  ;;  %v7375_v31 = vcombine.low %v12187_v24, %v12203_v13 }
 0xbec   : > { %v12360_v52 = vpop.permute.xlu1 %5874  ;;  %v12362_v29 = vpop.permute.xlu0 %5838  ;;  %v12397_v15 = vrot.slane %v7375_v31, %v13465_v20  ;;  %v12415_v31 = vrot.slane %v7359_v2, %v13465_v20  ;;  %v6307_v2 = vcombine.high %v12394_v58, %v13461_v23  ;;  %v12447_v58 = vrot.slane %v7597_v36, %v13465_v20 }
 0xbed   : > { %13549 = vst [vmem:[#allocation28_spill] sm:$0xff] %v12360_v52  ;;  %13550 = vst [vmem:[#allocation43_spill] sm:$0xff] %v12362_v29  ;;  %v7376_v36 = vcombine.high %v12187_v24, %v12203_v13  ;;  %v7428_v24 = vcombine.high %v12121_v45, %v12138_v47  ;;  %v7360_v13 = vcombine.high %v12172_v27, %v12185_v25 }
 0xbee   : > { %6090 = vrot.lane.b32.xlu0 %v6003_v51, %s13534_s30  ;;  %6118 = vrot.lane.b32.xlu1 %v6071_v49, %s13534_s30  ;;  %v7427_v51 = vcombine.low %v12121_v45, %v12138_v47  ;;  %v7681_v49 = vcombine.low %v12160_v16, %v12174_v34  ;;  %v7682_v45 = vcombine.high %v12160_v16, %v12174_v34 }
 0xbef   : > { %v12499_v47 = vrot.slane %v7376_v36, %v13465_v20  ;;  %v7614_v27 = vcombine.high %v12227_v30, %v12245_v7  ;;  %v12518_v34 = vrot.slane %v7428_v24, %v13465_v20  ;;  %v7598_v36 = vcombine.high %v12201_v42, %v12225_v55 }
 0xbf0   : > { %v12374_v57 = vpop.permute.xlu1 %5882  ;;  %v12376_v29 = vpop.permute.xlu0 %5846  ;;  %v12410_v52 = vrot.slane %v7427_v51, %v13465_v20  ;;  %v6310_v51 = vcombine.high %v12316_v37, %v13461_v23  ;;  %v12444_v37 = vrot.slane %v7665_v3, %v13465_v20  ;;  %v6737_v42 = vcombine.low %v12324_v9, %v12335_v48 }
 0xbf1   : > { %13551 = vst [vmem:[#allocation17_spill] sm:$0xff] %v12374_v57  ;;  %13552 = vst [vmem:[#allocation18_spill] sm:$0xff] %v12376_v29  ;;  %v7613_v29 = vcombine.low %v12227_v30, %v12245_v7  ;;  %v7666_v30 = vcombine.high %v12147_v28, %v12158_v50  ;;  %v12523_v7 = vrot.slane %v7360_v13, %v13465_v20 }
 0xbf2   : > { %6328 = vrot.lane.b32.xlu0 %v6241_v35, %s13534_s30  ;;  %6356 = vrot.lane.b32.xlu1 %v6309_v18, %s13534_s30  ;;  %v6072_v18 = vcombine.high %v12300_v62, %v13461_v23  ;;  %v7460_v14 = vcombine.high %v12410_v52, %v12389_v17  ;;  %v12424_v62 = vrot.slane %v7681_v49, %v13465_v20 }
 0xbf3   : > { %v12433_v6 = vrot.slane %v7613_v29, %v13465_v20  ;;  %v6953_v29 = vcombine.low %v12243_v56, %v12257_v53  ;;  %v7407_v28 = vcombine.low %v12523_v7, %v12499_v47  ;;  %v12539_v50 = vrot.slane %v7614_v27, %v13465_v20 }
 0xbf4   : > { %v12401_v57 = vpop.permute.xlu1 %5862  ;;  %v12403_v35 = vpop.permute.xlu0 %5834  ;;  %v7698_v3 = vcombine.high %v12444_v37, %v12424_v62  ;;  %v6669_v55 = vcombine.low %v12344_v4, %v12353_v38  ;;  %v12559_v27 = vrot.slane %v7598_v36, %v13465_v20 }
 0xbf5   : > { %13554 = vst [vmem:[#allocation22_spill] sm:$0xff] %v12401_v57  ;;  %13555 = vst [vmem:[#allocation30_spill] sm:$0xff] %v12403_v35  ;;  %v7392_v35 = vcombine.high %v12415_v31, %v12397_v15  ;;  %v7630_v40 = vcombine.high %v12447_v58, %v12433_v6  ;;  %v12577_v36 = vrot.slane %v7407_v28, %v13466_v39 }
 0xbf6   : > { %6098 = vrot.lane.b32.xlu0 %v6004_v10, %s8335_s15  ;;  %6126 = vrot.lane.b32.xlu1 %v6072_v18, %s8335_s15  ;;  %v6969_v10 = vcombine.low %v12259_v11, %v12275_v22  ;;  %v6901_v18 = vcombine.low %v12297_v32, %v12313_v63  ;;  %v6886_v28 = vcombine.high %v12273_v1, %v12295_v21 }
 0xbf7   : > { %v12515_v16 = vrot.slane %v7630_v40, %v13466_v39  ;;  %13566 = vst [vmem:[#allocation12_spill] sm:$0xff] %v12577_v36  ;;  %v12598_v22 = vrot.slane %v6721_v61, %v13465_v20  ;;  %v12601_v11 = vrot.slane %v6653_v44, %v13465_v20 }
 0xbf8   : > { %v12439_v49 = vpop.permute.xlu1 %5870  ;;  %v12441_v57 = vpop.permute.xlu0 %5842  ;;  %v12467_v60 = vrot.slane %v6969_v10, %v13465_v20  ;;  %v12487_v10 = vrot.slane %v6885_v43, %v13465_v20 }
 0xbf9   : > { %13556 = vst [vmem:[#allocation20_spill] sm:$0xff] %v12439_v49  ;;  %13557 = vst [vmem:[#allocation47_spill] sm:$0xff] %v12441_v57  ;;  %v7444_v49 = vcombine.high %v12140_v8, %v12149_v5  ;;  %v12462_v57 = vrot.slane %v7460_v14, %v13466_v39  ;;  %v12477_v5 = vrot.slane %v7392_v35, %v13466_v39 }
 0xbfa   : > { %6364 = vrot.lane.b32.xlu1 %v6310_v51, %s8335_s15  ;;  %6340 = vrot.lane.b32.xlu0 %v6307_v2, %s13464_s21  ;;  %v12470_v51 = vrot.slane %v6901_v18, %v13465_v20  ;;  %v12484_v14 = vrot.slane %v6953_v29, %v13465_v20  ;;  %13562 = vst [vmem:[#allocation49_spill] sm:$0xff] %v12515_v16 }
 0xbfb   : > { %13560 = vst [vmem:[#allocation33_spill] sm:$0xff] %v12477_v5  ;;  %v12494_v35 = vrot.slane %v7444_v49, %v13465_v20  ;;  %v12512_v49 = vrot.slane %v7698_v3, %v13466_v39  ;;  %v12534_v3 = vrot.slane %v7682_v45, %v13465_v20 }
 0xbfc   : > { %v12472_v2 = vpop.permute.xlu1 %5878  ;;  %v12474_v8 = vpop.permute.xlu0 %5850  ;;  %v6986_v43 = vcombine.high %v12484_v14, %v12467_v60  ;;  %v6918_v25 = vcombine.high %v12487_v10, %v12470_v51 }
 0xbfd   : > { %13558 = vst [vmem:[#allocation48_spill] sm:$0xff] %v12472_v2  ;;  %13559 = vst [vmem:[#allocation11_spill] sm:$0xff] %v12474_v8  ;;  %v7475_v40 = vcombine.low %v12518_v34, %v12494_v35  ;;  %v12556_v2 = vrot.slane %v7666_v30, %v13465_v20 }
 0xbfe   : > { %7528 = vrot.lane.b32.xlu0 %v12462_v57, %s13536_s27  ;;  %7500 = vrot.lane.b32.xlu1 %v12477_v5, %s13536_s27  ;;  %13561 = vst [vmem:[#allocation37_spill] sm:$0xff] %v12512_v49  ;;  %v12550_v8 = vrot.slane %v6986_v43, %v13466_v39  ;;  %v12553_v45 = vrot.slane %v6918_v25, %v13466_v39 }
 0xbff   : > { %v7713_v43 = vcombine.low %v12556_v2, %v12534_v3  ;;  %v7645_v25 = vcombine.low %v12559_v27, %v12539_v50  ;;  %v12574_v30 = vrot.slane %v7475_v40, %v13466_v39  ;;  %v6954_v40 = vcombine.high %v12243_v56, %v12257_v53 }
 0xc00   : > { %v12507_v18 = vpop.permute.xlu1 %7268  ;;  %v12509_v29 = vpop.permute.xlu0 %7296  ;;  %13563 = vst [vmem:[#allocation21_spill] sm:$0xff] %v12550_v8  ;;  %13564 = vst [vmem:[#allocation31_spill] sm:$0xff] %v12553_v45  ;;  %v12614_v53 = vrot.slane %v6970_v0, %v13465_v20 }
 0xc01   : > { %13565 = vst [vmem:[#allocation42_spill] sm:$0xff] %v12574_v30  ;;  %v12611_v56 = vrot.slane %v7645_v25, %v13466_v39 }
 0xc02   : > { %7766 = vrot.lane.b32.xlu0 %v12512_v49, %s13536_s27  ;;  %7738 = vrot.lane.b32.xlu1 %v12515_v16, %s13536_s27  ;;  %v12587_v49 = vrot.slane %v6669_v55, %v13465_v20  ;;  %v12629_v55 = vrot.slane %v6886_v28, %v13465_v20  ;;  %v7476_v28 = vcombine.high %v12518_v34, %v12494_v35 }
 0xc03   : > { %13568 = vst [vmem:[#allocation14_spill] sm:$0xff] %v12611_v56 }
 0xc04   : > { %v12545_v24 = vpop.permute.xlu1 %6556  ;;  %v12547_v13 = vpop.permute.xlu0 %6584  ;;  %v6686_v21 = vcombine.high %v12601_v11, %v12587_v49 }
 0xc06   : > { %7054 = vrot.lane.b32.xlu0 %v12550_v8, %s13536_s27  ;;  %7026 = vrot.lane.b32.xlu1 %v12553_v45, %s13536_s27  ;;  %v6902_v8 = vcombine.high %v12297_v32, %v12313_v63  ;;  %v12584_v45 = vrot.slane %v6737_v42, %v13465_v20  ;;  %v12608_v32 = vrot.slane %v7713_v43, %v13466_v39 }
 0xc07   : > { %v6968_v42 = vrot.slane %v6954_v40, %v13465_v20  ;;  %v12644_v40 = vrot.slane %v6686_v21, %v13466_v39 }
 0xc08   : > { %v12589_v16 = vpop.permute.xlu1 %7276  ;;  %v12591_v5 = vpop.permute.xlu0 %7304  ;;  %13567 = vst [vmem:[#allocation36_spill] sm:$0xff] %v12608_v32  ;;  %v12617_v1 = vrot.slane %v6902_v8, %v13465_v20  ;;  %v6754_v44 = vcombine.high %v12598_v22, %v12584_v45 }
 0xc09   : > { %v7001_v0 = vcombine.low %v6968_v42, %v12614_v53  ;;  %13570 = vst [vmem:[#allocation23_spill] sm:$0xff] %v12644_v40 }
 0xc0a   : > { %7536 = vrot.lane.b32.xlu0 %v12574_v30, %s8336_s16  ;;  %7508 = vrot.lane.b32.xlu1 %v12577_v36, %s8336_s16  ;;  %v6933_v8 = vcombine.low %v12629_v55, %v12617_v1  ;;  %v12641_v30 = vrot.slane %v6754_v44, %v13466_v39 }
 0xc0b   : > { %v12659_v21 = vrot.slane %v7001_v0, %v13466_v39 }
 0xc0c   : > { %v12623_v63 = vpop.permute.xlu1 %6600  ;;  %v12625_v61 = vpop.permute.xlu0 %6592  ;;  %13569 = vst [vmem:[#allocation46_spill] sm:$0xff] %v12641_v30 }
 0xc0e   : > { %7774 = vrot.lane.b32.xlu0 %v12608_v32, %s8336_s16  ;;  %7746 = vrot.lane.b32.xlu1 %v12611_v56, %s8336_s16  ;;  %v7408_v32 = vcombine.high %v12523_v7, %v12499_v47  ;;  %v6738_v56 = vcombine.high %v12324_v9, %v12335_v48  ;;  %v7714_v9 = vcombine.high %v12556_v2, %v12534_v3 }
 0xc0f   : > { %v7646_v48 = vcombine.high %v12559_v27, %v12539_v50  ;;  %v12678_v7 = vrot.slane %v7476_v28, %v13466_v39  ;;  %v7459_v2 = vcombine.low %v12410_v52, %v12389_v17  ;;  %v7391_v52 = vcombine.low %v12415_v31, %v12397_v15 }
 0xc10   : > { %v7265_v43 = vpop.permute.xlu1 %7264  ;;  %v12638_v25 = vpop.permute.xlu0 %7312  ;;  %v6752_v35 = vrot.slane %v6738_v56, %v13465_v20  ;;  %v12691_v3 = vrot.slane %v7714_v9, %v13466_v39 }
 0xc12   : > { %6822 = vrot.lane.b32.xlu0 %v12641_v30, %s13536_s27  ;;  %6794 = vrot.lane.b32.xlu1 %v12644_v40, %s13536_s27  ;;  %v12662_v30 = vrot.slane %v6933_v8, %v13466_v39  ;;  %v6722_v40 = vcombine.high %v12311_v41, %v12322_v19  ;;  %v12681_v41 = vrot.slane %v7408_v32, %v13466_v39 }
 0xc13   : > { %v6670_v32 = vcombine.high %v12344_v4, %v12353_v38  ;;  %v12698_v8 = vrot.slane %v7646_v48, %v13466_v39  ;;  %v12709_v4 = vrot.slane %v7459_v2, %v13466_v39  ;;  %v7002_v38 = vcombine.high %v6968_v42, %v12614_v53 }
 0xc14   : > { %v6581_v44 = vpop.permute.xlu1 %6580  ;;  %v12656_v36 = vpop.permute.xlu0 %6564  ;;  %v6736_v19 = vrot.slane %v6722_v40, %v13465_v20  ;;  %v6654_v40 = vcombine.high %v12333_v33, %v12342_v12  ;;  %v7629_v48 = vcombine.low %v12447_v58, %v12433_v6  ;;  %v12735_v6 = vrot.slane %v7391_v52, %v13466_v39 }
 0xc15   : > { %v12713_v17 = vrot.slane %v6670_v32, %v13465_v20 }
 0xc16   : > { %7062 = vrot.lane.b32.xlu0 %v12659_v21, %s8336_s16  ;;  %7034 = vrot.lane.b32.xlu1 %v12662_v30, %s8336_s16  ;;  %v6769_v50 = vcombine.low %v6736_v19, %v6752_v35  ;;  %v6770_v27 = vcombine.high %v6736_v19, %v6752_v35  ;;  %v6668_v15 = vrot.slane %v6654_v40, %v13465_v20 }
 0xc17   : > { %v12730_v35 = vrot.slane %v7002_v38, %v13466_v39  ;;  %v7491_v19 = vcombine.high %v12709_v4, %v13461_v23  ;;  %v7319_v20 = vsel %vm948_vm6, %v12071_v54, %v7265_v43  ;;  %v12745_v2 = vrot.slane %v7629_v48, %v13466_v39 }
 0xc18   : > { %v6553_v47 = vpop.permute.xlu1 %6552  ;;  %v12675_v34 = vpop.permute.xlu0 %7284  ;;  %v12716_v33 = vrot.slane %v6769_v50, %v13466_v39  ;;  %v12719_v12 = vrot.slane %v6770_v27, %v13466_v39  ;;  %v6701_v31 = vcombine.low %v6668_v15, %v12713_v17  ;;  %v6985_v50 = vcombine.low %v12484_v14, %v12467_v60 }
 0xc19   : > { %v6934_v27 = vcombine.high %v12629_v55, %v12617_v1  ;;  %v6614_v54 = vsel %vm948_vm6, %v12087_v46, %v6581_v44  ;;  %v7423_v60 = vcombine.high %v12735_v6, %v13461_v23  ;;  %v6607_v14 = vsel %vm948_vm6, %v12105_v26, %v6553_v47 }
 0xc1a   : > { %7544 = vrot.lane.b32.xlu0 %v12678_v7, %s8337_s17  ;;  %7516 = vrot.lane.b32.xlu1 %v12681_v41, %s8337_s17  ;;  %v12758_v52 = vrot.slane %v6701_v31, %v13466_v39  ;;  %v7661_v55 = vcombine.high %v12745_v2, %v13461_v23  ;;  %v6917_v26 = vcombine.low %v12487_v10, %v12470_v51 }
 0xc1b   : > { %v12779_v47 = vrot.slane %v6934_v27, %v13466_v39 }
 0xc1c   : > { %v7273_v56 = vpop.permute.xlu1 %7272  ;;  %v12695_v0 = vpop.permute.xlu0 %6572 }
 0xc1e   : > { %7782 = vrot.lane.b32.xlu0 %v12691_v3, %s8337_s17  ;;  %7754 = vrot.lane.b32.xlu1 %v12698_v8, %s8337_s17 }
 0xc20   : > { %v6561_v28 = vpop.permute.xlu1 %6560  ;;  %v7293_v9 = vpop.permute.xlu0 %7292 }
 0xc21   : > { %v7326_v58 = vsel %vm948_vm6, %v12134_v59, %v7293_v9  ;;  %v7320_v59 = vsel %vm950_vm7, %v7319_v20, %v12507_v18  ;;  %v7697_v18 = vcombine.low %v12444_v37, %v12424_v62  ;;  %v12782_v62 = vrot.slane %v6985_v50, %v13466_v39 }
 0xc22   : > { %6830 = vrot.lane.b32.xlu0 %v12716_v33, %s8336_s16  ;;  %6838 = vrot.lane.b32.xlu1 %v12719_v12, %s8337_s17  ;;  %v7327_v43 = vsel %vm950_vm7, %v7326_v58, %v12509_v29  ;;  %v7321_v1 = vsel %vm952_vm8, %v7320_v59, %v7273_v56  ;;  %v6615_v29 = vsel %vm950_vm7, %v6614_v54, %v12547_v13 }
 0xc23   : > { %v6702_v37 = vcombine.high %v6668_v15, %v12713_v17  ;;  %v6608_v13 = vsel %vm950_vm7, %v6607_v14, %v12545_v24  ;;  %v7322_v56 = vsel %vm954_vm9, %v7321_v1, %v12589_v16  ;;  %v7017_v16 = vcombine.high %v12782_v62, %v13461_v23 }
 0xc24   : > { %v7281_v53 = vpop.permute.xlu1 %7280  ;;  %v7301_v42 = vpop.permute.xlu0 %7300  ;;  %v6609_v9 = vsel %vm952_vm8, %v6608_v13, %v6561_v28  ;;  %v12805_v28 = vrot.slane %v7697_v18, %v13466_v39  ;;  %v7492_v18 = vcombine.high %v12462_v57, %v13461_v23 }
 0xc25   : > { %v7328_v46 = vsel %vm952_vm8, %v7327_v43, %v7301_v42  ;;  %v7323_v48 = vsel %vm956_vm10, %v7322_v56, %v7281_v53  ;;  %v12812_v42 = vrot.slane %v6702_v37, %v13466_v39 }
 0xc26   : > { %7070 = vrot.lane.b32.xlu0 %v12730_v35, %s8337_s17  ;;  %7524 = vrot.lane.b32.xlu1 %v7491_v19, %s13464_s21  ;;  %v7329_v51 = vsel %vm954_vm9, %v7328_v46, %v12591_v5  ;;  %v12815_v19 = vrot.slane %v6917_v26, %v13466_v39  ;;  %v7729_v59 = vcombine.high %v12805_v28, %v13461_v23 }
 0xc28   : > { %v6597_v32 = vpop.permute.xlu1 %6596  ;;  %v6589_v40 = vpop.permute.xlu0 %6588  ;;  %v6949_v43 = vcombine.high %v12815_v19, %v13461_v23 }
 0xc29   : > { %v6616_v44 = vsel %vm952_vm8, %v6615_v29, %v6589_v40  ;;  %v13571_v29 = vld [vmem:[#allocation33_spill] sm:$0xff] }
 0xc2a   : > { %6802 = vrot.lane.b32.xlu0 %v12758_v52, %s8336_s16  ;;  %7496 = vrot.lane.b32.xlu1 %v7423_v60, %s13464_s21  ;;  %v6617_v17 = vsel %vm954_vm9, %v6616_v44, %v12625_v61  ;;  %v7324_v61 = vsel %vm958_vm11, %v7323_v48, %v12675_v34  ;;  %v13574_v48 = vld [vmem:[#allocation31_spill] sm:$0xff] }
 0xc2b   : > { %v6618_v50 = vsel %vm956_vm10, %v6617_v17, %v6597_v32  ;;  %v13575_v17 = vld [vmem:[#allocation21_spill] sm:$0xff] }
 0xc2c   : > { %v7317_v38 = vpop.permute.xlu1 %7316  ;;  %v7309_v10 = vpop.permute.xlu0 %7308  ;;  %v6619_v34 = vsel %vm958_vm11, %v6618_v50, %v12623_v63  ;;  %v6753_v63 = vcombine.low %v12598_v22, %v12584_v45  ;;  %v13572_v22 = vld [vmem:[#allocation49_spill] sm:$0xff]  ;;  %v13578_v50 = vld [vmem:[#allocation14_spill] sm:$0xff] }
 0xc2d   : > { %v7330_v31 = vsel %vm956_vm10, %v7329_v51, %v7309_v10 }
 0xc2e   : > { %v7331_v24 = vsel %vm958_vm11, %v7330_v31, %v12638_v25  ;;  %7042 = vrot.lane.b32.xlu0 %v12779_v47, %s8337_s17  ;;  %7734 = vrot.lane.b32.xlu1 %v7661_v55, %s13464_s21  ;;  %v6610_v25 = vsel %vm954_vm9, %v6609_v9, %v12656_v36  ;;  %v7424_v55 = vcombine.high %v13571_v29, %v13461_v23 }
 0xc2f   : > { %v7332_v5 = vsel %vm960_vm12, %v7331_v24, %v7317_v38  ;;  %v12855_v57 = vrot.slane %v6753_v63, %v13466_v39  ;;  %v6950_v31 = vcombine.high %v13574_v48, %v13461_v23  ;;  %v7018_v24 = vcombine.high %v13575_v17, %v13461_v23  ;;  %v13583_v48 = vld [vmem:[#allocation27_spill] sm:$0xff] }
 0xc30   : > { %7334 = vst [vmem:[#allocation3 + $0x20] sm:$0xf] %v7332_v5  ;;  %v7289_v15 = vpop.permute.xlu1 %7288  ;;  %v6569_v53 = vpop.permute.xlu0 %6568  ;;  %v7664_v17 = vcombine.high %v12698_v8, %v13461_v23  ;;  %v6788_v8 = vcombine.high %v12719_v12, %v13461_v23 }
 0xc31   : > { %v7325_v20 = vsel %vm960_vm12, %v7324_v61, %v7289_v15  ;;  %v6611_v58 = vsel %vm956_vm10, %v6610_v25, %v6569_v53  ;;  %v6785_v51 = vcombine.high %v12855_v57, %v13461_v23  ;;  %v13576_v15 = vld [vmem:[#allocation12_spill] sm:$0xff]  ;;  %v13577_v25 = vld [vmem:[#allocation42_spill] sm:$0xff] }
 0xc32   : > { %7333 = vst [vmem:[#allocation3 + $0x8] sm:$0xf] %v7325_v20  ;;  %6810 = vrot.lane.b32.xlu0 %v12812_v42, %s8337_s17  ;;  %7050 = vrot.lane.b32.xlu1 %v7017_v16, %s13464_s21  ;;  %v6612_v27 = vsel %vm958_vm11, %v6611_v58, %v12695_v0  ;;  %v6685_v0 = vcombine.low %v12601_v11, %v12587_v49  ;;  %v13573_v11 = vld [vmem:[#allocation37_spill] sm:$0xff] }
 0xc33   : > { %v7662_v49 = vcombine.high %v13572_v22, %v13461_v23  ;;  %v7730_v44 = vcombine.high %v13573_v11, %v13461_v23  ;;  %v7425_v61 = vcombine.high %v13576_v15, %v13461_v23  ;;  %v7493_v53 = vcombine.high %v13577_v25, %v13461_v23 }
 0xc34   : > { %v6605_v36 = vpop.permute.xlu1 %6604  ;;  %v6577_v54 = vpop.permute.xlu0 %6576  ;;  %v12852_v37 = vrot.slane %v6685_v0, %v13466_v39  ;;  %v6951_v0 = vcombine.high %v12662_v30, %v13461_v23  ;;  %v7426_v22 = vcombine.high %v12681_v41, %v13461_v23 }
 0xc35   : > { %v6620_v32 = vsel %vm960_vm12, %v6619_v34, %v6605_v36  ;;  %v6613_v40 = vsel %vm960_vm12, %v6612_v27, %v6577_v54  ;;  %v7663_v36 = vcombine.high %v13578_v50, %v13461_v23  ;;  %v13579_v34 = vld [vmem:[#allocation36_spill] sm:$0xff] }
 0xc36   : > { %v6624_v60 = vrot.slane %v6620_v32, 4  ;;  %v6623_v14 = vrot.slane %v6613_v40, 4  ;;  %7762 = vrot.lane.b32.xlu0 %v7729_v59, %s13464_s21  ;;  %7022 = vrot.lane.b32.xlu1 %v6949_v43, %s13464_s21  ;;  %v6717_v38 = vcombine.high %v12852_v37, %v13461_v23  ;;  %v7731_v27 = vcombine.high %v13579_v34, %v13461_v23  ;;  %v13580_v43 = vld [vmem:[#allocation23_spill] sm:$0xff]  ;;  %v13581_v40 = vld [vmem:[#allocation46_spill] sm:$0xff] }
 0xc37   : > { %v6718_v32 = vcombine.high %v13580_v43, %v13461_v23  ;;  %v6719_v34 = vcombine.high %v12758_v52, %v13461_v23 }
 0xc38   : > { %6628 = vst [vmem:[#allocation3 + $0x10] sm:$0xf0] %v6624_v60  ;;  %6627 = vst [vmem:[#allocation3 + $0x18] sm:$0xf0] %v6623_v14  ;;  %v6075_v1 = vpop.permute.xlu1 %6074  ;;  %v12839_v46 = vpop.permute.xlu0 %6078  ;;  %v6786_v60 = vcombine.high %v13581_v40, %v13461_v23  ;;  %v6720_v40 = vcombine.high %v12812_v42, %v13461_v23 }
 0xc3a   : > { %7532 = vrot.lane.b32.xlu0 %v7492_v18, %s13537_s24  ;;  %7504 = vrot.lane.b32.xlu1 %v7424_v55, %s13537_s24  ;;  %v7019_v18 = vcombine.high %v12659_v21, %v13461_v23  ;;  %v6787_v21 = vcombine.high %v12716_v33, %v13461_v23 }
 0xc3c   : > { %v6313_v26 = vpop.permute.xlu1 %6312  ;;  %v6317_v45 = vpop.permute.xlu0 %6316 }
 0xc3d   : > { %v6367_v41 = vsel %vm948_vm6, %v13583_v48, %v6313_v26  ;;  %v7020_v26 = vcombine.high %v12730_v35, %v13461_v23 }
 0xc3e   : > { %7742 = vrot.lane.b32.xlu1 %v7662_v49, %s13537_s24  ;;  %7770 = vrot.lane.b32.xlu0 %v7730_v44, %s13537_s24  ;;  %v7494_v49 = vcombine.high %v12678_v7, %v13461_v23  ;;  %v7732_v44 = vcombine.high %v12691_v3, %v13461_v23  ;;  %v6368_v3 = vsel %vm950_vm7, %v6367_v41, %v6317_v45 }
 0xc40   : > { %v12859_v13 = vpop.permute.xlu1 %6114  ;;  %v12861_v56 = vpop.permute.xlu0 %6086 }
 0xc42   : > { %6790 = vrot.lane.b32.xlu1 %v6717_v38, %s13464_s21  ;;  %6818 = vrot.lane.b32.xlu0 %v6785_v51, %s13464_s21  ;;  %v13582_v38 = vld [vmem:[#allocation10_spill] sm:$0xff] }
 0xc43   : > { %v6129_v51 = vsel %vm948_vm6, %v13582_v38, %v6075_v1  ;;  %v8188_v38 = vld [vmem:[%s13179_s8 + $0x4] sm:$0xf] }
 0xc44   : > { %v12869_v10 = vpop.permute.xlu1 %6352  ;;  %v6325_v9 = vpop.permute.xlu0 %6324  ;;  %v6130_v33 = vsel %vm950_vm7, %v6129_v51, %v12839_v46 }
 0xc46   : > { %7030 = vrot.lane.b32.xlu1 %v6950_v31, %s13537_s24  ;;  %7058 = vrot.lane.b32.xlu0 %v7018_v24, %s13537_s24  ;;  %v13584_v31 = vld [vmem:[#allocation39_spill] sm:$0xff] }
 0xc48   : > { %v12877_v5 = vpop.permute.xlu1 %6122  ;;  %v12879_v16 = vpop.permute.xlu0 %6094 }
 0xc4a   : > { %7512 = vrot.lane.b32.xlu1 %v7425_v61, %s13534_s30  ;;  %7540 = vrot.lane.b32.xlu0 %v7493_v53, %s13534_s30 }
 0xc4c   : > { %v12887_v20 = vpop.permute.xlu1 %6360  ;;  %v6333_v58 = vpop.permute.xlu0 %6332 }
 0xc4e   : > { %7750 = vrot.lane.b32.xlu1 %v7663_v36, %s13534_s30  ;;  %7778 = vrot.lane.b32.xlu0 %v7731_v27, %s13534_s30 }
 0xc50   : > { %v6337_v54 = vpop.permute.xlu1 %6336  ;;  %v6107_v59 = vpop.permute.xlu0 %6106 }
 0xc52   : > { %6798 = vrot.lane.b32.xlu1 %v6718_v32, %s13537_s24  ;;  %6826 = vrot.lane.b32.xlu0 %v6786_v60, %s13537_s24 }
 0xc54   : > { %v6103_v14 = vpop.permute.xlu1 %6102  ;;  %v12901_v63 = vpop.permute.xlu0 %6344 }
 0xc55   : > { %v6136_v7 = vsel %vm948_vm6, %v13584_v31, %v6103_v14 }
 0xc56   : > { %7038 = vrot.lane.b32.xlu1 %v6951_v0, %s13534_s30  ;;  %7066 = vrot.lane.b32.xlu0 %v7019_v18, %s13534_s30  ;;  %v6137_v1 = vsel %vm950_vm7, %v6136_v7, %v6107_v59  ;;  %v13585_v18 = vld [vmem:[#allocation38_spill] sm:$0xff]  ;;  %v7996_v7 = vld [vmem:[%s13183_s12] sm:$0xf] }
 0xc57   : > { %v5832_v42 = vcombine.high %v13585_v18, %v13461_v23 }
 0xc58   : > { %v6111_v29 = vpop.permute.xlu1 %6110  ;;  %v6083_v55 = vpop.permute.xlu0 %6082 }
 0xc59   : > { %v6138_v61 = vsel %vm952_vm8, %v6137_v1, %v6111_v29  ;;  %v6131_v25 = vsel %vm952_vm8, %v6130_v33, %v6083_v55  ;;  %v13586_v29 = vld [vmem:[#allocation15_spill] sm:$0xff] }
 0xc5a   : > { %7520 = vrot.lane.b32.xlu1 %v7426_v22, %s8335_s15  ;;  %7548 = vrot.lane.b32.xlu0 %v7494_v49, %s8335_s15  ;;  %v6139_v46 = vsel %vm954_vm9, %v6138_v61, %v12859_v13  ;;  %v6132_v45 = vsel %vm954_vm9, %v6131_v25, %v12861_v56  ;;  %v13589_v49 = vld [vmem:[#allocation40_spill] sm:$0xff] }
 0xc5c   : > { %v6349_v30 = vpop.permute.xlu1 %6348  ;;  %v6321_v11 = vpop.permute.xlu0 %6320 }
 0xc5d   : > { %v6369_v53 = vsel %vm952_vm8, %v6368_v3, %v6321_v11 }
 0xc5e   : > { %6834 = vrot.lane.b32.xlu1 %v6787_v21, %s13534_s30  ;;  %7786 = vrot.lane.b32.xlu0 %v7732_v44, %s8335_s15  ;;  %v6370_v50 = vsel %vm954_vm9, %v6369_v53, %v6325_v9 }
 0xc60   : > { %v6119_v24 = vpop.permute.xlu1 %6118  ;;  %v6091_v15 = vpop.permute.xlu0 %6090 }
 0xc61   : > { %v6140_v27 = vsel %vm956_vm10, %v6139_v46, %v6119_v24  ;;  %v6133_v59 = vsel %vm956_vm10, %v6132_v45, %v6091_v15 }
 0xc62   : > { %7074 = vrot.lane.b32.xlu1 %v7020_v26, %s8335_s15  ;;  %7758 = vrot.lane.b32.xlu0 %v7664_v17, %s8335_s15  ;;  %v6141_v9 = vsel %vm958_vm11, %v6140_v27, %v12877_v5  ;;  %v6134_v52 = vsel %vm958_vm11, %v6133_v59, %v12879_v16 }
 0xc64   : > { %v6357_v35 = vpop.permute.xlu1 %6356  ;;  %v6329_v36 = vpop.permute.xlu0 %6328 }
 0xc65   : > { %v6371_v43 = vsel %vm956_vm10, %v6370_v50, %v6329_v36 }
 0xc66   : > { %v6372_v12 = vsel %vm958_vm11, %v6371_v43, %v6333_v58  ;;  %6842 = vrot.lane.b32.xlu1 %v6788_v8, %s8335_s15  ;;  %6806 = vrot.lane.b32.xlu0 %v6719_v34, %s13534_s30  ;;  %v6952_v58 = vcombine.high %v12779_v47, %v13461_v23  ;;  %v13587_v47 = vld [vmem:[#allocation34_spill] sm:$0xff] }
 0xc67   : > { %v6373_v13 = vsel %vm960_vm12, %v6372_v12, %v6337_v54  ;;  %v13588_v55 = vcombine.high %v13586_v29, %v13587_v47 }
 0xc68   : > { %6381 = vst [vmem:[#allocation3 + $0x18] sm:$0xf] %v6373_v13  ;;  %v6127_v56 = vpop.permute.xlu1 %6126  ;;  %v6099_v32 = vpop.permute.xlu0 %6098 }
 0xc69   : > { %v6142_v60 = vsel %vm960_vm12, %v6141_v9, %v6127_v56  ;;  %v6135_v14 = vsel %vm960_vm12, %v6134_v52, %v6099_v32  ;;  %v5760_v22 = vrot.slane %v13588_v55, %v13466_v39 }
 0xc6a   : > { %v6146_v54 = vrot.slane %v6142_v60, 4  ;;  %v6145_v0 = vrot.slane %v6135_v14, 4  ;;  %6814 = vrot.lane.b32.xlu1 %v6720_v40, %s8335_s15  ;;  %7046 = vrot.lane.b32.xlu0 %v6952_v58, %s8335_s15 }
 0xc6b   : > { %v5764_v41 = vcombine.high %v5760_v22, %v13461_v23 }
 0xc6c   : > { %6150 = vst [vmem:[#allocation3] sm:$0xf0] %v6146_v54  ;;  %6149 = vst [vmem:[#allocation3 + $0x30] sm:$0xf0] %v6145_v0  ;;  %v6365_v5 = vpop.permute.xlu1 %6364  ;;  %v6341_v16 = vpop.permute.xlu0 %6340 }
 0xc6d   : > { %v6374_v11 = vsel %vm948_vm6, %v13589_v49, %v6341_v16 }
 0xc6e   : > { %v6375_v21 = vsel %vm950_vm7, %v6374_v11, %v12901_v63  ;;  %5886 = vrot.lane.b32.xlu1 %v5832_v42, %s8335_s15  ;;  %5854 = vrot.lane.b32.xlu0 %v5760_v22, %s8337_s17  ;;  %s431_s17 = sand.u32 1, %s8324_s26  }
 0xc6f   : > { %v6376_v44 = vsel %vm952_vm8, %v6375_v21, %v6349_v30  ;;  %s8167_s23 = sshll.u32 %s431_s17, 3  ;;  %s8090_s16 = scalar_lea.sflag [#allocation5], %s431_s17 }
 0xc70   : > { %v6377_v51 = vsel %vm954_vm9, %v6376_v44, %v12869_v10  ;;  %v7501_v39 = vpop.permute.xlu1 %7500  ;;  %v7529_v48 = vpop.permute.xlu0 %7528  ;;  %v8196_v10 = vld [vmem:[%s13181_s10 + $0x4] sm:$0xf]  ;;  %s433_s30 = scalar_lea.vmem [#allocation4], %s8167_s23 }
 0xc71   : > { %v6378_v31 = vsel %vm956_vm10, %v6377_v51, %v6357_v35 }
 0xc72   : > { %v6379_v63 = vsel %vm958_vm11, %v6378_v31, %v12887_v20  ;;  %7817 = vperm.xlu1 %8262, %v8188_v38   ;;  %5858 = vrot.lane.b32.xlu0 %v5764_v41, %s8335_s15  ;;  %s8104_s15 = sshll.u32 %s433_s30, 4  ;;  %s8105_s15 = int_to_ptr.vmem [resolvable:$true] %s8104_s15 }
 0xc73   : > { %v6380_v30 = vsel %vm960_vm12, %v6379_v63, %v6365_v5  ;;  %s8272_s21 = scalar_lea.vmem %s8105_s15, 128  ;;  %p8279_p0 = scmp.lt.s32.totalorder %s8105_s15, %s8277_s1 }
 0xc74   : > { %6382 = vst [vmem:[#allocation3 + $0x10] sm:$0xf] %v6380_v30  ;;  %v7739_v17 = vpop.permute.xlu1 %7738  ;;  %v7767_v33 = vpop.permute.xlu0 %7766  ;;  %p8273_p11 = scmp.ne.s32.totalorder %s8105_s15, %s8272_s21  ;;  %p8280_p1 = scmp.lt.s32.totalorder %s8278_s29, %s8272_s21 }
 0xc76   : > { %7999 = vperm.xlu1 %8262, %v7996_v7   ;;  %7990 = vperm.xlu0 %8263, %v8196_v10   ;;  %p8274_p12 = pnand %p8273_p11, %p8459_p5  ;;  %p8281_p2 = por %p8280_p1, %p8279_p0 }
 0xc78   : > { %v7027_v3 = vpop.permute.xlu1 %7026  ;;  %v7055_v20 = vpop.permute.xlu0 %7054  ;;  %p8275_p13 = pneg %p8274_p12 }
 0xc7a   : > { %p8282_p3 = pnand %p8281_p2, %p8275_p13 }
 0xc7c   : > { %v7509_v1 = vpop.permute.xlu1 %7508  ;;  %v7537_v24 = vpop.permute.xlu0 %7536 }
 0xc80   : > { %v7747_v15 = vpop.permute.xlu1 %7746  ;;  %v7775_v26 = vpop.permute.xlu0 %7774 }
 0xc84   : > { %v12998_v61 = vpop.permute.xlu1 %6794  ;;  %v6823_v25 = vpop.permute.xlu0 %6822 }
 0xc88   : > { %v7035_v53 = vpop.permute.xlu1 %7034  ;;  %v7063_v8 = vpop.permute.xlu0 %7062 }
 0xc8c   : > { %v13000_v46 = vpop.permute.xlu1 %7516  ;;  %v13002_v45 = vpop.permute.xlu0 %7544 }
 0xc90   : > { %v7755_v35 = vpop.permute.xlu1 %7754  ;;  %v13004_v50 = vpop.permute.xlu0 %7782 }
 0xc94   : > { %v13006_v36 = vpop.permute.xlu1 %6838  ;;  %v6831_v34 = vpop.permute.xlu0 %6830 }
 0xc98   : > { %v7525_v27 = vpop.permute.xlu1 %7524  ;;  %v13008_v59 = vpop.permute.xlu0 %7070 }
 0xc99   : > { %v7558_v58 = vsel %vm948_vm6, %v12709_v4, %v7525_v27 }
 0xc9a   : > { %v7559_v0 = vsel %vm950_vm7, %v7558_v58, %v7529_v48 }
 0xc9c   : > { %v7497_v43 = vpop.permute.xlu1 %7496  ;;  %v13010_v12 = vpop.permute.xlu0 %6802 }
 0xc9d   : > { %v7551_v60 = vsel %vm948_vm6, %v12735_v6, %v7497_v43 }
 0xc9e   : > { %v7552_v14 = vsel %vm950_vm7, %v7551_v60, %v7501_v39 }
 0xca0   : > { %v7735_v13 = vpop.permute.xlu1 %7734  ;;  %v13012_v56 = vpop.permute.xlu0 %7042 }
 0xca1   : > { %v7789_v16 = vsel %vm948_vm6, %v12745_v2, %v7735_v13 }
 0xca2   : > { %v7790_v47 = vsel %vm950_vm7, %v7789_v16, %v7739_v17 }
 0xca4   : > { %v7051_v9 = vpop.permute.xlu1 %7050  ;;  %v13014_v52 = vpop.permute.xlu0 %6810 }
 0xca5   : > { %v7084_v51 = vsel %vm948_vm6, %v12782_v62, %v7051_v9 }
 0xca6   : > { %v7085_v31 = vsel %vm950_vm7, %v7084_v51, %v7055_v20 }
 0xca8   : > { %v7023_v32 = vpop.permute.xlu1 %7022  ;;  %v7763_v40 = vpop.permute.xlu0 %7762 }
 0xca9   : > { %v7796_v18 = vsel %vm948_vm6, %v12805_v28, %v7763_v40  ;;  %v7077_v39 = vsel %vm948_vm6, %v12815_v19, %v7023_v32 }
 0xcaa   : > { %v7797_v22 = vsel %vm950_vm7, %v7796_v18, %v7767_v33  ;;  %v7078_v48 = vsel %vm950_vm7, %v7077_v39, %v7027_v3 }
 0xcac   : > { %v7505_v54 = vpop.permute.xlu1 %7504  ;;  %v7533_v5 = vpop.permute.xlu0 %7532 }
 0xcad   : > { %v7553_v42 = vsel %vm952_vm8, %v7552_v14, %v7505_v54  ;;  %v7560_v29 = vsel %vm952_vm8, %v7559_v0, %v7533_v5 }
 0xcae   : > { %v7554_v4 = vsel %vm954_vm9, %v7553_v42, %v7509_v1  ;;  %v7561_v6 = vsel %vm954_vm9, %v7560_v29, %v7537_v24 }
 0xcb0   : > { %v7743_v55 = vpop.permute.xlu1 %7742  ;;  %v7771_v49 = vpop.permute.xlu0 %7770 }
 0xcb1   : > { %v7791_v11 = vsel %vm952_vm8, %v7790_v47, %v7743_v55  ;;  %v7798_v2 = vsel %vm952_vm8, %v7797_v22, %v7771_v49  ;;  %v13590_v55 = vld [vmem:[#allocation22_spill] sm:$0xff] }
 0xcb2   : > { %v7792_v28 = vsel %vm954_vm9, %v7791_v11, %v7747_v15  ;;  %v7799_v21 = vsel %vm954_vm9, %v7798_v2, %v7775_v26 }
 0xcb4   : > { %v6791_v44 = vpop.permute.xlu1 %6790  ;;  %v6819_v38 = vpop.permute.xlu0 %6818 }
 0xcb5   : > { %v6852_v19 = vsel %vm948_vm6, %v12855_v57, %v6819_v38  ;;  %v6845_v16 = vsel %vm948_vm6, %v12852_v37, %v6791_v44  ;;  %v13591_v37 = vld [vmem:[#allocation9_spill] sm:$0xff]  ;;  %v13593_v38 = vld [vmem:[#allocation20_spill] sm:$0xff] }
 0xcb6   : > { %v6853_v26 = vsel %vm950_vm7, %v6852_v19, %v6823_v25  ;;  %v5896_v22 = vsel %vm948_vm6, %v13591_v37, %v13590_v55 }
 0xcb8   : > { %v7031_v41 = vpop.permute.xlu1 %7030  ;;  %v7059_v63 = vpop.permute.xlu0 %7058 }
 0xcb9   : > { %v7079_v30 = vsel %vm952_vm8, %v7078_v48, %v7031_v41  ;;  %v7086_v7 = vsel %vm952_vm8, %v7085_v31, %v7059_v63  ;;  %v13594_v63 = vld [vmem:[#allocation30_spill] sm:$0xff] }
 0xcba   : > { %v7080_v10 = vsel %vm954_vm9, %v7079_v30, %v7035_v53  ;;  %v7087_v17 = vsel %vm954_vm9, %v7086_v7, %v7063_v8  ;;  %v13595_v30 = vld [vmem:[#allocation25_spill] sm:$0xff] }
 0xcbb   : > { %v5889_v7 = vsel %vm948_vm6, %v13595_v30, %v13594_v63 }
 0xcbc   : > { %v7513_v33 = vpop.permute.xlu1 %7512  ;;  %v7541_v1 = vpop.permute.xlu0 %7540 }
 0xcbd   : > { %v7555_v9 = vsel %vm956_vm10, %v7554_v4, %v7513_v33  ;;  %v7562_v32 = vsel %vm956_vm10, %v7561_v6, %v7541_v1  ;;  %v6846_v4 = vsel %vm950_vm7, %v6845_v16, %v12998_v61  ;;  %v7807_v16 = vld [vmem:[#allocation3 + $0x18] sm:$0xff] }
 0xcbe   : > { %v7556_v57 = vsel %vm958_vm11, %v7555_v9, %v13000_v46 }
 0xcc0   : > { %v7751_v62 = vpop.permute.xlu1 %7750  ;;  %v7779_v24 = vpop.permute.xlu0 %7778 }
 0xcc1   : > { %v7793_v3 = vsel %vm956_vm10, %v7792_v28, %v7751_v62  ;;  %v7800_v25 = vsel %vm956_vm10, %v7799_v21, %v7779_v24  ;;  %v13597_v24 = vld [vmem:[#allocation48_spill] sm:$0xff] }
 0xcc2   : > { %v7794_v20 = vsel %vm958_vm11, %v7793_v3, %v7755_v35  ;;  %v7563_v35 = vsel %vm958_vm11, %v7562_v32, %v13002_v45  ;;  %v7801_v5 = vsel %vm958_vm11, %v7800_v25, %v13004_v50 }
 0xcc4   : > { %v6799_v15 = vpop.permute.xlu1 %6798  ;;  %v6827_v27 = vpop.permute.xlu0 %6826 }
 0xcc5   : > { %v6854_v43 = vsel %vm952_vm8, %v6853_v26, %v6827_v27  ;;  %v6847_v49 = vsel %vm952_vm8, %v6846_v4, %v6799_v15  ;;  %v13598_v26 = vld [vmem:[#allocation43_spill] sm:$0xff] }
 0xcc6   : > { %v6855_v53 = vsel %vm954_vm9, %v6854_v43, %v6831_v34  ;;  %v5890_v27 = vsel %vm950_vm7, %v5889_v7, %v13598_v26 }
 0xcc8   : > { %v7039_v8 = vpop.permute.xlu1 %7038  ;;  %v7067_v13 = vpop.permute.xlu0 %7066 }
 0xcc9   : > { %v7088_v45 = vsel %vm956_vm10, %v7087_v17, %v7067_v13  ;;  %v7081_v39 = vsel %vm956_vm10, %v7080_v10, %v7039_v8  ;;  %v13596_v17 = vld [vmem:[#allocation28_spill] sm:$0xff]  ;;  %v13600_v13 = vld [vmem:[#allocation17_spill] sm:$0xff] }
 0xcca   : > { %v7089_v50 = vsel %vm958_vm11, %v7088_v45, %v13008_v59  ;;  %v6848_v59 = vsel %vm954_vm9, %v6847_v49, %v13010_v12  ;;  %v7082_v10 = vsel %vm958_vm11, %v7081_v39, %v13012_v56 }
 0xccc   : > { %v7521_v40 = vpop.permute.xlu1 %7520  ;;  %v7549_v58 = vpop.permute.xlu0 %7548 }
 0xccd   : > { %v7557_v60 = vsel %vm960_vm12, %v7556_v57, %v7521_v40  ;;  %v7564_v34 = vsel %vm960_vm12, %v7563_v35, %v7549_v58  ;;  %v13601_v58 = vld [vmem:[#allocation18_spill] sm:$0xff] }
 0xcce   : > { %v7567_v14 = vrot.slane %v7557_v60, 4  ;;  %v7568_v54 = vrot.slane %v7564_v34, 4  ;;  %v13602_v60 = vld [vmem:[#allocation11_spill] sm:$0xff] }
 0xcd0   : > { %7571 = vst [vmem:[#allocation3 + $0x8] sm:$0xf0] %v7567_v14  ;;  %7572 = vst [vmem:[#allocation3 + $0x20] sm:$0xf0] %v7568_v54  ;;  %v6835_v0 = vpop.permute.xlu1 %6834  ;;  %v7787_v46 = vpop.permute.xlu0 %7786 }
 0xcd1   : > { %v6856_v18 = vsel %vm956_vm10, %v6855_v53, %v6835_v0  ;;  %v7802_v42 = vsel %vm960_vm12, %v7801_v5, %v7787_v46  ;;  %v13599_v53 = vld [vmem:[#allocation47_spill] sm:$0xff] }
 0xcd2   : > { %7804 = vst [vmem:[#allocation3 + $0x38] sm:$0xf] %v7802_v42  ;;  %v6857_v29 = vsel %vm958_vm11, %v6856_v18, %v13006_v36  ;;  %v13592_v36 = vld [vmem:[#allocation26_spill] sm:$0xff]  ;;  %v5891_v56 = vsel %vm952_vm8, %v5890_v27, %v13599_v53  ;;  %v7808_v46 = vld [vmem:[#allocation3 + $0x10] sm:$0xff]  ;;  %v8187_v18 = vld [vmem:[%s13178_s7 + $0x4] sm:$0xf] }
 0xcd3   : > { %v5897_v61 = vsel %vm950_vm7, %v5896_v22, %v13592_v36  ;;  %v5892_v25 = vsel %vm954_vm9, %v5891_v56, %v13601_v58  ;;  %v8192_v22 = vld [vmem:[%s13180_s9 + $0x4] sm:$0xf]  ;;  %v13604_v36 = vld [vmem:[#allocation24_spill] sm:$0xff] }
 0xcd4   : > { %v7075_v6 = vpop.permute.xlu1 %7074  ;;  %v7759_v47 = vpop.permute.xlu0 %7758  ;;  %v5898_v51 = vsel %vm952_vm8, %v5897_v61, %v13593_v38  ;;  %v5893_v34 = vsel %vm956_vm10, %v5892_v25, %v13602_v60  ;;  %v7995_v38 = vld [vmem:[%s13182_s11] sm:$0xf] }
 0xcd5   : > { %v7090_v11 = vsel %vm960_vm12, %v7089_v50, %v7075_v6  ;;  %v7795_v2 = vsel %vm960_vm12, %v7794_v20, %v7759_v47  ;;  %v5899_v12 = vsel %vm954_vm9, %v5898_v51, %v13596_v17 }
 0xcd6   : > { %v7094_v28 = vrot.slane %v7090_v11, 4  ;;  %7803 = vst [vmem:[#allocation3 + $0x40] sm:$0xf] %v7795_v2  ;;  %v5900_v19 = vsel %vm956_vm10, %v5899_v12, %v13597_v24  ;;  %v13603_v11 = vld [vmem:[#allocation44_spill] sm:$0xff] }
 0xcd7   : > { %v7811_v8 = vld [vmem:[#allocation3 + $0x8] sm:$0xff]  ;;  %v5901_v9 = vsel %vm958_vm11, %v5900_v19, %v13600_v13 }
 0xcd8   : > { %7098 = vst [vmem:[#allocation3 + $0x28] sm:$0xf0] %v7094_v28  ;;  %v6843_v21 = vpop.permute.xlu1 %6842  ;;  %v6807_v44 = vpop.permute.xlu0 %6806 }
 0xcd9   : > { %v6858_v48 = vsel %vm960_vm12, %v6857_v29, %v6843_v21  ;;  %v6849_v41 = vsel %vm956_vm10, %v6848_v59, %v6807_v44  ;;  %v7814_v31 = vld [vmem:[#allocation3 + $0x38] sm:$0xf] }
 0xcda   : > { %6860 = vst [vmem:[#allocation3 + $0x28] sm:$0xf] %v6858_v48  ;;  %8189 = vmatprep.subr.msk.mxu0 %vm2761_vm13, %v7814_v31  ;;  %v6850_v1 = vsel %vm958_vm11, %v6849_v41, %v13014_v52  ;;  %v7812_v52 = vld [vmem:[#allocation3 + $0x20] sm:$0xff] }
 0xcdc   : > { %v6815_v33 = vpop.permute.xlu1 %6814  ;;  %v7047_v62 = vpop.permute.xlu0 %7046 }
 0xcdd   : > { %v6851_v3 = vsel %vm960_vm12, %v6850_v1, %v6815_v33  ;;  %v7083_v20 = vsel %vm960_vm12, %v7082_v10, %v7047_v62  ;;  %v7813_v15 = vld [vmem:[#allocation3 + $0x40] sm:$0xf] }
 0xcde   : > { %6859 = vst [vmem:[#allocation3 + $0x48] sm:$0xf] %v6851_v3  ;;  %v7093_v43 = vrot.slane %v7083_v20, 4  ;;  %8190 = vmatpush1.msk.msra.mxu0 %vm2761_vm13, %v7813_v15 }
 0xcdf   : > { %7853 = vmatprep.subr.mxu0 %v7812_v52 }
 0xce0   : > { %7097 = vst [vmem:[#allocation3 + $0x48] sm:$0xf0] %v7093_v43  ;;  %v5887_v32 = vpop.permute.xlu1 %5886  ;;  %7854 = vmatpush1.msra.mxu0 %v7811_v8  ;;  %v5855_v57 = vpop.permute.xlu0 %5854 }
 0xce1   : > { %v5902_v40 = vsel %vm960_vm12, %v5901_v9, %v5887_v32  ;;  %v7810_v35 = vld [vmem:[#allocation3 + $0x28] sm:$0xff]  ;;  %v5894_v14 = vsel %vm958_vm11, %v5893_v34, %v5855_v57 }
 0xce2   : > { %5904 = vst [vmem:[#allocation3] sm:$0xf] %v5902_v40  ;;  %7855 = vmatprep.subr.mxu0 %v7810_v35 }
 0xce4   : > { %v5859_v54 = vpop.permute.xlu0 %5858 }
 0xce5   : > { %v5895_v0 = vsel %vm960_vm12, %v5894_v14, %v5859_v54 }
 0xce6   : > { %5903 = vst [vmem:[#allocation3 + $0x30] sm:$0xf] %v5895_v0 }
 0xce7   : > { %v7809_v5 = vld [vmem:[#allocation3 + $0x48] sm:$0xff] }
 0xce8   : > { %7856 = vmatpush1.msra.mxu0 %v7809_v5 }
 0xce9   : > { %7857 = vmatprep.subr.mxu0 %v7808_v46  ;;  %v7806_v45 = vld [vmem:[#allocation3] sm:$0xff] }
 0xcea   : > { %7858 = vmatpush1.msra.mxu0 %v7807_v16 }
 0xceb   : > { %7859 = vmatprep.subr.mxu0 %v7806_v45 }
 0xced   : > { %v7805_v42 = vld [vmem:[#allocation3 + $0x30] sm:$0xff]  ;;  %v7818_v4 = vpop.permute.xlu1 %7817 }
 0xcee   : > { %7860 = vmatpush1.msra.mxu0 %v7805_v42 }
 0xcef   : > { %8191 = vmatmul.mubr.msk.f32.vlgmr.msra.gmra.mxu0 %vm5287_vm15, %v8187_v18 }
 0xcf1   : > { %v7991_v21 = vpop.permute.xlu0 %7990 }
 0xdaf   : > { %v7895_v29 = vpop.f32.mrf.mxu0 }
 0xdb0   : > { %v7896_v6 = vadd.f32 %v7895_v29, %v7818_v4 }
 0xdb1   : > { %v7897_v50 = vpop.f32.mrf.mxu0 }
 0xdb2   : > { %v7898_v47 = vadd.f32 %v7897_v50, %v7818_v4  ;;  %v7900_v37 = vmax.f32 %v7896_v6, 0.0 }
 0xdb4   : > { %v7901_v55 = vmax.f32 %v7898_v47, 0.0 }
 0xdb6   : > { %8193 = vmatprep.subr.msk.mxu1 %vm2761_vm13, %v7901_v55 }
 0xdb7   : > { %8194 = vmatpush1.msk.msra.mxu1 %vm2761_vm13, %v7900_v37 }
 0xdb8   : > { %8195 = vmatmul.mubr.msk.f32.vlgmr.msra.gmra.mxu1 %vm2757_vm14, %v8192_v22 }
 0xdb9   : > { %8075 = vmatprep.mubr.f32.mxu1 %v13461_v23  ;;  %v8000_v23 = vpop.permute.xlu1 %7999 }
 0xe78   : > { %v7979_v49 = vpop.f32.mrf.mxu1 }
 0xe79   : > { %v7984_v2 = vadd.f32 %v7979_v49, %v13603_v11 }
 0xe7a   : > { %v7981_v28 = vpop.f32.mrf.mxu1 }
 0xe7b   : > { %v7985_v61 = vadd.f32 %v7981_v28, %v13604_v36  ;;  %v7993_v44 = vadd.f32 %v7991_v21, %v7984_v2 }
 0xe7d   : > { %v7994_v59 = vadd.f32 %v7991_v21, %v7985_v61 }
 0xe7f   : > { %8197 = vmatprep.subr.msk.mxu1 %vm2761_vm13, %v7994_v59 }
 0xe80   : > { %8198 = vmatpush1.msk.msra.mxu1 %vm2761_vm13, %v7993_v44 }
 0xe81   : > { %8199 = vmatmul.mubr.msk.f32.vlgmr.msra.gmra.mxu1 %vm2757_vm14, %v7995_v38 }
 0xf41   : > { %v8077_v51 = vpop.f32.mrf.mxu1 }
 0xf42   : > { %v8078_v39 = vadd.f32 %v8077_v51, %v8000_v23 }
 0xf43   : > { %v8079_v48 = vpop.f32.mrf.mxu1 }
 0xf44   : > { %v8080_v41 = vadd.f32 %v8079_v48, %v8000_v23  ;;  %v8082_v31 = vmax.f32 %v8078_v39, 0.0 }
 0xf46   : > { %v8083_v63 = vmax.f32 %v8080_v41, 0.0 }
 0xf48   : > { %v8086_v30 = vcombine.low %v8082_v31, %v8083_v63 }
 0xf4a   : > { %8088 = vst [vmem:[%s433_s30] sm:$0xff] %v8086_v30 }
 0xf4b   : > { %8285 = shalt.err (!%p8282_p3)
}
 0xf4c   : > { %s8286_s23 = scalar_lea.hbm %s8102_s22, 128  ;;  %s8290_s30 = scalar_lea.hbm %s13184_s13, 256 }
 0xf4d   : > { %p8287_p4 = scmp.ne.s32.totalorder %s8102_s22, %s8286_s23  ;;  %p8291_p9 = scmp.lt.s32.totalorder %s8102_s22, %s13184_s13 }
 0xf4e   : > { %p8292_p10 = scmp.lt.s32.totalorder %s8290_s30, %s8286_s23 }
 0xf4f   : > { %p8288_p7 = pnand %p8287_p4, %p8459_p5 }
 0xf50   : > { %p8293_p11 = por %p8292_p10, %p8291_p9 }
 0xf51   : > { %p8289_p8 = pneg %p8288_p7 }
 0xf53   : > { %p8294_p12 = pnand %p8293_p11, %p8289_p8 }
 0xf55   : > { %8297 = shalt.err (!%p8294_p12)
}
 0xf56   : > { %8207 = dma.vmem_to_hbm [thread:$0]  (%p8459_p5), %s8105_s15, 128, %s8102_s22, %s8090_s16  }
 0xf57 PF: > { %p8213_p13 = scmp.ge.s32.totalorder %s8332_s28, 2  ;;  %s8116_s0 = sand.u32 1, %s8320_s25  }
 0xf58   : > { %s8117_s1 = scalar_lea.sflag [#allocation5], %s8116_s0 }
 0xf59   : > { %p8210_p0 = pnand %p8213_p13, %p8463_p6 }
 0xf5b   : > { %p8211_p1 = pneg %p8210_p0 }
 0xf5d   : > { %8315 = dma.done.wait (%p8211_p1), %s8117_s1, 128  }
 0xf5e   : > { %8317 = vsyncadd (%p8211_p1), %s8117_s1, 4294967168  ;;  %s13605_s21 = sld [smem:[#allocation7_spill]]  ;;  %p23_p2 = scmp.ge.s32.totalorder %s8446_s14, 4  }
 0xf5f   : > { %s13606_s27 = sld [smem:[#allocation8_spill]]  ;;  %s13607_s25 = smov %s8324_s26 }
 0xf60   : > { %s13609_s28 = smov %s8446_s14  ;;  %25 = sbr.rel (!%p23_p2) target bundleno = 6 (0x6), region = 111 }
 0xf64   : > { %s13608_s26 = smov %s13605_s21 }
 0xf65   :  { %8122 = vsyncpa [#allocation5], 1 }
 0xf66   :  { %8124 = vsyncpa [#allocation5 + $0x1], 1 }

</bundles_post_ra>
